<compile_context>
chip_gen: v5e
topology: v5e:2x2
jax: 0.10.0
libtpu: 0.0.40
codegen_flags: <defaults>
</compile_context>

<pallas_src>
import jax
import jax.numpy as jnp
import numpy as np
from jax import lax
from jax.experimental import pallas as pl
from jax.experimental.pallas import tpu as pltpu

THRESHOLD = 0.5
NEG_POS_RATIO = 3
ALPHA = 1.0

# prior_pack rows
(R_XMIN, R_YMIN, R_XMAX, R_YMAX, R_AREA, R_CX, R_CY,
 R_IPW10, R_IPH10, R_LOGPW, R_LOGPH, R_PAD) = range(12)
# boxes_feat columns
(F_XMIN, F_YMIN, F_XMAX, F_YMAX, F_AREA, F_CX, F_CY,
 F_LOGW, F_LOGH, F_LABEL) = range(10)


def cxcy_to_xy(cxcy):
    return jnp.concatenate(
        [cxcy[:, :2] - cxcy[:, 2:] / 2.0, cxcy[:, :2] + cxcy[:, 2:] / 2.0], axis=1
    )


def _pick_tb(batch):
    """Largest per-step batch <= 8 that keeps >= 2 grid steps (v7x has 2 TCs)."""
    tb = 1
    for cand in range(1, min(8, batch) + 1):
        if batch % cand == 0 and (batch // cand >= 2 or batch == 1):
            tb = cand
    return tb


def _multibox_target_kernel(feat_ref, prior_ref, locs_ref, scores_ref, out_ref):
    feat = feat_ref[...]                                    # (TB, O, 10)
    pri = prior_ref[...]                                    # (12, P)
    # In-kernel minor-dim transposes (XLU, idle here) replace the host-side
    # HBM transpose pass over the prediction tensors.
    locs = jnp.transpose(locs_ref[...], (0, 2, 1))          # (TB, 4, P)
    scores = jnp.transpose(scores_ref[...], (0, 2, 1))      # (TB, C, P)

    TB, O, _ = feat.shape
    P = pri.shape[1]
    C = scores.shape[1]

    def prow(r):           # (1, 1, P) per-prior row, broadcasts over (TB, O)
        return pri[r:r + 1, :].reshape(1, 1, P)

    def prow2(r):          # (1, P) per-prior row, broadcasts over TB sublanes
        return pri[r:r + 1, :]

    def bcol(c):           # (TB, O, 1) per-object column, broadcasts over lanes
        return feat[:, :, c:c + 1]

    # Hoisted iotas: one materialization per TB-batched grid step.
    obj_iota = lax.broadcasted_iota(jnp.int32, (TB, O, P), 1)
    prior_iota = lax.broadcasted_iota(jnp.int32, (TB, O, P), 2)
    class_iota = lax.broadcasted_iota(jnp.int32, (TB, C, P), 1)

    # ---- Jaccard overlap (TB, O, P): objects on sublanes, priors on lanes ----
    inter_w = jnp.maximum(
        jnp.minimum(prow(R_XMAX), bcol(F_XMAX)) - jnp.maximum(prow(R_XMIN), bcol(F_XMIN)), 0.0)
    inter_h = jnp.maximum(
        jnp.minimum(prow(R_YMAX), bcol(F_YMAX)) - jnp.maximum(prow(R_YMIN), bcol(F_YMIN)), 0.0)
    inter = inter_w * inter_h
    union = prow(R_AREA) + bcol(F_AREA) - inter
    # EUP approx reciprocal + one Newton step (~1e-7 rel. err): IoU only feeds
    # comparisons / the 0.5 threshold, so this is safe and keeps the VPU free.
    rcp = pl.reciprocal(union, approx=True)
    rcp = rcp * (2.0 - union * rcp)
    iou = inter * rcp

    # best object per prior (sublane reduce over O; first max on ties) -> (TB, P)
    overlap_pp = jnp.max(iou, axis=1)
    object_pp = jnp.min(
        jnp.where(iou >= overlap_pp[:, None, :], obj_iota, O), axis=1)

    # best prior per object (cross-lane reduce over P; first max on ties) -> (TB, O, 1)
    best_po = jnp.max(iou, axis=2, keepdims=True)
    prior_po = jnp.min(jnp.where(iou >= best_po, prior_iota, P), axis=2, keepdims=True)

    # force-match each object's best prior to that object (highest object index wins)
    match_mat = (prior_iota == prior_po)                                     # (TB, O, P)
    has_match = jnp.max(match_mat.astype(jnp.int32), axis=1) > 0             # (TB, P)
    forced_obj = jnp.max(jnp.where(match_mat, obj_iota, -1), axis=1)         # (TB, P)
    object_pp = jnp.where(has_match, forced_obj, object_pp)
    overlap_pp = jnp.where(has_match, jnp.float32(1.0), overlap_pp)

    # one-hot gather of the matched object's features (O<=8: cheap sublane reduce)
    onehot_f = (object_pp[:, None, :] == obj_iota).astype(jnp.float32)       # (TB, O, P)

    def gather(c):
        return jnp.sum(onehot_f * bcol(c), axis=1)                           # (TB, P)

    cx = gather(F_CX)
    cy = gather(F_CY)
    logw = gather(F_LOGW)
    logh = gather(F_LOGH)
    label_g = gather(F_LABEL)   # exact: label ids << 2^24 through f32 one-hot

    true_cls = jnp.where(overlap_pp < THRESHOLD, 0.0, label_g)               # (TB, P)
    true_cls_i = true_cls.astype(jnp.int32)
    pos_f = (true_cls_i != 0).astype(jnp.float32)

    # cxcy -> gcxgcy with hoisted prior constants (no divides / logs here)
    g_cx = (cx - prow2(R_CX)) * prow2(R_IPW10)
    g_cy = (cy - prow2(R_CY)) * prow2(R_IPH10)
    g_w = (logw - prow2(R_LOGPW)) * 5.0
    g_h = (logh - prow2(R_LOGPH)) * 5.0
    g_all = jnp.stack([g_cx, g_cy, g_w, g_h], axis=1)                        # (TB, 4, P)
    locabs = jnp.sum(jnp.abs(locs - g_all), axis=1) * pos_f                  # (TB, P)

    # per-prior cross-entropy: log-sum-exp over the C sublanes -> (TB, P)
    row_max = jnp.max(scores, axis=1)
    lse = jnp.log(jnp.sum(jnp.exp(scores - row_max[:, None, :]), axis=1)) + row_max
    onehot_true = (class_iota == true_cls_i[:, None, :]).astype(jnp.float32)  # (TB, C, P)
    logit_true = jnp.sum(scores * onehot_true, axis=1)
    ce = lse - logit_true                                                     # (TB, P)

    # single packed lane-dense store: rows [ce, pos, masked |L1| sum]
    out_ref[...] = jnp.stack([ce, pos_f, locabs], axis=1)                     # (TB, 3, P)


def _combine(ce, pos, locabs):
    """Hard-negative mining + final reduction (shared by kernel path and reference)."""
    P = ce.shape[1]
    n_positives = pos.sum(axis=1)                        # (B,)
    n_pos_total = jnp.maximum(n_positives.sum(), 1.0)    # guard empty-positive batches
    loc_loss = locabs.sum() / (4.0 * n_pos_total)        # nn.L1Loss() mean over (n_pos, 4)
    conf_pos_sum = (ce * pos).sum()
    conf_neg = ce * (1.0 - pos)
    # TODO(synk): per-row descending sort for hard-negative mining has no clean
    # Pallas TPU primitive; done with jnp.sort here (glue).
    conf_neg_sorted = -jnp.sort(-conf_neg, axis=1)
    hard_mask = (jnp.arange(P)[None, :]
                 < (NEG_POS_RATIO * n_positives)[:, None]).astype(jnp.float32)
    conf_hard_sum = (conf_neg_sorted * hard_mask).sum()
    conf_loss = (conf_hard_sum + conf_pos_sum) / n_pos_total
    return conf_loss + ALPHA * loc_loss


def multibox_loss(predicted_locs, predicted_scores, boxes, labels, priors_cxcy):
    B, P, _ = predicted_locs.shape
    C = predicted_scores.shape[2]
    O = boxes.shape[1]
    TB = _pick_tb(B)

    priors_cxcy = priors_cxcy.astype(jnp.float32)
    priors_xy = cxcy_to_xy(priors_cxcy)

    # Hoisted per-prior constants packed with P on the lane axis; the constant
    # index_map keeps this block resident across the batch grid.
    p_xmin, p_ymin, p_xmax, p_ymax = (priors_xy[:, k] for k in range(4))
    p_cx, p_cy, p_w, p_h = (priors_cxcy[:, k] for k in range(4))
    prior_pack = jnp.stack([
        p_xmin, p_ymin, p_xmax, p_ymax,
        (p_xmax - p_xmin) * (p_ymax - p_ymin),
        p_cx, p_cy, 10.0 / p_w, 10.0 / p_h,
        jnp.log(p_w), jnp.log(p_h), jnp.zeros_like(p_w)], axis=0)               # (12, P)

    # Per-object features: coords/area for IoU, cx/cy/log-size/label for the gather.
    # NOTE: all O boxes are assumed valid; padded/degenerate boxes would need a
    # valid-object mask before force-matching (PyTorch takes variable-length lists).
    bx = boxes.astype(jnp.float32)
    b_xmin, b_ymin, b_xmax, b_ymax = bx[..., 0], bx[..., 1], bx[..., 2], bx[..., 3]
    b_w = jnp.maximum(b_xmax - b_xmin, 1e-10)     # guard degenerate boxes for log
    b_h = jnp.maximum(b_ymax - b_ymin, 1e-10)
    boxes_feat = jnp.stack([
        b_xmin, b_ymin, b_xmax, b_ymax,
        (b_xmax - b_xmin) * (b_ymax - b_ymin),
        (b_xmin + b_xmax) * 0.5, (b_ymin + b_ymax) * 0.5,
        jnp.log(b_w), jnp.log(b_h),
        labels.astype(jnp.float32)], axis=2)                                    # (B, O, 10)

    # Predictions are passed in their natural layouts; transposed in-kernel.
    locs_nat = predicted_locs.astype(jnp.float32)                               # (B, P, 4)
    scores_nat = predicted_scores.astype(jnp.float32)                           # (B, P, C)

    packed = pl.pallas_call(
        _multibox_target_kernel,
        out_shape=jax.ShapeDtypeStruct((B, 3, P), jnp.float32),
        grid_spec=pltpu.PrefetchScalarGridSpec(
            num_scalar_prefetch=0,
            grid=(B // TB,),
            in_specs=[
                pl.BlockSpec((TB, O, 10), lambda g: (g, 0, 0)),
                pl.BlockSpec((12, P), lambda g: (0, 0)),
                pl.BlockSpec((TB, P, 4), lambda g: (g, 0, 0)),
                pl.BlockSpec((TB, P, C), lambda g: (g, 0, 0)),
            ],
            out_specs=pl.BlockSpec((TB, 3, P), lambda g: (g, 0, 0))),
        compiler_params=pltpu.CompilerParams(dimension_semantics=("parallel",)),
    )(boxes_feat, prior_pack, locs_nat, scores_nat)

    return _combine(packed[:, 0, :], packed[:, 1, :], packed[:, 2, :])


def reference_loss(predicted_locs, predicted_scores, boxes, labels, priors_cxcy):
    """Pure-JAX mirror of the PyTorch forward (same tie-breaking as the kernel)."""
    B, P, _ = predicted_locs.shape
    O = boxes.shape[1]
    priors_cxcy = priors_cxcy.astype(jnp.float32)
    priors_xy = cxcy_to_xy(priors_cxcy)
    ces, poss, locabss = [], [], []
    for i in range(B):
        bx = boxes[i].astype(jnp.float32)
        lb = labels[i].astype(jnp.int32)
        ixmin = jnp.maximum(priors_xy[:, None, 0], bx[None, :, 0])
        iymin = jnp.maximum(priors_xy[:, None, 1], bx[None, :, 1])
        ixmax = jnp.minimum(priors_xy[:, None, 2], bx[None, :, 2])
        iymax = jnp.minimum(priors_xy[:, None, 3], bx[None, :, 3])
        inter = jnp.clip(ixmax - ixmin, 0.0) * jnp.clip(iymax - iymin, 0.0)       # (P, O)
        area_b = (bx[:, 2] - bx[:, 0]) * (bx[:, 3] - bx[:, 1])
        area_p = (priors_xy[:, 2] - priors_xy[:, 0]) * (priors_xy[:, 3] - priors_xy[:, 1])
        iou = inter / (area_p[:, None] + area_b[None, :] - inter)

        obj_idx = jnp.arange(O)[None, :]
        prior_idx = jnp.arange(P)[:, None]
        ovl_pp = iou.max(axis=1)
        obj_pp = jnp.min(jnp.where(iou >= ovl_pp[:, None], obj_idx, O), axis=1)
        prior_po = jnp.min(jnp.where(iou >= iou.max(axis=0, keepdims=True), prior_idx, P),
                           axis=0)                                                 # (O,)
        match_mat = (prior_idx == prior_po[None, :])
        has_match = match_mat.any(axis=1)
        forced = jnp.max(jnp.where(match_mat, obj_idx, -1), axis=1)
        obj_pp = jnp.where(has_match, forced, obj_pp)
        ovl_pp = jnp.where(has_match, 1.0, ovl_pp)

        lab_pp = lb[obj_pp]
        true_cls = jnp.where(ovl_pp < THRESHOLD, 0, lab_pp)                       # (P,)
        mb = bx[obj_pp]                                                           # (P, 4)
        cxcy = jnp.stack([(mb[:, 0] + mb[:, 2]) / 2, (mb[:, 1] + mb[:, 3]) / 2,
                          mb[:, 2] - mb[:, 0], mb[:, 3] - mb[:, 1]], axis=1)
        g = jnp.concatenate(
            [(cxcy[:, :2] - priors_cxcy[:, :2]) / (priors_cxcy[:, 2:] / 10.0),
             jnp.log(cxcy[:, 2:] / priors_cxcy[:, 2:]) * 5.0], axis=1)
        pos = (true_cls != 0).astype(jnp.float32)
        locabs = jnp.abs(predicted_locs[i].astype(jnp.float32) - g).sum(axis=1) * pos
        logp = jax.nn.log_softmax(predicted_scores[i].astype(jnp.float32), axis=1)
        ce = -jnp.take_along_axis(logp, true_cls[:, None], axis=1)[:, 0]
        ces.append(ce); poss.append(pos); locabss.append(locabs)
    return _combine(jnp.stack(ces), jnp.stack(poss), jnp.stack(locabss))


def make_priors():
    xs = (jnp.arange(8, dtype=jnp.float32) + 0.5) / 8.0
    cx, cy = jnp.meshgrid(xs, xs, indexing="ij")
    cx = cx.reshape(-1)
    cy = cy.reshape(-1)
    p1 = jnp.stack([cx, cy, jnp.full_like(cx, 0.20), jnp.full_like(cx, 0.20)], axis=1)
    p2 = jnp.stack([cx, cy, jnp.full_like(cx, 0.35), jnp.full_like(cx, 0.15)], axis=1)
    return jnp.concatenate([p1, p2], axis=0)   # (128, 4)


if __name__ == "__main__":
    B, P, C, O = 16, 128, 8, 3      # TB = 8 -> 2 grid steps (v7x megacore friendly)
    key = jax.random.PRNGKey(0)
    k1, k2, k3, k4, k5, k6 = jax.random.split(key, 6)

    priors_cxcy = make_priors()                                        # (P, 4)

    bcx = jax.random.uniform(k1, (B, O), minval=0.30, maxval=0.70)
    bcy = jax.random.uniform(k2, (B, O), minval=0.30, maxval=0.70)
    bw = jax.random.uniform(k3, (B, O), minval=0.15, maxval=0.35)
    bh = jax.random.uniform(k4, (B, O), minval=0.15, maxval=0.35)
    boxes = jnp.stack([bcx - bw / 2, bcy - bh / 2, bcx + bw / 2, bcy + bh / 2],
                      axis=2).astype(jnp.float32)                      # (B, O, 4)
    labels = jax.random.randint(k5, (B, O), minval=1, maxval=C)        # (B, O)

    kl, ks = jax.random.split(k6)
    predicted_locs = (0.5 * jax.random.normal(kl, (B, P, 4))).astype(jnp.float32)
    predicted_scores = jax.random.normal(ks, (B, P, C)).astype(jnp.float32)

    loss = multibox_loss(predicted_locs, predicted_scores, boxes, labels, priors_cxcy)
    loss = jax.block_until_ready(loss)

    ref = reference_loss(predicted_locs, predicted_scores, boxes, labels, priors_cxcy)
    np.testing.assert_allclose(np.asarray(loss), np.asarray(ref), rtol=1e-4, atol=1e-4)

    print("KERNEL_OK")
</pallas_src>

<mosaic_0001>
module attributes {stable_mosaic.version = 11 : i64} {
  func.func @_multibox_target_kernel(%arg0: i32, %arg1: memref<8x3x10xf32, #tpu.memory_space<vmem>>, %arg2: memref<12x128xf32, #tpu.memory_space<vmem>>, %arg3: memref<8x128x4xf32, #tpu.memory_space<vmem>>, %arg4: memref<8x128x8xf32, #tpu.memory_space<vmem>>, %arg5: memref<8x3x128xf32, #tpu.memory_space<vmem>>) attributes {dimension_semantics = [#tpu.dimension_semantics<parallel>], iteration_bounds = array<i64: 2>, scalar_prefetch = 0 : i64, scratch_operands = 0 : i64, tpu.core_type = #tpu.core_type<tc>, window_params = [{transform_indices = @transform_0, window_bounds = array<i64: 8, 3, 10>}, {pipeline_mode = #tpu.pipeline_mode<synchronous>, transform_indices = @transform_1, window_bounds = array<i64: 12, 128>}, {transform_indices = @transform_2, window_bounds = array<i64: 8, 128, 4>}, {transform_indices = @transform_3, window_bounds = array<i64: 8, 128, 8>}, {transform_indices = @transform_4, window_bounds = array<i64: 8, 3, 128>}]} {
    %c0 = arith.constant 0 : index
    %c0_0 = arith.constant 0 : index
    %c0_1 = arith.constant 0 : index
    %0 = vector.load %arg1[%c0, %c0_0, %c0_1] : memref<8x3x10xf32, #tpu.memory_space<vmem>>, vector<8x3x10xf32>
    %c0_2 = arith.constant 0 : index
    %c0_3 = arith.constant 0 : index
    %1 = vector.load %arg2[%c0_2, %c0_3] : memref<12x128xf32, #tpu.memory_space<vmem>>, vector<12x128xf32>
    %c0_4 = arith.constant 0 : index
    %c0_5 = arith.constant 0 : index
    %c0_6 = arith.constant 0 : index
    %2 = vector.load %arg3[%c0_4, %c0_5, %c0_6] : memref<8x128x4xf32, #tpu.memory_space<vmem>>, vector<8x128x4xf32>
    %3 = tpu.transpose %2, [0, 2, 1] : vector<8x128x4xf32> -> vector<8x4x128xf32>
    %c0_7 = arith.constant 0 : index
    %c0_8 = arith.constant 0 : index
    %c0_9 = arith.constant 0 : index
    %4 = vector.load %arg4[%c0_7, %c0_8, %c0_9] : memref<8x128x8xf32, #tpu.memory_space<vmem>>, vector<8x128x8xf32>
    %5 = tpu.transpose %4, [0, 2, 1] : vector<8x128x8xf32> -> vector<8x8x128xf32>
    %6 = tpu.iota {dimensions = array<i32: 1>} : vector<8x3x128xi32>
    %7 = tpu.iota {dimensions = array<i32: 2>} : vector<8x3x128xi32>
    %8 = tpu.iota {dimensions = array<i32: 1>} : vector<8x8x128xi32>
    %9 = vector.extract_strided_slice %1 {offsets = [2, 0], sizes = [1, 128], strides = [1, 1]} : vector<12x128xf32> to vector<1x128xf32>
    %10 = vector.shape_cast %9 : vector<1x128xf32> to vector<1x1x128xf32>
    %11 = vector.extract_strided_slice %0 {offsets = [0, 0, 2], sizes = [8, 3, 1], strides = [1, 1, 1]} : vector<8x3x10xf32> to vector<8x3x1xf32>
    %12 = vector.broadcast %10 : vector<1x1x128xf32> to vector<8x3x128xf32>
    %13 = vector.broadcast %11 : vector<8x3x1xf32> to vector<8x3x128xf32>
    %14 = arith.minimumf %12, %13 : vector<8x3x128xf32>
    %15 = vector.extract_strided_slice %1 {offsets = [0, 0], sizes = [1, 128], strides = [1, 1]} : vector<12x128xf32> to vector<1x128xf32>
    %16 = vector.shape_cast %15 : vector<1x128xf32> to vector<1x1x128xf32>
    %17 = vector.extract_strided_slice %0 {offsets = [0, 0, 0], sizes = [8, 3, 1], strides = [1, 1, 1]} : vector<8x3x10xf32> to vector<8x3x1xf32>
    %18 = vector.broadcast %16 : vector<1x1x128xf32> to vector<8x3x128xf32>
    %19 = vector.broadcast %17 : vector<8x3x1xf32> to vector<8x3x128xf32>
    %20 = arith.maximumf %18, %19 : vector<8x3x128xf32>
    %21 = arith.subf %14, %20 : vector<8x3x128xf32>
    %cst = arith.constant 0.000000e+00 : f32
    %22 = vector.broadcast %cst : f32 to vector<8x3x128xf32>
    %23 = arith.maximumf %21, %22 : vector<8x3x128xf32>
    %24 = vector.extract_strided_slice %1 {offsets = [3, 0], sizes = [1, 128], strides = [1, 1]} : vector<12x128xf32> to vector<1x128xf32>
    %25 = vector.shape_cast %24 : vector<1x128xf32> to vector<1x1x128xf32>
    %26 = vector.extract_strided_slice %0 {offsets = [0, 0, 3], sizes = [8, 3, 1], strides = [1, 1, 1]} : vector<8x3x10xf32> to vector<8x3x1xf32>
    %27 = vector.broadcast %25 : vector<1x1x128xf32> to vector<8x3x128xf32>
    %28 = vector.broadcast %26 : vector<8x3x1xf32> to vector<8x3x128xf32>
    %29 = arith.minimumf %27, %28 : vector<8x3x128xf32>
    %30 = vector.extract_strided_slice %1 {offsets = [1, 0], sizes = [1, 128], strides = [1, 1]} : vector<12x128xf32> to vector<1x128xf32>
    %31 = vector.shape_cast %30 : vector<1x128xf32> to vector<1x1x128xf32>
    %32 = vector.extract_strided_slice %0 {offsets = [0, 0, 1], sizes = [8, 3, 1], strides = [1, 1, 1]} : vector<8x3x10xf32> to vector<8x3x1xf32>
    %33 = vector.broadcast %31 : vector<1x1x128xf32> to vector<8x3x128xf32>
    %34 = vector.broadcast %32 : vector<8x3x1xf32> to vector<8x3x128xf32>
    %35 = arith.maximumf %33, %34 : vector<8x3x128xf32>
    %36 = arith.subf %29, %35 : vector<8x3x128xf32>
    %cst_10 = arith.constant 0.000000e+00 : f32
    %37 = vector.broadcast %cst_10 : f32 to vector<8x3x128xf32>
    %38 = arith.maximumf %36, %37 : vector<8x3x128xf32>
    %39 = arith.mulf %23, %38 : vector<8x3x128xf32>
    %40 = vector.extract_strided_slice %1 {offsets = [4, 0], sizes = [1, 128], strides = [1, 1]} : vector<12x128xf32> to vector<1x128xf32>
    %41 = vector.shape_cast %40 : vector<1x128xf32> to vector<1x1x128xf32>
    %42 = vector.extract_strided_slice %0 {offsets = [0, 0, 4], sizes = [8, 3, 1], strides = [1, 1, 1]} : vector<8x3x10xf32> to vector<8x3x1xf32>
    %43 = vector.broadcast %41 : vector<1x1x128xf32> to vector<8x3x128xf32>
    %44 = vector.broadcast %42 : vector<8x3x1xf32> to vector<8x3x128xf32>
    %45 = arith.addf %43, %44 : vector<8x3x128xf32>
    %46 = arith.subf %45, %39 : vector<8x3x128xf32>
    %47 = tpu.reciprocal %46 {approx = true} : vector<8x3x128xf32> -> vector<8x3x128xf32>
    %48 = arith.mulf %46, %47 : vector<8x3x128xf32>
    %cst_11 = arith.constant 2.000000e+00 : f32
    %49 = vector.broadcast %cst_11 : f32 to vector<8x3x128xf32>
    %50 = arith.subf %49, %48 : vector<8x3x128xf32>
    %51 = arith.mulf %47, %50 : vector<8x3x128xf32>
    %52 = arith.mulf %39, %51 : vector<8x3x128xf32>
    %cst_12 = arith.constant dense<0xFF800000> : vector<8x128xf32>
    %53 = vector.multi_reduction <maximumf>, %52, %cst_12 [1] : vector<8x3x128xf32> to vector<8x128xf32>
    %54 = vector.shape_cast %53 : vector<8x128xf32> to vector<8x1x128xf32>
    %55 = vector.broadcast %54 : vector<8x1x128xf32> to vector<8x3x128xf32>
    %56 = arith.cmpf oge, %52, %55 : vector<8x3x128xf32>
    %c3_i32 = arith.constant 3 : i32
    %57 = vector.broadcast %c3_i32 : i32 to vector<8x3x128xi32>
    %58 = arith.select %56, %6, %57 : vector<8x3x128xi1>, vector<8x3x128xi32>
    %cst_13 = arith.constant dense<2147483647> : vector<8x128xi32>
    %59 = vector.multi_reduction <minsi>, %58, %cst_13 [1] : vector<8x3x128xi32> to vector<8x128xi32>
    %cst_14 = arith.constant dense<0xFF800000> : vector<8x3xf32>
    %60 = vector.multi_reduction <maximumf>, %52, %cst_14 [2] : vector<8x3x128xf32> to vector<8x3xf32>
    %61 = vector.shape_cast %60 : vector<8x3xf32> to vector<8x3x1xf32>
    %62 = vector.broadcast %61 : vector<8x3x1xf32> to vector<8x3x128xf32>
    %63 = arith.cmpf oge, %52, %62 : vector<8x3x128xf32>
    %c128_i32 = arith.constant 128 : i32
    %64 = vector.broadcast %c128_i32 : i32 to vector<8x3x128xi32>
    %65 = arith.select %63, %7, %64 : vector<8x3x128xi1>, vector<8x3x128xi32>
    %cst_15 = arith.constant dense<2147483647> : vector<8x3xi32>
    %66 = vector.multi_reduction <minsi>, %65, %cst_15 [2] : vector<8x3x128xi32> to vector<8x3xi32>
    %67 = vector.shape_cast %66 : vector<8x3xi32> to vector<8x3x1xi32>
    %68 = vector.broadcast %67 : vector<8x3x1xi32> to vector<8x3x128xi32>
    %69 = arith.cmpi eq, %7, %68 : vector<8x3x128xi32>
    %70 = arith.extui %69 : vector<8x3x128xi1> to vector<8x3x128xi32>
    %cst_16 = arith.constant dense<-2147483648> : vector<8x128xi32>
    %71 = vector.multi_reduction <maxsi>, %70, %cst_16 [1] : vector<8x3x128xi32> to vector<8x128xi32>
    %c0_i32 = arith.constant 0 : i32
    %72 = vector.broadcast %c0_i32 : i32 to vector<8x128xi32>
    %73 = arith.cmpi sgt, %71, %72 : vector<8x128xi32>
    %c-1_i32 = arith.constant -1 : i32
    %74 = vector.broadcast %c-1_i32 : i32 to vector<8x3x128xi32>
    %75 = arith.select %69, %6, %74 : vector<8x3x128xi1>, vector<8x3x128xi32>
    %cst_17 = arith.constant dense<-2147483648> : vector<8x128xi32>
    %76 = vector.multi_reduction <maxsi>, %75, %cst_17 [1] : vector<8x3x128xi32> to vector<8x128xi32>
    %77 = arith.select %73, %76, %59 : vector<8x128xi1>, vector<8x128xi32>
    %cst_18 = arith.constant 1.000000e+00 : f32
    %78 = vector.broadcast %cst_18 : f32 to vector<8x128xf32>
    %79 = arith.select %73, %78, %53 : vector<8x128xi1>, vector<8x128xf32>
    %80 = vector.shape_cast %77 : vector<8x128xi32> to vector<8x1x128xi32>
    %81 = vector.broadcast %80 : vector<8x1x128xi32> to vector<8x3x128xi32>
    %82 = arith.cmpi eq, %81, %6 : vector<8x3x128xi32>
    %83 = arith.extui %82 : vector<8x3x128xi1> to vector<8x3x128xi32>
    %84 = arith.sitofp %83 : vector<8x3x128xi32> to vector<8x3x128xf32>
    %85 = vector.extract_strided_slice %0 {offsets = [0, 0, 5], sizes = [8, 3, 1], strides = [1, 1, 1]} : vector<8x3x10xf32> to vector<8x3x1xf32>
    %86 = vector.broadcast %85 : vector<8x3x1xf32> to vector<8x3x128xf32>
    %87 = arith.mulf %84, %86 : vector<8x3x128xf32>
    %cst_19 = arith.constant dense<0.000000e+00> : vector<8x128xf32>
    %88 = vector.multi_reduction <add>, %87, %cst_19 [1] : vector<8x3x128xf32> to vector<8x128xf32>
    %89 = vector.extract_strided_slice %0 {offsets = [0, 0, 6], sizes = [8, 3, 1], strides = [1, 1, 1]} : vector<8x3x10xf32> to vector<8x3x1xf32>
    %90 = vector.broadcast %89 : vector<8x3x1xf32> to vector<8x3x128xf32>
    %91 = arith.mulf %84, %90 : vector<8x3x128xf32>
    %cst_20 = arith.constant dense<0.000000e+00> : vector<8x128xf32>
    %92 = vector.multi_reduction <add>, %91, %cst_20 [1] : vector<8x3x128xf32> to vector<8x128xf32>
    %93 = vector.extract_strided_slice %0 {offsets = [0, 0, 7], sizes = [8, 3, 1], strides = [1, 1, 1]} : vector<8x3x10xf32> to vector<8x3x1xf32>
    %94 = vector.broadcast %93 : vector<8x3x1xf32> to vector<8x3x128xf32>
    %95 = arith.mulf %84, %94 : vector<8x3x128xf32>
    %cst_21 = arith.constant dense<0.000000e+00> : vector<8x128xf32>
    %96 = vector.multi_reduction <add>, %95, %cst_21 [1] : vector<8x3x128xf32> to vector<8x128xf32>
    %97 = vector.extract_strided_slice %0 {offsets = [0, 0, 8], sizes = [8, 3, 1], strides = [1, 1, 1]} : vector<8x3x10xf32> to vector<8x3x1xf32>
    %98 = vector.broadcast %97 : vector<8x3x1xf32> to vector<8x3x128xf32>
    %99 = arith.mulf %84, %98 : vector<8x3x128xf32>
    %cst_22 = arith.constant dense<0.000000e+00> : vector<8x128xf32>
    %100 = vector.multi_reduction <add>, %99, %cst_22 [1] : vector<8x3x128xf32> to vector<8x128xf32>
    %101 = vector.extract_strided_slice %0 {offsets = [0, 0, 9], sizes = [8, 3, 1], strides = [1, 1, 1]} : vector<8x3x10xf32> to vector<8x3x1xf32>
    %102 = vector.broadcast %101 : vector<8x3x1xf32> to vector<8x3x128xf32>
    %103 = arith.mulf %84, %102 : vector<8x3x128xf32>
    %cst_23 = arith.constant dense<0.000000e+00> : vector<8x128xf32>
    %104 = vector.multi_reduction <add>, %103, %cst_23 [1] : vector<8x3x128xf32> to vector<8x128xf32>
    %cst_24 = arith.constant 5.000000e-01 : f32
    %105 = vector.broadcast %cst_24 : f32 to vector<8x128xf32>
    %106 = arith.cmpf olt, %79, %105 : vector<8x128xf32>
    %cst_25 = arith.constant 0.000000e+00 : f32
    %107 = vector.broadcast %cst_25 : f32 to vector<8x128xf32>
    %108 = arith.select %106, %107, %104 : vector<8x128xi1>, vector<8x128xf32>
    %109 = arith.fptosi %108 : vector<8x128xf32> to vector<8x128xi32>
    %c0_i32_26 = arith.constant 0 : i32
    %110 = vector.broadcast %c0_i32_26 : i32 to vector<8x128xi32>
    %111 = arith.cmpi ne, %109, %110 : vector<8x128xi32>
    %112 = arith.extui %111 : vector<8x128xi1> to vector<8x128xi32>
    %113 = arith.sitofp %112 : vector<8x128xi32> to vector<8x128xf32>
    %114 = vector.extract_strided_slice %1 {offsets = [5, 0], sizes = [1, 128], strides = [1, 1]} : vector<12x128xf32> to vector<1x128xf32>
    %115 = vector.broadcast %114 : vector<1x128xf32> to vector<8x128xf32>
    %116 = arith.subf %88, %115 : vector<8x128xf32>
    %117 = vector.extract_strided_slice %1 {offsets = [7, 0], sizes = [1, 128], strides = [1, 1]} : vector<12x128xf32> to vector<1x128xf32>
    %118 = vector.broadcast %117 : vector<1x128xf32> to vector<8x128xf32>
    %119 = arith.mulf %116, %118 : vector<8x128xf32>
    %120 = vector.extract_strided_slice %1 {offsets = [6, 0], sizes = [1, 128], strides = [1, 1]} : vector<12x128xf32> to vector<1x128xf32>
    %121 = vector.broadcast %120 : vector<1x128xf32> to vector<8x128xf32>
    %122 = arith.subf %92, %121 : vector<8x128xf32>
    %123 = vector.extract_strided_slice %1 {offsets = [8, 0], sizes = [1, 128], strides = [1, 1]} : vector<12x128xf32> to vector<1x128xf32>
    %124 = vector.broadcast %123 : vector<1x128xf32> to vector<8x128xf32>
    %125 = arith.mulf %122, %124 : vector<8x128xf32>
    %126 = vector.extract_strided_slice %1 {offsets = [9, 0], sizes = [1, 128], strides = [1, 1]} : vector<12x128xf32> to vector<1x128xf32>
    %127 = vector.broadcast %126 : vector<1x128xf32> to vector<8x128xf32>
    %128 = arith.subf %96, %127 : vector<8x128xf32>
    %cst_27 = arith.constant 5.000000e+00 : f32
    %129 = vector.broadcast %cst_27 : f32 to vector<8x128xf32>
    %130 = arith.mulf %128, %129 : vector<8x128xf32>
    %131 = vector.extract_strided_slice %1 {offsets = [10, 0], sizes = [1, 128], strides = [1, 1]} : vector<12x128xf32> to vector<1x128xf32>
    %132 = vector.broadcast %131 : vector<1x128xf32> to vector<8x128xf32>
    %133 = arith.subf %100, %132 : vector<8x128xf32>
    %cst_28 = arith.constant 5.000000e+00 : f32
    %134 = vector.broadcast %cst_28 : f32 to vector<8x128xf32>
    %135 = arith.mulf %133, %134 : vector<8x128xf32>
    %136 = vector.shape_cast %119 : vector<8x128xf32> to vector<8x1x128xf32>
    %137 = vector.shape_cast %125 : vector<8x128xf32> to vector<8x1x128xf32>
    %138 = vector.shape_cast %130 : vector<8x128xf32> to vector<8x1x128xf32>
    %139 = vector.shape_cast %135 : vector<8x128xf32> to vector<8x1x128xf32>
    %140 = tpu.concatenate %136, %137, %138, %139 in 1 : vector<8x1x128xf32>, vector<8x1x128xf32>, vector<8x1x128xf32>, vector<8x1x128xf32> -> vector<8x4x128xf32>
    %141 = arith.subf %3, %140 : vector<8x4x128xf32>
    %142 = math.absf %141 : vector<8x4x128xf32>
    %cst_29 = arith.constant dense<0.000000e+00> : vector<8x128xf32>
    %143 = vector.multi_reduction <add>, %142, %cst_29 [1] : vector<8x4x128xf32> to vector<8x128xf32>
    %144 = arith.mulf %143, %113 : vector<8x128xf32>
    %cst_30 = arith.constant dense<0xFF800000> : vector<8x128xf32>
    %145 = vector.multi_reduction <maximumf>, %5, %cst_30 [1] : vector<8x8x128xf32> to vector<8x128xf32>
    %146 = vector.shape_cast %145 : vector<8x128xf32> to vector<8x1x128xf32>
    %147 = vector.broadcast %146 : vector<8x1x128xf32> to vector<8x8x128xf32>
    %148 = arith.subf %5, %147 : vector<8x8x128xf32>
    %149 = math.exp %148 : vector<8x8x128xf32>
    %cst_31 = arith.constant dense<0.000000e+00> : vector<8x128xf32>
    %150 = vector.multi_reduction <add>, %149, %cst_31 [1] : vector<8x8x128xf32> to vector<8x128xf32>
    %151 = math.log %150 : vector<8x128xf32>
    %152 = arith.addf %151, %145 : vector<8x128xf32>
    %153 = vector.shape_cast %109 : vector<8x128xi32> to vector<8x1x128xi32>
    %154 = vector.broadcast %153 : vector<8x1x128xi32> to vector<8x8x128xi32>
    %155 = arith.cmpi eq, %8, %154 : vector<8x8x128xi32>
    %156 = arith.extui %155 : vector<8x8x128xi1> to vector<8x8x128xi32>
    %157 = arith.sitofp %156 : vector<8x8x128xi32> to vector<8x8x128xf32>
    %158 = arith.mulf %5, %157 : vector<8x8x128xf32>
    %cst_32 = arith.constant dense<0.000000e+00> : vector<8x128xf32>
    %159 = vector.multi_reduction <add>, %158, %cst_32 [1] : vector<8x8x128xf32> to vector<8x128xf32>
    %160 = arith.subf %152, %159 : vector<8x128xf32>
    %161 = vector.shape_cast %160 : vector<8x128xf32> to vector<8x1x128xf32>
    %162 = vector.shape_cast %113 : vector<8x128xf32> to vector<8x1x128xf32>
    %163 = vector.shape_cast %144 : vector<8x128xf32> to vector<8x1x128xf32>
    %164 = tpu.concatenate %161, %162, %163 in 1 : vector<8x1x128xf32>, vector<8x1x128xf32>, vector<8x1x128xf32> -> vector<8x3x128xf32>
    %c0_33 = arith.constant 0 : index
    %c0_34 = arith.constant 0 : index
    %c0_35 = arith.constant 0 : index
    %165 = vector.load %arg5[%c0_33, %c0_34, %c0_35] : memref<8x3x128xf32, #tpu.memory_space<vmem>>, vector<8x3x128xf32>
    tpu.vector_store %arg5[%c0_33, %c0_34, %c0_35], %164 {strides = array<i32>} : memref<8x3x128xf32, #tpu.memory_space<vmem>>, vector<8x3x128xf32>,
    return
  }
  func.func @transform_0(%arg0: i32) -> (i32, i32, i32) {
    %c0_i32 = arith.constant 0 : i32
    %c0_i32_0 = arith.constant 0 : i32
    %c0_i32_1 = arith.constant 0 : i32
    return %arg0, %c0_i32, %c0_i32_0 : i32, i32, i32
  }
  func.func @transform_1(%arg0: i32) -> (i32, i32) {
    %c0_i32 = arith.constant 0 : i32
    %c0_i32_0 = arith.constant 0 : i32
    %c0_i32_1 = arith.constant 0 : i32
    return %c0_i32, %c0_i32_0 : i32, i32
  }
  func.func @transform_2(%arg0: i32) -> (i32, i32, i32) {
    %c0_i32 = arith.constant 0 : i32
    %c0_i32_0 = arith.constant 0 : i32
    %c0_i32_1 = arith.constant 0 : i32
    return %arg0, %c0_i32, %c0_i32_0 : i32, i32, i32
  }
  func.func @transform_3(%arg0: i32) -> (i32, i32, i32) {
    %c0_i32 = arith.constant 0 : i32
    %c0_i32_0 = arith.constant 0 : i32
    %c0_i32_1 = arith.constant 0 : i32
    return %arg0, %c0_i32, %c0_i32_0 : i32, i32, i32
  }
  func.func @transform_4(%arg0: i32) -> (i32, i32, i32) {
    %c0_i32 = arith.constant 0 : i32
    %c0_i32_0 = arith.constant 0 : i32
    %c0_i32_1 = arith.constant 0 : i32
    return %arg0, %c0_i32, %c0_i32_0 : i32, i32, i32
  }
}

</mosaic_0001>

<bundles_post_ra>
// kernel: tpu_custom_call.1
= control target key start
LH: loop header
LB: loop body
LE: loop exit
PB: predicated region body
PF: predicated region fallthrough
CT: control target
= control target key end

     0   :  { %s3214_s15 = smov 0   ;;  %s4686_s0 = inlined_call_operand.vmem [shape: f32[16,3,10], index: 0, kind: input, shape index: {}]   ;;  %s4687_s1 = inlined_call_operand.vmem [shape: f32[12,128], index: 1, kind: input, shape index: {}]   ;;  %s4688_s2 = inlined_call_operand.vmem [shape: f32[16,128,4], index: 2, kind: input, shape index: {}]   ;;  %s4689_s3 = inlined_call_operand.vmem [shape: f32[16,128,8], index: 3, kind: input, shape index: {}]   ;;  %s4690_s4 = inlined_call_operand.vmem [shape: f32[16,3,128], index: 4, kind: output, shape index: {}]  }
   0x1 LB: > { %s2984_s16 = sadd.s32 4294967295, %s3176_s15   ;;  %p2988_p0 = scmp.ge.s32.totalorder %s3176_s15, 1  ;;  %s3176_s15 = sphi %s3214_s15, %s14_s15  }
   0x2   : > { %p187_p1 = scmp.lt.s32.totalorder %s3176_s15, 3 }
   0x4   : > { %p188_p2 = pnand %p2988_p0, %p187_p1 }
   0x6   : > { %191 = sbr.rel (%p188_p2) target bundleno = 1935 (0x78f), region = 36 }
   0xb   : > { %s2989_s17 = sshll.u32 %s2984_s16, 3  ;;  %vm1334_vm0 = vcmask 1042432  }
   0xc   : > { %p226_p3 = scmp.lt.s32.totalorder %s2989_s17, 15 }
   0xe   : > { %s4783_s17 = smov (!%p226_p3, %s2989_s17), 15 }
   0xf   : > { %s3025_s18 = sshll.u32 %s4783_s17, 7  ;;  %s2990_s25 = sshll.u32 %s4783_s17, 2 }
  0x10   : > { %s3230_s21 = scalar_lea.vmem %s4688_s2, %s3025_s18  ;;  %s3333_s24 = scalar_lea.vmem %s4689_s3, %s3025_s18 }
  0x11   : > { %v293_v0 = vld [vmem:[%s3230_s21 + $0x100] sm:$0xff]  ;;  %v294_v3 = vld [vmem:[%s3230_s21 + $0x108] sm:$0xff]  ;;  %v295_v6 = vld [vmem:[%s3230_s21 + $0x110] sm:$0xff]  ;;  %s3495_s28 = scalar_lea.vmem %s4686_s0, %s2990_s25  ;;  %s4463_s11 = scalar_lea.vmem %s4690_s4, %s2990_s25 }
  0x12   : > { %v277_v1 = vld [vmem:[%s3230_s21 + $0x80] sm:$0xff]  ;;  %453 = vxpose.xlu2.b32.start [1/16] (narrow) %v293_v0, 8  ;;  %v278_v4 = vld [vmem:[%s3230_s21 + $0x88] sm:$0xff]  ;;  %v279_v7 = vld [vmem:[%s3230_s21 + $0x90] sm:$0xff] }
  0x13   : > { %v261_v2 = vld [vmem:[%s3230_s21] sm:$0xff]  ;;  %421 = vxpose.xlu1.b32.start [1/16] (narrow) %v277_v1, 8  ;;  %v262_v5 = vld [vmem:[%s3230_s21 + $0x8] sm:$0xff]  ;;  %v263_v8 = vld [vmem:[%s3230_s21 + $0x10] sm:$0xff] }
  0x14   : > { %389 = vxpose.xlu0.b32.start [1/16] (narrow) %v261_v2, 8  ;;  %v296_v9 = vld [vmem:[%s3230_s21 + $0x118] sm:$0xff]  ;;  %v297_v12 = vld [vmem:[%s3230_s21 + $0x120] sm:$0xff]  ;;  %v298_v15 = vld [vmem:[%s3230_s21 + $0x128] sm:$0xff] }
  0x15   : > { %v280_v10 = vld [vmem:[%s3230_s21 + $0x98] sm:$0xff]  ;;  %v281_v13 = vld [vmem:[%s3230_s21 + $0xa0] sm:$0xff]  ;;  %v282_v16 = vld [vmem:[%s3230_s21 + $0xa8] sm:$0xff] }
  0x16   : > { %v264_v11 = vld [vmem:[%s3230_s21 + $0x18] sm:$0xff]  ;;  %v265_v14 = vld [vmem:[%s3230_s21 + $0x20] sm:$0xff]  ;;  %v266_v17 = vld [vmem:[%s3230_s21 + $0x28] sm:$0xff] }
  0x17   : > { %v299_v18 = vld [vmem:[%s3230_s21 + $0x130] sm:$0xff]  ;;  %v300_v21 = vld [vmem:[%s3230_s21 + $0x138] sm:$0xff]  ;;  %v301_v24 = vld [vmem:[%s3230_s21 + $0x140] sm:$0xff] }
  0x18   : > { %v283_v19 = vld [vmem:[%s3230_s21 + $0xb0] sm:$0xff]  ;;  %v284_v22 = vld [vmem:[%s3230_s21 + $0xb8] sm:$0xff]  ;;  %v285_v25 = vld [vmem:[%s3230_s21 + $0xc0] sm:$0xff] }
  0x19   : > { %v267_v20 = vld [vmem:[%s3230_s21 + $0x30] sm:$0xff]  ;;  %v268_v23 = vld [vmem:[%s3230_s21 + $0x38] sm:$0xff]  ;;  %v269_v26 = vld [vmem:[%s3230_s21 + $0x40] sm:$0xff] }
  0x1a   : > { %454 = vxpose.xlu2.b32.cont [2/16] (narrow) %v294_v3, 8  ;;  %v302_v27 = vld [vmem:[%s3230_s21 + $0x148] sm:$0xff]  ;;  %v303_v30 = vld [vmem:[%s3230_s21 + $0x150] sm:$0xff]  ;;  %v304_v33 = vld [vmem:[%s3230_s21 + $0x158] sm:$0xff] }
  0x1b   : > { %422 = vxpose.xlu1.b32.cont [2/16] (narrow) %v278_v4, 8  ;;  %v286_v28 = vld [vmem:[%s3230_s21 + $0xc8] sm:$0xff]  ;;  %v287_v31 = vld [vmem:[%s3230_s21 + $0xd0] sm:$0xff]  ;;  %v288_v34 = vld [vmem:[%s3230_s21 + $0xd8] sm:$0xff] }
  0x1c   : > { %390 = vxpose.xlu0.b32.cont [2/16] (narrow) %v262_v5, 8  ;;  %v270_v29 = vld [vmem:[%s3230_s21 + $0x48] sm:$0xff]  ;;  %v271_v32 = vld [vmem:[%s3230_s21 + $0x50] sm:$0xff]  ;;  %v272_v35 = vld [vmem:[%s3230_s21 + $0x58] sm:$0xff] }
  0x1d   : > { %v305_v36 = vld [vmem:[%s3230_s21 + $0x160] sm:$0xff]  ;;  %v306_v39 = vld [vmem:[%s3230_s21 + $0x168] sm:$0xff]  ;;  %v307_v42 = vld [vmem:[%s3230_s21 + $0x170] sm:$0xff] }
  0x1e   : > { %v289_v37 = vld [vmem:[%s3230_s21 + $0xe0] sm:$0xff]  ;;  %v290_v40 = vld [vmem:[%s3230_s21 + $0xe8] sm:$0xff]  ;;  %v291_v43 = vld [vmem:[%s3230_s21 + $0xf0] sm:$0xff] }
  0x1f   : > { %v273_v38 = vld [vmem:[%s3230_s21 + $0x60] sm:$0xff]  ;;  %v274_v41 = vld [vmem:[%s3230_s21 + $0x68] sm:$0xff]  ;;  %v275_v44 = vld [vmem:[%s3230_s21 + $0x70] sm:$0xff] }
  0x20   : > { %v308_v45 = vld [vmem:[%s3230_s21 + $0x178] sm:$0xff]  ;;  %v341_v48 = vld [vmem:[%s3230_s21 + $0x280] sm:$0xff]  ;;  %v342_v51 = vld [vmem:[%s3230_s21 + $0x288] sm:$0xff] }
  0x21   : > { %v292_v46 = vld [vmem:[%s3230_s21 + $0xf8] sm:$0xff]  ;;  %v325_v49 = vld [vmem:[%s3230_s21 + $0x200] sm:$0xff]  ;;  %v326_v52 = vld [vmem:[%s3230_s21 + $0x208] sm:$0xff] }
  0x22   : > { %455 = vxpose.xlu2.b32.cont [3/16] (narrow) %v295_v6, 8  ;;  %v276_v47 = vld [vmem:[%s3230_s21 + $0x78] sm:$0xff]  ;;  %v309_v50 = vld [vmem:[%s3230_s21 + $0x180] sm:$0xff]  ;;  %v310_v53 = vld [vmem:[%s3230_s21 + $0x188] sm:$0xff] }
  0x23   : > { %423 = vxpose.xlu1.b32.cont [3/16] (narrow) %v279_v7, 8  ;;  %v343_v54 = vld [vmem:[%s3230_s21 + $0x290] sm:$0xff]  ;;  %v344_v57 = vld [vmem:[%s3230_s21 + $0x298] sm:$0xff]  ;;  %v345_v60 = vld [vmem:[%s3230_s21 + $0x2a0] sm:$0xff] }
  0x24   : > { %391 = vxpose.xlu0.b32.cont [3/16] (narrow) %v263_v8, 8  ;;  %v327_v55 = vld [vmem:[%s3230_s21 + $0x210] sm:$0xff]  ;;  %v328_v58 = vld [vmem:[%s3230_s21 + $0x218] sm:$0xff]  ;;  %v329_v61 = vld [vmem:[%s3230_s21 + $0x220] sm:$0xff] }
  0x25   : > { %v311_v56 = vld [vmem:[%s3230_s21 + $0x190] sm:$0xff]  ;;  %v312_v59 = vld [vmem:[%s3230_s21 + $0x198] sm:$0xff]  ;;  %v313_v62 = vld [vmem:[%s3230_s21 + $0x1a0] sm:$0xff] }
  0x26   : > { %v346_v63 = vld [vmem:[%s3230_s21 + $0x2a8] sm:$0xff]  ;;  %v347_v2 = vld [vmem:[%s3230_s21 + $0x2b0] sm:$0xff]  ;;  %v348_v5 = vld [vmem:[%s3230_s21 + $0x2b8] sm:$0xff] }
  0x27   : > { %v330_v0 = vld [vmem:[%s3230_s21 + $0x228] sm:$0xff]  ;;  %v331_v3 = vld [vmem:[%s3230_s21 + $0x230] sm:$0xff]  ;;  %v332_v6 = vld [vmem:[%s3230_s21 + $0x238] sm:$0xff] }
  0x28   : > { %v314_v1 = vld [vmem:[%s3230_s21 + $0x1a8] sm:$0xff]  ;;  %v315_v4 = vld [vmem:[%s3230_s21 + $0x1b0] sm:$0xff]  ;;  %v316_v7 = vld [vmem:[%s3230_s21 + $0x1b8] sm:$0xff] }
  0x29   : > { %v349_v8 = vld [vmem:[%s3230_s21 + $0x2c0] sm:$0xff] }
  0x2a   : > { %456 = vxpose.xlu2.b32.cont [4/16] (narrow) %v296_v9, 8  ;;  %v333_v9 = vld [vmem:[%s3230_s21 + $0x240] sm:$0xff] }
  0x2b   : > { %424 = vxpose.xlu1.b32.cont [4/16] (narrow) %v280_v10, 8  ;;  %v317_v10 = vld [vmem:[%s3230_s21 + $0x1c0] sm:$0xff] }
  0x2c   : > { %392 = vxpose.xlu0.b32.cont [4/16] (narrow) %v264_v11, 8  ;;  %v350_v11 = vld [vmem:[%s3230_s21 + $0x2c8] sm:$0xff] }
  0x32   : > { %457 = vxpose.xlu2.b32.cont [5/16] (narrow) %v297_v12, 8  ;;  %v334_v12 = vld [vmem:[%s3230_s21 + $0x248] sm:$0xff] }
  0x33   : > { %425 = vxpose.xlu1.b32.cont [5/16] (narrow) %v281_v13, 8  ;;  %v318_v13 = vld [vmem:[%s3230_s21 + $0x1c8] sm:$0xff] }
  0x34   : > { %393 = vxpose.xlu0.b32.cont [5/16] (narrow) %v265_v14, 8  ;;  %v351_v14 = vld [vmem:[%s3230_s21 + $0x2d0] sm:$0xff] }
  0x3a   : > { %458 = vxpose.xlu2.b32.cont [6/16] (narrow) %v298_v15, 8  ;;  %v335_v15 = vld [vmem:[%s3230_s21 + $0x250] sm:$0xff] }
  0x3b   : > { %426 = vxpose.xlu1.b32.cont [6/16] (narrow) %v282_v16, 8  ;;  %v319_v16 = vld [vmem:[%s3230_s21 + $0x1d0] sm:$0xff] }
  0x3c   : > { %394 = vxpose.xlu0.b32.cont [6/16] (narrow) %v266_v17, 8  ;;  %v352_v17 = vld [vmem:[%s3230_s21 + $0x2d8] sm:$0xff] }
  0x42   : > { %459 = vxpose.xlu2.b32.cont [7/16] (narrow) %v299_v18, 8  ;;  %v336_v18 = vld [vmem:[%s3230_s21 + $0x258] sm:$0xff] }
  0x43   : > { %427 = vxpose.xlu1.b32.cont [7/16] (narrow) %v283_v19, 8  ;;  %v320_v19 = vld [vmem:[%s3230_s21 + $0x1d8] sm:$0xff] }
  0x44   : > { %395 = vxpose.xlu0.b32.cont [7/16] (narrow) %v267_v20, 8  ;;  %v353_v20 = vld [vmem:[%s3230_s21 + $0x2e0] sm:$0xff] }
  0x4a   : > { %460 = vxpose.xlu2.b32.cont [8/16] (narrow) %v300_v21, 8  ;;  %v337_v21 = vld [vmem:[%s3230_s21 + $0x260] sm:$0xff] }
  0x4b   : > { %428 = vxpose.xlu1.b32.cont [8/16] (narrow) %v284_v22, 8  ;;  %v321_v22 = vld [vmem:[%s3230_s21 + $0x1e0] sm:$0xff] }
  0x4c   : > { %396 = vxpose.xlu0.b32.cont [8/16] (narrow) %v268_v23, 8  ;;  %v354_v23 = vld [vmem:[%s3230_s21 + $0x2e8] sm:$0xff] }
  0x52   : > { %461 = vxpose.xlu2.b32.cont [9/16] (narrow) %v301_v24, 8  ;;  %v338_v24 = vld [vmem:[%s3230_s21 + $0x268] sm:$0xff] }
  0x53   : > { %429 = vxpose.xlu1.b32.cont [9/16] (narrow) %v285_v25, 8  ;;  %v322_v25 = vld [vmem:[%s3230_s21 + $0x1e8] sm:$0xff] }
  0x54   : > { %397 = vxpose.xlu0.b32.cont [9/16] (narrow) %v269_v26, 8  ;;  %v355_v26 = vld [vmem:[%s3230_s21 + $0x2f0] sm:$0xff] }
  0x5a   : > { %462 = vxpose.xlu2.b32.cont [10/16] (narrow) %v302_v27, 8  ;;  %v339_v27 = vld [vmem:[%s3230_s21 + $0x270] sm:$0xff] }
  0x5b   : > { %430 = vxpose.xlu1.b32.cont [10/16] (narrow) %v286_v28, 8  ;;  %v323_v28 = vld [vmem:[%s3230_s21 + $0x1f0] sm:$0xff] }
  0x5c   : > { %398 = vxpose.xlu0.b32.cont [10/16] (narrow) %v270_v29, 8  ;;  %v356_v29 = vld [vmem:[%s3230_s21 + $0x2f8] sm:$0xff] }
  0x62   : > { %463 = vxpose.xlu2.b32.cont [11/16] (narrow) %v303_v30, 8  ;;  %v340_v30 = vld [vmem:[%s3230_s21 + $0x278] sm:$0xff] }
  0x63   : > { %431 = vxpose.xlu1.b32.cont [11/16] (narrow) %v287_v31, 8  ;;  %v324_v31 = vld [vmem:[%s3230_s21 + $0x1f8] sm:$0xff] }
  0x64   : > { %399 = vxpose.xlu0.b32.cont [11/16] (narrow) %v271_v32, 8  ;;  %v645_v32 = vld [vmem:[%s3333_s24] sm:$0xff] }
  0x6a   : > { %464 = vxpose.xlu2.b32.cont [12/16] (narrow) %v304_v33, 8  ;;  %v373_v33 = vld [vmem:[%s3230_s21 + $0x380] sm:$0xff] }
  0x6b   : > { %432 = vxpose.xlu1.b32.cont [12/16] (narrow) %v288_v34, 8  ;;  %v357_v34 = vld [vmem:[%s3230_s21 + $0x300] sm:$0xff] }
  0x6c   : > { %400 = vxpose.xlu0.b32.cont [12/16] (narrow) %v272_v35, 8  ;;  %v646_v35 = vld [vmem:[%s3333_s24 + $0x8] sm:$0xff] }
  0x72   : > { %465 = vxpose.xlu2.b32.cont [13/16] (narrow) %v305_v36, 8  ;;  %v374_v36 = vld [vmem:[%s3230_s21 + $0x388] sm:$0xff] }
  0x73   : > { %433 = vxpose.xlu1.b32.cont [13/16] (narrow) %v289_v37, 8  ;;  %v358_v37 = vld [vmem:[%s3230_s21 + $0x308] sm:$0xff] }
  0x74   : > { %401 = vxpose.xlu0.b32.cont [13/16] (narrow) %v273_v38, 8  ;;  %v647_v38 = vld [vmem:[%s3333_s24 + $0x10] sm:$0xff] }
  0x7a   : > { %466 = vxpose.xlu2.b32.cont [14/16] (narrow) %v306_v39, 8  ;;  %v375_v39 = vld [vmem:[%s3230_s21 + $0x390] sm:$0xff] }
  0x7b   : > { %434 = vxpose.xlu1.b32.cont [14/16] (narrow) %v290_v40, 8  ;;  %v359_v40 = vld [vmem:[%s3230_s21 + $0x310] sm:$0xff] }
  0x7c   : > { %402 = vxpose.xlu0.b32.cont [14/16] (narrow) %v274_v41, 8  ;;  %v648_v41 = vld [vmem:[%s3333_s24 + $0x18] sm:$0xff] }
  0x82   : > { %467 = vxpose.xlu2.b32.cont [15/16] (narrow) %v307_v42, 8  ;;  %v376_v42 = vld [vmem:[%s3230_s21 + $0x398] sm:$0xff] }
  0x83   : > { %435 = vxpose.xlu1.b32.cont [15/16] (narrow) %v291_v43, 8  ;;  %v360_v43 = vld [vmem:[%s3230_s21 + $0x318] sm:$0xff] }
  0x84   : > { %403 = vxpose.xlu0.b32.cont [15/16] (narrow) %v275_v44, 8  ;;  %v649_v44 = vld [vmem:[%s3333_s24 + $0x20] sm:$0xff] }
  0x8a   : > { %468 = vxpose.xlu2.b32.end [16/16] (narrow) %v308_v45, 8  ;;  %v377_v45 = vld [vmem:[%s3230_s21 + $0x3a0] sm:$0xff] }
  0x8b   : > { %436 = vxpose.xlu1.b32.end [16/16] (narrow) %v292_v46, 8  ;;  %v361_v46 = vld [vmem:[%s3230_s21 + $0x320] sm:$0xff] }
  0x8c   : > { %404 = vxpose.xlu0.b32.end [16/16] (narrow) %v276_v47, 8  ;;  %v650_v47 = vld [vmem:[%s3333_s24 + $0x28] sm:$0xff] }
  0x92   : > { %549 = vxpose.xlu2.b32.start [1/16] (narrow) %v341_v48, 8  ;;  %v378_v48 = vld [vmem:[%s3230_s21 + $0x3a8] sm:$0xff] }
  0x93   : > { %517 = vxpose.xlu1.b32.start [1/16] (narrow) %v325_v49, 8  ;;  %v362_v49 = vld [vmem:[%s3230_s21 + $0x328] sm:$0xff] }
  0x94   : > { %485 = vxpose.xlu0.b32.start [1/16] (narrow) %v309_v50, 8  ;;  %v651_v50 = vld [vmem:[%s3333_s24 + $0x30] sm:$0xff] }
  0x9a   : > { %550 = vxpose.xlu2.b32.cont [2/16] (narrow) %v342_v51, 8  ;;  %v379_v51 = vld [vmem:[%s3230_s21 + $0x3b0] sm:$0xff] }
  0x9b   : > { %518 = vxpose.xlu1.b32.cont [2/16] (narrow) %v326_v52, 8  ;;  %v363_v52 = vld [vmem:[%s3230_s21 + $0x330] sm:$0xff] }
  0x9c   : > { %486 = vxpose.xlu0.b32.cont [2/16] (narrow) %v310_v53, 8  ;;  %v652_v53 = vld [vmem:[%s3333_s24 + $0x38] sm:$0xff] }
  0xa2   : > { %551 = vxpose.xlu2.b32.cont [3/16] (narrow) %v343_v54, 8  ;;  %v380_v54 = vld [vmem:[%s3230_s21 + $0x3b8] sm:$0xff] }
  0xa3   : > { %519 = vxpose.xlu1.b32.cont [3/16] (narrow) %v327_v55, 8  ;;  %v364_v55 = vld [vmem:[%s3230_s21 + $0x338] sm:$0xff] }
  0xa4   : > { %487 = vxpose.xlu0.b32.cont [3/16] (narrow) %v311_v56, 8  ;;  %v653_v56 = vld [vmem:[%s3333_s24 + $0x40] sm:$0xff] }
  0xaa   : > { %552 = vxpose.xlu2.b32.cont [4/16] (narrow) %v344_v57, 8  ;;  %v381_v57 = vld [vmem:[%s3230_s21 + $0x3c0] sm:$0xff] }
  0xab   : > { %520 = vxpose.xlu1.b32.cont [4/16] (narrow) %v328_v58, 8  ;;  %v365_v58 = vld [vmem:[%s3230_s21 + $0x340] sm:$0xff] }
  0xac   : > { %488 = vxpose.xlu0.b32.cont [4/16] (narrow) %v312_v59, 8  ;;  %v654_v59 = vld [vmem:[%s3333_s24 + $0x48] sm:$0xff] }
  0xb2   : > { %553 = vxpose.xlu2.b32.cont [5/16] (narrow) %v345_v60, 8  ;;  %v382_v60 = vld [vmem:[%s3230_s21 + $0x3c8] sm:$0xff] }
  0xb3   : > { %521 = vxpose.xlu1.b32.cont [5/16] (narrow) %v329_v61, 8  ;;  %v366_v61 = vld [vmem:[%s3230_s21 + $0x348] sm:$0xff] }
  0xb4   : > { %489 = vxpose.xlu0.b32.cont [5/16] (narrow) %v313_v62, 8  ;;  %v655_v62 = vld [vmem:[%s3333_s24 + $0x50] sm:$0xff] }
  0xba   : > { %554 = vxpose.xlu2.b32.cont [6/16] (narrow) %v346_v63, 8  ;;  %v383_v63 = vld [vmem:[%s3230_s21 + $0x3d0] sm:$0xff] }
  0xbb   : > { %522 = vxpose.xlu1.b32.cont [6/16] (narrow) %v330_v0, 8  ;;  %v367_v0 = vld [vmem:[%s3230_s21 + $0x350] sm:$0xff] }
  0xbc   : > { %490 = vxpose.xlu0.b32.cont [6/16] (narrow) %v314_v1, 8  ;;  %v656_v1 = vld [vmem:[%s3333_s24 + $0x58] sm:$0xff] }
  0xc2   : > { %555 = vxpose.xlu2.b32.cont [7/16] (narrow) %v347_v2, 8  ;;  %v384_v2 = vld [vmem:[%s3230_s21 + $0x3d8] sm:$0xff] }
  0xc3   : > { %523 = vxpose.xlu1.b32.cont [7/16] (narrow) %v331_v3, 8  ;;  %v368_v3 = vld [vmem:[%s3230_s21 + $0x358] sm:$0xff] }
  0xc4   : > { %491 = vxpose.xlu0.b32.cont [7/16] (narrow) %v315_v4, 8  ;;  %v657_v4 = vld [vmem:[%s3333_s24 + $0x60] sm:$0xff] }
  0xca   : > { %556 = vxpose.xlu2.b32.cont [8/16] (narrow) %v348_v5, 8  ;;  %v385_v5 = vld [vmem:[%s3230_s21 + $0x3e0] sm:$0xff] }
  0xcb   : > { %524 = vxpose.xlu1.b32.cont [8/16] (narrow) %v332_v6, 8  ;;  %v369_v6 = vld [vmem:[%s3230_s21 + $0x360] sm:$0xff] }
  0xcc   : > { %492 = vxpose.xlu0.b32.cont [8/16] (narrow) %v316_v7, 8  ;;  %v658_v7 = vld [vmem:[%s3333_s24 + $0x68] sm:$0xff] }
  0xd2   : > { %557 = vxpose.xlu2.b32.cont [9/16] (narrow) %v349_v8, 8  ;;  %v386_v8 = vld [vmem:[%s3230_s21 + $0x3e8] sm:$0xff] }
  0xd3   : > { %525 = vxpose.xlu1.b32.cont [9/16] (narrow) %v333_v9, 8  ;;  %v370_v9 = vld [vmem:[%s3230_s21 + $0x368] sm:$0xff] }
  0xd4   : > { %493 = vxpose.xlu0.b32.cont [9/16] (narrow) %v317_v10, 8  ;;  %v659_v10 = vld [vmem:[%s3333_s24 + $0x70] sm:$0xff] }
  0xda   : > { %558 = vxpose.xlu2.b32.cont [10/16] (narrow) %v350_v11, 8  ;;  %v387_v11 = vld [vmem:[%s3230_s21 + $0x3f0] sm:$0xff] }
  0xdb   : > { %526 = vxpose.xlu1.b32.cont [10/16] (narrow) %v334_v12, 8  ;;  %v371_v12 = vld [vmem:[%s3230_s21 + $0x370] sm:$0xff] }
  0xdc   : > { %494 = vxpose.xlu0.b32.cont [10/16] (narrow) %v318_v13, 8  ;;  %v660_v13 = vld [vmem:[%s3333_s24 + $0x78] sm:$0xff] }
  0xe2   : > { %559 = vxpose.xlu2.b32.cont [11/16] (narrow) %v351_v14, 8  ;;  %v388_v14 = vld [vmem:[%s3230_s21 + $0x3f8] sm:$0xff] }
  0xe3   : > { %527 = vxpose.xlu1.b32.cont [11/16] (narrow) %v335_v15, 8  ;;  %v372_v15 = vld [vmem:[%s3230_s21 + $0x378] sm:$0xff] }
  0xe4   : > { %495 = vxpose.xlu0.b32.cont [11/16] (narrow) %v319_v16, 8  ;;  %v693_v16 = vld [vmem:[%s3333_s24 + $0x180] sm:$0xff] }
  0xea   : > { %560 = vxpose.xlu2.b32.cont [12/16] (narrow) %v352_v17, 8  ;;  %v677_v17 = vld [vmem:[%s3333_s24 + $0x100] sm:$0xff] }
  0xeb   : > { %528 = vxpose.xlu1.b32.cont [12/16] (narrow) %v336_v18, 8  ;;  %v661_v18 = vld [vmem:[%s3333_s24 + $0x80] sm:$0xff] }
  0xec   : > { %496 = vxpose.xlu0.b32.cont [12/16] (narrow) %v320_v19, 8  ;;  %v694_v19 = vld [vmem:[%s3333_s24 + $0x188] sm:$0xff] }
  0xf2   : > { %561 = vxpose.xlu2.b32.cont [13/16] (narrow) %v353_v20, 8  ;;  %v678_v20 = vld [vmem:[%s3333_s24 + $0x108] sm:$0xff] }
  0xf3   : > { %529 = vxpose.xlu1.b32.cont [13/16] (narrow) %v337_v21, 8  ;;  %v662_v21 = vld [vmem:[%s3333_s24 + $0x88] sm:$0xff] }
  0xf4   : > { %497 = vxpose.xlu0.b32.cont [13/16] (narrow) %v321_v22, 8  ;;  %v695_v22 = vld [vmem:[%s3333_s24 + $0x190] sm:$0xff] }
  0xfa   : > { %562 = vxpose.xlu2.b32.cont [14/16] (narrow) %v354_v23, 8  ;;  %v679_v23 = vld [vmem:[%s3333_s24 + $0x110] sm:$0xff] }
  0xfb   : > { %530 = vxpose.xlu1.b32.cont [14/16] (narrow) %v338_v24, 8  ;;  %v663_v24 = vld [vmem:[%s3333_s24 + $0x90] sm:$0xff] }
  0xfc   : > { %498 = vxpose.xlu0.b32.cont [14/16] (narrow) %v322_v25, 8  ;;  %v696_v25 = vld [vmem:[%s3333_s24 + $0x198] sm:$0xff] }
 0x102   : > { %563 = vxpose.xlu2.b32.cont [15/16] (narrow) %v355_v26, 8  ;;  %v680_v26 = vld [vmem:[%s3333_s24 + $0x118] sm:$0xff] }
 0x103   : > { %531 = vxpose.xlu1.b32.cont [15/16] (narrow) %v339_v27, 8  ;;  %v664_v27 = vld [vmem:[%s3333_s24 + $0x98] sm:$0xff] }
 0x104   : > { %499 = vxpose.xlu0.b32.cont [15/16] (narrow) %v323_v28, 8  ;;  %v697_v28 = vld [vmem:[%s3333_s24 + $0x1a0] sm:$0xff] }
 0x10a   : > { %564 = vxpose.xlu2.b32.end [16/16] (narrow) %v356_v29, 8  ;;  %v681_v29 = vld [vmem:[%s3333_s24 + $0x120] sm:$0xff] }
 0x10b   : > { %532 = vxpose.xlu1.b32.end [16/16] (narrow) %v340_v30, 8  ;;  %v665_v30 = vld [vmem:[%s3333_s24 + $0xa0] sm:$0xff] }
 0x10c   : > { %500 = vxpose.xlu0.b32.end [16/16] (narrow) %v324_v31, 8  ;;  %v698_v31 = vld [vmem:[%s3333_s24 + $0x1a8] sm:$0xff] }
 0x112   : > { %773 = vxpose.xlu2.b32.start [1/16] (narrow) %v645_v32, 8  ;;  %v682_v32 = vld [vmem:[%s3333_s24 + $0x128] sm:$0xff] }
 0x113   : > { %613 = vxpose.xlu1.b32.start [1/16] (narrow) %v373_v33, 8  ;;  %v666_v33 = vld [vmem:[%s3333_s24 + $0xa8] sm:$0xff] }
 0x114   : > { %581 = vxpose.xlu0.b32.start [1/16] (narrow) %v357_v34, 8  ;;  %v699_v34 = vld [vmem:[%s3333_s24 + $0x1b0] sm:$0xff] }
 0x11a   : > { %774 = vxpose.xlu2.b32.cont [2/16] (narrow) %v646_v35, 8  ;;  %v683_v35 = vld [vmem:[%s3333_s24 + $0x130] sm:$0xff] }
 0x11b   : > { %614 = vxpose.xlu1.b32.cont [2/16] (narrow) %v374_v36, 8  ;;  %v667_v36 = vld [vmem:[%s3333_s24 + $0xb0] sm:$0xff] }
 0x11c   : > { %582 = vxpose.xlu0.b32.cont [2/16] (narrow) %v358_v37, 8  ;;  %v700_v37 = vld [vmem:[%s3333_s24 + $0x1b8] sm:$0xff] }
 0x122   : > { %775 = vxpose.xlu2.b32.cont [3/16] (narrow) %v647_v38, 8  ;;  %v684_v38 = vld [vmem:[%s3333_s24 + $0x138] sm:$0xff] }
 0x123   : > { %615 = vxpose.xlu1.b32.cont [3/16] (narrow) %v375_v39, 8  ;;  %v668_v39 = vld [vmem:[%s3333_s24 + $0xb8] sm:$0xff] }
 0x124   : > { %583 = vxpose.xlu0.b32.cont [3/16] (narrow) %v359_v40, 8  ;;  %v701_v40 = vld [vmem:[%s3333_s24 + $0x1c0] sm:$0xff] }
 0x12a   : > { %776 = vxpose.xlu2.b32.cont [4/16] (narrow) %v648_v41, 8  ;;  %v685_v41 = vld [vmem:[%s3333_s24 + $0x140] sm:$0xff] }
 0x12b   : > { %616 = vxpose.xlu1.b32.cont [4/16] (narrow) %v376_v42, 8  ;;  %v669_v42 = vld [vmem:[%s3333_s24 + $0xc0] sm:$0xff] }
 0x12c   : > { %584 = vxpose.xlu0.b32.cont [4/16] (narrow) %v360_v43, 8  ;;  %v702_v43 = vld [vmem:[%s3333_s24 + $0x1c8] sm:$0xff] }
 0x132   : > { %777 = vxpose.xlu2.b32.cont [5/16] (narrow) %v649_v44, 8  ;;  %v686_v44 = vld [vmem:[%s3333_s24 + $0x148] sm:$0xff] }
 0x133   : > { %617 = vxpose.xlu1.b32.cont [5/16] (narrow) %v377_v45, 8  ;;  %v670_v45 = vld [vmem:[%s3333_s24 + $0xc8] sm:$0xff] }
 0x134   : > { %585 = vxpose.xlu0.b32.cont [5/16] (narrow) %v361_v46, 8  ;;  %v703_v46 = vld [vmem:[%s3333_s24 + $0x1d0] sm:$0xff] }
 0x13a   : > { %778 = vxpose.xlu2.b32.cont [6/16] (narrow) %v650_v47, 8  ;;  %v687_v47 = vld [vmem:[%s3333_s24 + $0x150] sm:$0xff] }
 0x13b   : > { %618 = vxpose.xlu1.b32.cont [6/16] (narrow) %v378_v48, 8  ;;  %v671_v48 = vld [vmem:[%s3333_s24 + $0xd0] sm:$0xff] }
 0x13c   : > { %586 = vxpose.xlu0.b32.cont [6/16] (narrow) %v362_v49, 8  ;;  %v704_v49 = vld [vmem:[%s3333_s24 + $0x1d8] sm:$0xff] }
 0x142   : > { %779 = vxpose.xlu2.b32.cont [7/16] (narrow) %v651_v50, 8  ;;  %v688_v50 = vld [vmem:[%s3333_s24 + $0x158] sm:$0xff] }
 0x143   : > { %619 = vxpose.xlu1.b32.cont [7/16] (narrow) %v379_v51, 8  ;;  %v672_v51 = vld [vmem:[%s3333_s24 + $0xd8] sm:$0xff] }
 0x144   : > { %587 = vxpose.xlu0.b32.cont [7/16] (narrow) %v363_v52, 8  ;;  %v705_v52 = vld [vmem:[%s3333_s24 + $0x1e0] sm:$0xff] }
 0x14a   : > { %780 = vxpose.xlu2.b32.cont [8/16] (narrow) %v652_v53, 8  ;;  %v689_v53 = vld [vmem:[%s3333_s24 + $0x160] sm:$0xff] }
 0x14b   : > { %620 = vxpose.xlu1.b32.cont [8/16] (narrow) %v380_v54, 8  ;;  %v673_v54 = vld [vmem:[%s3333_s24 + $0xe0] sm:$0xff] }
 0x14c   : > { %588 = vxpose.xlu0.b32.cont [8/16] (narrow) %v364_v55, 8  ;;  %v706_v55 = vld [vmem:[%s3333_s24 + $0x1e8] sm:$0xff] }
 0x152   : > { %781 = vxpose.xlu2.b32.cont [9/16] (narrow) %v653_v56, 8  ;;  %v690_v56 = vld [vmem:[%s3333_s24 + $0x168] sm:$0xff] }
 0x153   : > { %621 = vxpose.xlu1.b32.cont [9/16] (narrow) %v381_v57, 8  ;;  %v674_v57 = vld [vmem:[%s3333_s24 + $0xe8] sm:$0xff] }
 0x154   : > { %589 = vxpose.xlu0.b32.cont [9/16] (narrow) %v365_v58, 8  ;;  %v707_v58 = vld [vmem:[%s3333_s24 + $0x1f0] sm:$0xff] }
 0x15a   : > { %782 = vxpose.xlu2.b32.cont [10/16] (narrow) %v654_v59, 8  ;;  %v691_v59 = vld [vmem:[%s3333_s24 + $0x170] sm:$0xff] }
 0x15b   : > { %622 = vxpose.xlu1.b32.cont [10/16] (narrow) %v382_v60, 8  ;;  %v675_v60 = vld [vmem:[%s3333_s24 + $0xf0] sm:$0xff] }
 0x15c   : > { %590 = vxpose.xlu0.b32.cont [10/16] (narrow) %v366_v61, 8  ;;  %v708_v61 = vld [vmem:[%s3333_s24 + $0x1f8] sm:$0xff] }
 0x162   : > { %783 = vxpose.xlu2.b32.cont [11/16] (narrow) %v655_v62, 8  ;;  %v692_v62 = vld [vmem:[%s3333_s24 + $0x178] sm:$0xff] }
 0x163   : > { %623 = vxpose.xlu1.b32.cont [11/16] (narrow) %v383_v63, 8  ;;  %v676_v63 = vld [vmem:[%s3333_s24 + $0xf8] sm:$0xff] }
 0x164   : > { %591 = vxpose.xlu0.b32.cont [11/16] (narrow) %v367_v0, 8  ;;  %v741_v0 = vld [vmem:[%s3333_s24 + $0x300] sm:$0xff] }
 0x16a   : > { %784 = vxpose.xlu2.b32.cont [12/16] (narrow) %v656_v1, 8  ;;  %v725_v1 = vld [vmem:[%s3333_s24 + $0x280] sm:$0xff] }
 0x16b   : > { %624 = vxpose.xlu1.b32.cont [12/16] (narrow) %v384_v2, 8  ;;  %v709_v2 = vld [vmem:[%s3333_s24 + $0x200] sm:$0xff] }
 0x16c   : > { %592 = vxpose.xlu0.b32.cont [12/16] (narrow) %v368_v3, 8  ;;  %v742_v3 = vld [vmem:[%s3333_s24 + $0x308] sm:$0xff] }
 0x172   : > { %785 = vxpose.xlu2.b32.cont [13/16] (narrow) %v657_v4, 8  ;;  %v726_v4 = vld [vmem:[%s3333_s24 + $0x288] sm:$0xff] }
 0x173   : > { %625 = vxpose.xlu1.b32.cont [13/16] (narrow) %v385_v5, 8  ;;  %v710_v5 = vld [vmem:[%s3333_s24 + $0x208] sm:$0xff] }
 0x174   : > { %593 = vxpose.xlu0.b32.cont [13/16] (narrow) %v369_v6, 8  ;;  %v743_v6 = vld [vmem:[%s3333_s24 + $0x310] sm:$0xff] }
 0x17a   : > { %786 = vxpose.xlu2.b32.cont [14/16] (narrow) %v658_v7, 8  ;;  %v727_v7 = vld [vmem:[%s3333_s24 + $0x290] sm:$0xff] }
 0x17b   : > { %626 = vxpose.xlu1.b32.cont [14/16] (narrow) %v386_v8, 8  ;;  %v711_v8 = vld [vmem:[%s3333_s24 + $0x210] sm:$0xff] }
 0x17c   : > { %594 = vxpose.xlu0.b32.cont [14/16] (narrow) %v370_v9, 8  ;;  %v744_v9 = vld [vmem:[%s3333_s24 + $0x318] sm:$0xff] }
 0x182   : > { %787 = vxpose.xlu2.b32.cont [15/16] (narrow) %v659_v10, 8  ;;  %v728_v10 = vld [vmem:[%s3333_s24 + $0x298] sm:$0xff] }
 0x183   : > { %627 = vxpose.xlu1.b32.cont [15/16] (narrow) %v387_v11, 8  ;;  %v712_v11 = vld [vmem:[%s3333_s24 + $0x218] sm:$0xff] }
 0x184   : > { %595 = vxpose.xlu0.b32.cont [15/16] (narrow) %v371_v12, 8  ;;  %v745_v12 = vld [vmem:[%s3333_s24 + $0x320] sm:$0xff] }
 0x18a   : > { %788 = vxpose.xlu2.b32.end [16/16] (narrow) %v660_v13, 8  ;;  %v729_v13 = vld [vmem:[%s3333_s24 + $0x2a0] sm:$0xff] }
 0x18b   : > { %628 = vxpose.xlu1.b32.end [16/16] (narrow) %v388_v14, 8  ;;  %v713_v14 = vld [vmem:[%s3333_s24 + $0x220] sm:$0xff] }
 0x18c   : > { %596 = vxpose.xlu0.b32.end [16/16] (narrow) %v372_v15, 8  ;;  %v746_v15 = vld [vmem:[%s3333_s24 + $0x328] sm:$0xff] }
 0x192   : > { %869 = vxpose.xlu2.b32.start [1/16] (narrow) %v693_v16, 8  ;;  %v730_v16 = vld [vmem:[%s3333_s24 + $0x2a8] sm:$0xff] }
 0x193   : > { %837 = vxpose.xlu1.b32.start [1/16] (narrow) %v677_v17, 8  ;;  %v714_v17 = vld [vmem:[%s3333_s24 + $0x228] sm:$0xff] }
 0x194   : > { %805 = vxpose.xlu0.b32.start [1/16] (narrow) %v661_v18, 8  ;;  %v747_v18 = vld [vmem:[%s3333_s24 + $0x330] sm:$0xff] }
 0x19a   : > { %870 = vxpose.xlu2.b32.cont [2/16] (narrow) %v694_v19, 8  ;;  %v731_v19 = vld [vmem:[%s3333_s24 + $0x2b0] sm:$0xff] }
 0x19b   : > { %838 = vxpose.xlu1.b32.cont [2/16] (narrow) %v678_v20, 8  ;;  %v715_v20 = vld [vmem:[%s3333_s24 + $0x230] sm:$0xff] }
 0x19c   : > { %806 = vxpose.xlu0.b32.cont [2/16] (narrow) %v662_v21, 8  ;;  %v748_v21 = vld [vmem:[%s3333_s24 + $0x338] sm:$0xff] }
 0x1a2   : > { %871 = vxpose.xlu2.b32.cont [3/16] (narrow) %v695_v22, 8  ;;  %v732_v22 = vld [vmem:[%s3333_s24 + $0x2b8] sm:$0xff] }
 0x1a3   : > { %839 = vxpose.xlu1.b32.cont [3/16] (narrow) %v679_v23, 8  ;;  %v716_v23 = vld [vmem:[%s3333_s24 + $0x238] sm:$0xff] }
 0x1a4   : > { %807 = vxpose.xlu0.b32.cont [3/16] (narrow) %v663_v24, 8  ;;  %v749_v24 = vld [vmem:[%s3333_s24 + $0x340] sm:$0xff] }
 0x1aa   : > { %872 = vxpose.xlu2.b32.cont [4/16] (narrow) %v696_v25, 8  ;;  %v733_v25 = vld [vmem:[%s3333_s24 + $0x2c0] sm:$0xff] }
 0x1ab   : > { %840 = vxpose.xlu1.b32.cont [4/16] (narrow) %v680_v26, 8  ;;  %v717_v26 = vld [vmem:[%s3333_s24 + $0x240] sm:$0xff] }
 0x1ac   : > { %808 = vxpose.xlu0.b32.cont [4/16] (narrow) %v664_v27, 8  ;;  %v750_v27 = vld [vmem:[%s3333_s24 + $0x348] sm:$0xff] }
 0x1b2   : > { %873 = vxpose.xlu2.b32.cont [5/16] (narrow) %v697_v28, 8  ;;  %v734_v28 = vld [vmem:[%s3333_s24 + $0x2c8] sm:$0xff] }
 0x1b3   : > { %841 = vxpose.xlu1.b32.cont [5/16] (narrow) %v681_v29, 8  ;;  %v718_v29 = vld [vmem:[%s3333_s24 + $0x248] sm:$0xff] }
 0x1b4   : > { %809 = vxpose.xlu0.b32.cont [5/16] (narrow) %v665_v30, 8  ;;  %v751_v30 = vld [vmem:[%s3333_s24 + $0x350] sm:$0xff] }
 0x1ba   : > { %874 = vxpose.xlu2.b32.cont [6/16] (narrow) %v698_v31, 8  ;;  %v735_v31 = vld [vmem:[%s3333_s24 + $0x2d0] sm:$0xff] }
 0x1bb   : > { %842 = vxpose.xlu1.b32.cont [6/16] (narrow) %v682_v32, 8  ;;  %v719_v32 = vld [vmem:[%s3333_s24 + $0x250] sm:$0xff] }
 0x1bc   : > { %810 = vxpose.xlu0.b32.cont [6/16] (narrow) %v666_v33, 8  ;;  %v752_v33 = vld [vmem:[%s3333_s24 + $0x358] sm:$0xff] }
 0x1c2   : > { %875 = vxpose.xlu2.b32.cont [7/16] (narrow) %v699_v34, 8  ;;  %v736_v34 = vld [vmem:[%s3333_s24 + $0x2d8] sm:$0xff] }
 0x1c3   : > { %843 = vxpose.xlu1.b32.cont [7/16] (narrow) %v683_v35, 8  ;;  %v720_v35 = vld [vmem:[%s3333_s24 + $0x258] sm:$0xff] }
 0x1c4   : > { %811 = vxpose.xlu0.b32.cont [7/16] (narrow) %v667_v36, 8  ;;  %v753_v36 = vld [vmem:[%s3333_s24 + $0x360] sm:$0xff] }
 0x1ca   : > { %876 = vxpose.xlu2.b32.cont [8/16] (narrow) %v700_v37, 8  ;;  %v737_v37 = vld [vmem:[%s3333_s24 + $0x2e0] sm:$0xff] }
 0x1cb   : > { %844 = vxpose.xlu1.b32.cont [8/16] (narrow) %v684_v38, 8  ;;  %v721_v38 = vld [vmem:[%s3333_s24 + $0x260] sm:$0xff] }
 0x1cc   : > { %812 = vxpose.xlu0.b32.cont [8/16] (narrow) %v668_v39, 8  ;;  %v754_v39 = vld [vmem:[%s3333_s24 + $0x368] sm:$0xff] }
 0x1d2   : > { %877 = vxpose.xlu2.b32.cont [9/16] (narrow) %v701_v40, 8  ;;  %v738_v40 = vld [vmem:[%s3333_s24 + $0x2e8] sm:$0xff] }
 0x1d3   : > { %845 = vxpose.xlu1.b32.cont [9/16] (narrow) %v685_v41, 8  ;;  %v722_v41 = vld [vmem:[%s3333_s24 + $0x268] sm:$0xff] }
 0x1d4   : > { %813 = vxpose.xlu0.b32.cont [9/16] (narrow) %v669_v42, 8  ;;  %v755_v42 = vld [vmem:[%s3333_s24 + $0x370] sm:$0xff] }
 0x1da   : > { %878 = vxpose.xlu2.b32.cont [10/16] (narrow) %v702_v43, 8  ;;  %v739_v43 = vld [vmem:[%s3333_s24 + $0x2f0] sm:$0xff] }
 0x1db   : > { %846 = vxpose.xlu1.b32.cont [10/16] (narrow) %v686_v44, 8  ;;  %v723_v44 = vld [vmem:[%s3333_s24 + $0x270] sm:$0xff] }
 0x1dc   : > { %814 = vxpose.xlu0.b32.cont [10/16] (narrow) %v670_v45, 8  ;;  %v756_v45 = vld [vmem:[%s3333_s24 + $0x378] sm:$0xff] }
 0x1e2   : > { %879 = vxpose.xlu2.b32.cont [11/16] (narrow) %v703_v46, 8  ;;  %v740_v46 = vld [vmem:[%s3333_s24 + $0x2f8] sm:$0xff] }
 0x1e3   : > { %847 = vxpose.xlu1.b32.cont [11/16] (narrow) %v687_v47, 8  ;;  %v724_v47 = vld [vmem:[%s3333_s24 + $0x278] sm:$0xff] }
 0x1e4   : > { %815 = vxpose.xlu0.b32.cont [11/16] (narrow) %v671_v48, 8  ;;  %v757_v48 = vld [vmem:[%s3333_s24 + $0x380] sm:$0xff] }
 0x1ea   : > { %880 = vxpose.xlu2.b32.cont [12/16] (narrow) %v704_v49, 8  ;;  %v758_v49 = vld [vmem:[%s3333_s24 + $0x388] sm:$0xff] }
 0x1eb   : > { %848 = vxpose.xlu1.b32.cont [12/16] (narrow) %v688_v50, 8  ;;  %v759_v50 = vld [vmem:[%s3333_s24 + $0x390] sm:$0xff] }
 0x1ec   : > { %816 = vxpose.xlu0.b32.cont [12/16] (narrow) %v672_v51, 8  ;;  %v760_v51 = vld [vmem:[%s3333_s24 + $0x398] sm:$0xff] }
 0x1f2   : > { %881 = vxpose.xlu2.b32.cont [13/16] (narrow) %v705_v52, 8  ;;  %v761_v52 = vld [vmem:[%s3333_s24 + $0x3a0] sm:$0xff] }
 0x1f3   : > { %849 = vxpose.xlu1.b32.cont [13/16] (narrow) %v689_v53, 8  ;;  %v762_v53 = vld [vmem:[%s3333_s24 + $0x3a8] sm:$0xff] }
 0x1f4   : > { %817 = vxpose.xlu0.b32.cont [13/16] (narrow) %v673_v54, 8  ;;  %v763_v54 = vld [vmem:[%s3333_s24 + $0x3b0] sm:$0xff] }
 0x1fa   : > { %882 = vxpose.xlu2.b32.cont [14/16] (narrow) %v706_v55, 8  ;;  %v764_v55 = vld [vmem:[%s3333_s24 + $0x3b8] sm:$0xff] }
 0x1fb   : > { %850 = vxpose.xlu1.b32.cont [14/16] (narrow) %v690_v56, 8  ;;  %v765_v56 = vld [vmem:[%s3333_s24 + $0x3c0] sm:$0xff] }
 0x1fc   : > { %818 = vxpose.xlu0.b32.cont [14/16] (narrow) %v674_v57, 8  ;;  %v766_v57 = vld [vmem:[%s3333_s24 + $0x3c8] sm:$0xff] }
 0x202   : > { %883 = vxpose.xlu2.b32.cont [15/16] (narrow) %v707_v58, 8  ;;  %v3178_v58 = vmov 2  }
 0x203   : > { %851 = vxpose.xlu1.b32.cont [15/16] (narrow) %v691_v59, 8  ;;  %v767_v59 = vld [vmem:[%s3333_s24 + $0x3d0] sm:$0xff] }
 0x204   : > { %819 = vxpose.xlu0.b32.cont [15/16] (narrow) %v675_v60, 8  ;;  %v3499_v60 = vld [vmem:[%s3495_s28] sm:$0x7] }
 0x20a   : > { %884 = vxpose.xlu2.b32.end [16/16] (narrow) %v708_v61, 8  ;;  %v768_v61 = vld [vmem:[%s3333_s24 + $0x3d8] sm:$0xff] }
 0x20b   : > { %852 = vxpose.xlu1.b32.end [16/16] (narrow) %v692_v62, 8  ;;  %v3504_v62 = vld [vmem:[%s3495_s28 + $0x8] sm:$0x7] }
 0x20c   : > { %820 = vxpose.xlu0.b32.end [16/16] (narrow) %v676_v63, 8  ;;  %v769_v63 = vld [vmem:[%s3333_s24 + $0x3e0] sm:$0xff] }
 0x212   : > { %965 = vxpose.xlu2.b32.start [1/16] (narrow) %v741_v0, 8  ;;  %v3509_v0 = vld [vmem:[%s3495_s28 + $0x4] sm:$0x7] }
 0x213   : > { %933 = vxpose.xlu1.b32.start [1/16] (narrow) %v725_v1, 8  ;;  %v3512_v1 = vld [vmem:[%s3495_s28 + $0xc] sm:$0x7] }
 0x214   : > { %901 = vxpose.xlu0.b32.start [1/16] (narrow) %v709_v2, 8  ;;  %v770_v2 = vld [vmem:[%s3333_s24 + $0x3e8] sm:$0xff] }
 0x21a   : > { %966 = vxpose.xlu2.b32.cont [2/16] (narrow) %v742_v3, 8  ;;  %v3518_v3 = vld [vmem:[%s3495_s28 + $0x10] sm:$0x7] }
 0x21b   : > { %934 = vxpose.xlu1.b32.cont [2/16] (narrow) %v726_v4, 8  ;;  %v3521_v4 = vld [vmem:[%s3495_s28 + $0x14] sm:$0x7] }
 0x21c   : > { %902 = vxpose.xlu0.b32.cont [2/16] (narrow) %v710_v5, 8  ;;  %v771_v5 = vld [vmem:[%s3333_s24 + $0x3f0] sm:$0xff] }
 0x222   : > { %967 = vxpose.xlu2.b32.cont [3/16] (narrow) %v743_v6, 8  ;;  %v3527_v6 = vld [vmem:[%s3495_s28 + $0x18] sm:$0x7] }
 0x223   : > { %935 = vxpose.xlu1.b32.cont [3/16] (narrow) %v727_v7, 8  ;;  %v3530_v7 = vld [vmem:[%s3495_s28 + $0x1c] sm:$0x7] }
 0x224   : > { %903 = vxpose.xlu0.b32.cont [3/16] (narrow) %v711_v8, 8  ;;  %v772_v8 = vld [vmem:[%s3333_s24 + $0x3f8] sm:$0xff] }
 0x22a   : > { %968 = vxpose.xlu2.b32.cont [4/16] (narrow) %v744_v9, 8  ;;  %v4697_v9 = vmov 0  }
 0x22b   : > { %936 = vxpose.xlu1.b32.cont [4/16] (narrow) %v728_v10, 8  ;;  %v3541_v10 = vpop.trf.xlu2 }
 0x22c   : > { %904 = vxpose.xlu0.b32.cont [4/16] (narrow) %v712_v11, 8  ;;  %4716 = vst [vmem:[#allocation2_spill] sm:$0xff] %v3541_v10  ;;  %v3180_v11 = vmov 3  }
 0x232   : > { %969 = vxpose.xlu2.b32.cont [5/16] (narrow) %v745_v12, 8 }
 0x233   : > { %937 = vxpose.xlu1.b32.cont [5/16] (narrow) %v729_v13, 8  ;;  %v3546_v12 = vpop.trf.xlu2  ;;  %v3548_v13 = vpop.trf.xlu1 }
 0x234   : > { %905 = vxpose.xlu0.b32.cont [5/16] (narrow) %v713_v14, 8  ;;  %4717 = vst [vmem:[#allocation3_spill] sm:$0xff] %v3546_v12 }
 0x235   : > { %4718 = vst [vmem:[#allocation4_spill] sm:$0xff] %v3548_v13 }
 0x23a   : > { %970 = vxpose.xlu2.b32.cont [6/16] (narrow) %v746_v15, 8 }
 0x23b   : > { %938 = vxpose.xlu1.b32.cont [6/16] (narrow) %v730_v16, 8  ;;  %v3553_v14 = vpop.trf.xlu2  ;;  %v3555_v15 = vpop.trf.xlu1 }
 0x23c   : > { %906 = vxpose.xlu0.b32.cont [6/16] (narrow) %v714_v17, 8  ;;  %4719 = vst [vmem:[#allocation5_spill] sm:$0xff] %v3555_v15  ;;  %v4060_v15 = vld [vmem:[%s3495_s28 + $0x1c] sm:$0x7] }
 0x242   : > { %971 = vxpose.xlu2.b32.cont [7/16] (narrow) %v747_v18, 8 }
 0x243   : > { %939 = vxpose.xlu1.b32.cont [7/16] (narrow) %v731_v19, 8  ;;  %v3559_v16 = vpop.trf.xlu2  ;;  %v3561_v17 = vpop.trf.xlu1 }
 0x244   : > { %907 = vxpose.xlu0.b32.cont [7/16] (narrow) %v715_v20, 8  ;;  %4720 = vst [vmem:[#allocation6_spill] sm:$0xff] %v3559_v16  ;;  %v3181_v20 = vmov 1  }
 0x245   : > { %4721 = vst [vmem:[#allocation7_spill] sm:$0xff] %v3561_v17 }
 0x24a   : > { %972 = vxpose.xlu2.b32.cont [8/16] (narrow) %v748_v21, 8 }
 0x24b   : > { %940 = vxpose.xlu1.b32.cont [8/16] (narrow) %v732_v22, 8  ;;  %v3567_v19 = vpop.trf.xlu1 }
 0x24c   : > { %908 = vxpose.xlu0.b32.cont [8/16] (narrow) %v716_v23, 8  ;;  %4723 = vst [vmem:[#allocation9_spill] sm:$0xff] %v3567_v19 }
 0x252   : > { %973 = vxpose.xlu2.b32.cont [9/16] (narrow) %v749_v24, 8 }
 0x253   : > { %941 = vxpose.xlu1.b32.cont [9/16] (narrow) %v733_v25, 8 }
 0x254   : > { %909 = vxpose.xlu0.b32.cont [9/16] (narrow) %v717_v26, 8 }
 0x25a   : > { %974 = vxpose.xlu2.b32.cont [10/16] (narrow) %v750_v27, 8  ;;  %v3584_v27 = vld [vmem:[%s4687_s1] sm:$0xff] }
 0x25b   : > { %942 = vxpose.xlu1.b32.cont [10/16] (narrow) %v734_v28, 8  ;;  %v3587_v28 = vperm.slane %v3584_v27, 2 }
 0x25c   : > { %910 = vxpose.xlu0.b32.cont [10/16] (narrow) %v718_v29, 8  ;;  %v3590_v29 = vperm.slane %v3584_v27, 0 }
 0x262   : > { %975 = vxpose.xlu2.b32.cont [11/16] (narrow) %v751_v30, 8 }
 0x263   : > { %943 = vxpose.xlu1.b32.cont [11/16] (narrow) %v735_v31, 8 }
 0x264   : > { %911 = vxpose.xlu0.b32.cont [11/16] (narrow) %v719_v32, 8 }
 0x26a   : > { %976 = vxpose.xlu2.b32.cont [12/16] (narrow) %v752_v33, 8 }
 0x26b   : > { %944 = vxpose.xlu1.b32.cont [12/16] (narrow) %v736_v34, 8  ;;  %v3182_v34 = vmov 4  }
 0x26c   : > { %912 = vxpose.xlu0.b32.cont [12/16] (narrow) %v720_v35, 8 }
 0x272   : > { %977 = vxpose.xlu2.b32.cont [13/16] (narrow) %v753_v36, 8 }
 0x273   : > { %945 = vxpose.xlu1.b32.cont [13/16] (narrow) %v737_v37, 8 }
 0x274   : > { %913 = vxpose.xlu0.b32.cont [13/16] (narrow) %v721_v38, 8 }
 0x27a   : > { %978 = vxpose.xlu2.b32.cont [14/16] (narrow) %v754_v39, 8 }
 0x27b   : > { %946 = vxpose.xlu1.b32.cont [14/16] (narrow) %v738_v40, 8 }
 0x27c   : > { %914 = vxpose.xlu0.b32.cont [14/16] (narrow) %v722_v41, 8 }
 0x282   : > { %979 = vxpose.xlu2.b32.cont [15/16] (narrow) %v755_v42, 8 }
 0x283   : > { %947 = vxpose.xlu1.b32.cont [15/16] (narrow) %v739_v43, 8 }
 0x284   : > { %915 = vxpose.xlu0.b32.cont [15/16] (narrow) %v723_v44, 8 }
 0x28a   : > { %980 = vxpose.xlu2.b32.end [16/16] (narrow) %v756_v45, 8 }
 0x28b   : > { %948 = vxpose.xlu1.b32.end [16/16] (narrow) %v740_v46, 8 }
 0x28c   : > { %916 = vxpose.xlu0.b32.end [16/16] (narrow) %v724_v47, 8 }
 0x294   : > { %997 = vxpose.xlu0.b32.start [1/16] (narrow) %v757_v48, 8 }
 0x29c   : > { %998 = vxpose.xlu0.b32.cont [2/16] (narrow) %v758_v49, 8 }
 0x2a4   : > { %999 = vxpose.xlu0.b32.cont [3/16] (narrow) %v759_v50, 8 }
 0x2ab   : > { %v3565_v18 = vpop.trf.xlu2 }
 0x2ac   : > { %1000 = vxpose.xlu0.b32.cont [4/16] (narrow) %v760_v51, 8  ;;  %4722 = vst [vmem:[#allocation8_spill] sm:$0xff] %v3565_v18 }
 0x2b4   : > { %1001 = vxpose.xlu0.b32.cont [5/16] (narrow) %v761_v52, 8 }
 0x2b7   : > { %v3571_v22 = vpop.trf.xlu1 }
 0x2b8   : > { %4724 = vst [vmem:[#allocation10_spill] sm:$0xff] %v3571_v22 }
 0x2bc   : > { %1002 = vxpose.xlu0.b32.cont [6/16] (narrow) %v762_v53, 8 }
 0x2c4   : > { %1003 = vxpose.xlu0.b32.cont [7/16] (narrow) %v763_v54, 8 }
 0x2cc   : > { %1004 = vxpose.xlu0.b32.cont [8/16] (narrow) %v764_v55, 8 }
 0x2d4   : > { %1005 = vxpose.xlu0.b32.cont [9/16] (narrow) %v765_v56, 8 }
 0x2dc   : > { %1006 = vxpose.xlu0.b32.cont [10/16] (narrow) %v766_v57, 8 }
 0x2de   : > { %3086 = vset.pattern.permute.xlu1 %v3178_v58 }
 0x2e4   : > { %1007 = vxpose.xlu0.b32.cont [11/16] (narrow) %v767_v59, 8 }
 0x2e5   : > { %1036 = vperm.xlu1 %3086, %v3499_v60  }
 0x2ec   : > { %1008 = vxpose.xlu0.b32.cont [12/16] (narrow) %v768_v61, 8  ;;  %3087 = vset.pattern.permute.xlu2 %v3178_v58 }
 0x2ed   : > { %1046 = vperm.xlu1 %3086, %v3504_v62  }
 0x2f3   : > { %1041 = vperm.xlu2 %3087, %v3509_v0  }
 0x2f4   : > { %1009 = vxpose.xlu0.b32.cont [13/16] (narrow) %v769_v63, 8 }
 0x2f5   : > { %1051 = vperm.xlu1 %3086, %v3512_v1  }
 0x2fb   : > { %1056 = vperm.xlu2 %3087, %v3518_v3  }
 0x2fc   : > { %1010 = vxpose.xlu0.b32.cont [14/16] (narrow) %v770_v2, 8 }
 0x2fd   : > { %1061 = vperm.xlu1 %3086, %v3521_v4  }
 0x303   : > { %1066 = vperm.xlu2 %3087, %v3527_v6  }
 0x304   : > { %1011 = vxpose.xlu0.b32.cont [15/16] (narrow) %v771_v5, 8 }
 0x305   : > { %1071 = vperm.xlu1 %3086, %v3530_v7  }
 0x30b   : > { %3088 = vset.pattern.permute.xlu2 %v4697_v9 }
 0x30c   : > { %1012 = vxpose.xlu0.b32.end [16/16] (narrow) %v772_v8, 8  ;;  %1084 = vperm.xlu2 %3088, %v3499_v60   ;;  %v3632_v8 = vperm.slane %v3584_v27, 1 }
 0x30d   : > { %3089 = vset.pattern.permute.xlu1 %v4697_v9 }
 0x30e   : > { %1088 = vperm.xlu1 %3089, %v3509_v0  }
 0x314   : > { %1096 = vperm.xlu2 %3088, %v3512_v1  }
 0x316   : > { %1100 = vperm.xlu1 %3089, %v3518_v3  }
 0x31c   : > { %1104 = vperm.xlu2 %3088, %v3521_v4  }
 0x31e   : > { %1108 = vperm.xlu1 %3089, %v3527_v6  }
 0x324   : > { %1112 = vperm.xlu2 %3088, %v3530_v7  }
 0x326   : > { %3091 = vset.pattern.permute.xlu1 %v3180_v11 }
 0x327   : > { %1141 = vperm.xlu1 %3091, %v3499_v60  }
 0x32c   : > { %3092 = vset.pattern.permute.xlu2 %v3180_v11  ;;  %v3634_v11 = vpop.trf.xlu0 }
 0x32d   : > { %1145 = vperm.xlu2 %3092, %v3509_v0   ;;  %4725 = vst [vmem:[#allocation11_spill] sm:$0xff] %v3634_v11 }
 0x32f   : > { %1149 = vperm.xlu1 %3091, %v3504_v62  }
 0x335   : > { %1153 = vperm.xlu2 %3092, %v3512_v1  }
 0x337   : > { %1157 = vperm.xlu1 %3091, %v3518_v3  }
 0x33d   : > { %1161 = vperm.xlu2 %3092, %v3521_v4  }
 0x33f   : > { %1165 = vperm.xlu1 %3091, %v3527_v6  }
 0x345   : > { %1169 = vperm.xlu2 %3092, %v3530_v7  }
 0x347   : > { %3093 = vset.pattern.permute.xlu1 %v3181_v20 }
 0x348   : > { %1182 = vperm.xlu1 %3093, %v3499_v60  }
 0x34d   : > { %3094 = vset.pattern.permute.xlu2 %v3181_v20  ;;  %v1042_v21 = vpop.permute.xlu2 %1041 }
 0x34e   : > { %1186 = vperm.xlu2 %3094, %v3509_v0   ;;  %v1075_v50 = vmin.f32 %v3587_v28, %v1042_v21 }
 0x350   : > { %1190 = vperm.xlu1 %3093, %v3504_v62  }
 0x355   : > { %v1057_v23 = vpop.permute.xlu2 %1056 }
 0x356   : > { %1194 = vperm.xlu2 %3094, %v3512_v1   ;;  %v1078_v56 = vmin.f32 %v3587_v28, %v1057_v23 }
 0x357   : > { %v1037_v24 = vpop.permute.xlu1 %1036 }
 0x358   : > { %1198 = vperm.xlu1 %3093, %v3518_v3   ;;  %v1074_v32 = vmin.f32 %v3587_v28, %v1037_v24 }
 0x35d   : > { %v1067_v25 = vpop.permute.xlu2 %1066 }
 0x35e   : > { %1202 = vperm.xlu2 %3094, %v3521_v4   ;;  %v1080_v61 = vmin.f32 %v3587_v28, %v1067_v25 }
 0x35f   : > { %v3578_v26 = vpop.permute.xlu1 %1046 }
 0x360   : > { %1206 = vperm.xlu1 %3093, %v3527_v6  }
 0x366   : > { %1210 = vperm.xlu2 %3094, %v3530_v7   ;;  %v1085_v30 = vpop.permute.xlu2 %1084 }
 0x367   : > { %v1052_v31 = vpop.permute.xlu1 %1051  ;;  %v1115_v33 = vmax.f32 %v3590_v29, %v1085_v30 }
 0x368   : > { %3095 = vset.pattern.permute.xlu1 %v3182_v34  ;;  %v1077_v38 = vmin.f32 %v3587_v28, %v1052_v31 }
 0x369   : > { %1247 = vperm.xlu1 %3095, %v3499_v60   ;;  %v3596_v35 = vsub.f32 %v1074_v32, %v1115_v33 }
 0x36e   : > { %3096 = vset.pattern.permute.xlu2 %v3182_v34  ;;  %v1097_v36 = vpop.permute.xlu2 %1096 }
 0x36f   : > { %v1062_v37 = vpop.permute.xlu1 %1061  ;;  %v1118_v39 = vmax.f32 %v3590_v29, %v1097_v36  ;;  %1251 = vperm.xlu2 %3096, %v3509_v0  }
 0x370   : > { %v1079_v43 = vmin.f32 %v3587_v28, %v1062_v37  ;;  %v3643_v37 = vpop.trf.xlu0 }
 0x371   : > { %1255 = vperm.xlu1 %3095, %v3504_v62   ;;  %v1126_v40 = vsub.f32 %v1077_v38, %v1118_v39  ;;  %4726 = vst [vmem:[#allocation12_spill] sm:$0xff] %v3643_v37 }
 0x373   : > { %3090 = vset.pattern.permute.xlu0 %v4697_v9  ;;  %v1134_v25 = vmax.f32 %v1126_v40, 0.0 }
 0x376   : > { %v1105_v41 = vpop.permute.xlu2 %1104 }
 0x377   : > { %v1072_v42 = vpop.permute.xlu1 %1071  ;;  %v1120_v44 = vmax.f32 %v3590_v29, %v1105_v41  ;;  %1259 = vperm.xlu2 %3096, %v3512_v1  }
 0x378   : > { %v1081_v47 = vmin.f32 %v3587_v28, %v1072_v42 }
 0x379   : > { %1263 = vperm.xlu1 %3095, %v3518_v3   ;;  %v1128_v45 = vsub.f32 %v1079_v43, %v1120_v44 }
 0x37a   : > { %1092 = vperm.xlu0 %3090, %v3504_v62  }
 0x37b   : > { %v1136_v39 = vmax.f32 %v1128_v45, 0.0 }
 0x37e   : > { %v1113_v46 = vpop.permute.xlu2 %1112 }
 0x37f   : > { %v1122_v48 = vmax.f32 %v3590_v29, %v1113_v46  ;;  %1267 = vperm.xlu2 %3096, %v3521_v4  }
 0x380   : > { %v1089_v49 = vpop.permute.xlu1 %1088 }
 0x381   : > { %v1116_v51 = vmax.f32 %v3590_v29, %v1089_v49  ;;  %1271 = vperm.xlu1 %3095, %v3527_v6   ;;  %v1130_v52 = vsub.f32 %v1081_v47, %v1122_v48  ;;  %v3628_v6 = vperm.slane %v3584_v27, 3 }
 0x382   : > { %3097 = vset.pattern.permute.xlu0 %v3182_v34 }
 0x383   : > { %v1124_v53 = vsub.f32 %v1075_v50, %v1116_v51  ;;  %1275 = vperm.xlu0 %3097, %v3530_v7   ;;  %v3653_v51 = vpop.trf.xlu0 }
 0x384   : > { %4727 = vst [vmem:[#allocation13_spill] sm:$0xff] %v3653_v51 }
 0x387   : > { %v1146_v55 = vpop.permute.xlu2 %1145 }
 0x388   : > { %v1101_v54 = vpop.permute.xlu1 %1100  ;;  %v1173_v42 = vmin.f32 %v3628_v6, %v1146_v55  ;;  %v3656_v55 = vperm.slane %v3584_v27, 4 }
 0x389   : > { %v1119_v57 = vmax.f32 %v3590_v29, %v1101_v54  ;;  %v1138_v54 = vmax.f32 %v1130_v52, 0.0 }
 0x38b   : > { %v3617_v58 = vsub.f32 %v1078_v56, %v1119_v57 }
 0x38f   : > { %v1154_v60 = vpop.permute.xlu2 %1153 }
 0x390   : > { %v1109_v59 = vpop.permute.xlu1 %1108  ;;  %v1175_v7 = vmin.f32 %v3628_v6, %v1154_v60 }
 0x391   : > { %v1121_v62 = vmax.f32 %v3590_v29, %v1109_v59  ;;  %v1132_v59 = vmax.f32 %v1124_v53, 0.0 }
 0x393   : > { %v3621_v63 = vsub.f32 %v1080_v61, %v1121_v62 }
 0x397   : > { %v1162_v0 = vpop.permute.xlu2 %1161 }
 0x398   : > { %v1177_v33 = vmin.f32 %v3628_v6, %v1162_v0 }
 0x399   : > { %v1142_v1 = vpop.permute.xlu1 %1141 }
 0x39a   : > { %v1172_v52 = vmin.f32 %v3628_v6, %v1142_v1 }
 0x39f   : > { %v1170_v2 = vpop.permute.xlu2 %1169 }
 0x3a0   : > { %v1179_v46 = vmin.f32 %v3628_v6, %v1170_v2 }
 0x3a1   : > { %v3623_v3 = vpop.permute.xlu1 %1149 }
 0x3a8   : > { %v1187_v4 = vpop.permute.xlu2 %1186 }
 0x3a9   : > { %v3625_v5 = vpop.permute.xlu1 %1157  ;;  %v1214_v43 = vmax.f32 %v3632_v8, %v1187_v4  ;;  %v3661_v4 = vpop.trf.xlu0 }
 0x3aa   : > { %4728 = vst [vmem:[#allocation14_spill] sm:$0xff] %v3661_v4 }
 0x3ab   : > { %v1222_v49 = vsub.f32 %v1173_v42, %v1214_v43 }
 0x3ad   : > { %v1230_v56 = vmax.f32 %v1222_v49, 0.0  ;;  %v1176_v49 = vmin.f32 %v3628_v6, %v3625_v5  ;;  %v1135_v5 = vmax.f32 %v3617_v58, 0.0 }
 0x3af   : > { %v1238_v62 = vmul.f32 %v1230_v56, %v1132_v59 }
 0x3b0   : > { %v1195_v20 = vpop.permute.xlu2 %1194 }
 0x3b1   : > { %v3636_v21 = vpop.permute.xlu1 %1165  ;;  %v1216_v23 = vmax.f32 %v3632_v8, %v1195_v20 }
 0x3b3   : > { %v1224_v24 = vsub.f32 %v1175_v7, %v1216_v23 }
 0x3b5   : > { %v1232_v30 = vmax.f32 %v1224_v24, 0.0 }
 0x3b7   : > { %v3639_v31 = vmul.f32 %v1232_v30, %v1134_v25 }
 0x3b8   : > { %v1203_v32 = vpop.permute.xlu2 %1202 }
 0x3b9   : > { %v1218_v34 = vmax.f32 %v3632_v8, %v1203_v32 }
 0x3ba   : > { %v1183_v36 = vpop.permute.xlu1 %1182 }
 0x3bb   : > { %v1226_v38 = vsub.f32 %v1177_v33, %v1218_v34  ;;  %v1213_v7 = vmax.f32 %v3632_v8, %v1183_v36  ;;  %v3666_v33 = vpop.trf.xlu0  ;;  %v1131_v34 = vmax.f32 %v3596_v35, 0.0 }
 0x3bc   : > { %4729 = vst [vmem:[#allocation15_spill] sm:$0xff] %v3666_v33 }
 0x3bd   : > { %v1234_v41 = vmax.f32 %v1226_v38, 0.0  ;;  %v1221_v27 = vsub.f32 %v1172_v52, %v1213_v7 }
 0x3bf   : > { %v3647_v44 = vmul.f32 %v1234_v41, %v1136_v39  ;;  %v1229_v30 = vmax.f32 %v1221_v27, 0.0  ;;  %v1174_v27 = vmin.f32 %v3628_v6, %v3623_v3 }
 0x3c0   : > { %v1211_v40 = vpop.permute.xlu2 %1210 }
 0x3c1   : > { %v1220_v47 = vmax.f32 %v3632_v8, %v1211_v40  ;;  %v1237_v1 = vmul.f32 %v1229_v30, %v1131_v34 }
 0x3c2   : > { %v3651_v48 = vpop.permute.xlu1 %1190 }
 0x3c3   : > { %v1228_v50 = vsub.f32 %v1179_v46, %v1220_v47 }
 0x3c5   : > { %v1236_v45 = vmax.f32 %v1228_v50, 0.0 }
 0x3c7   : > { %v3658_v57 = vmul.f32 %v1236_v45, %v1138_v54  ;;  %v3683_v54 = vpop.trf.xlu0 }
 0x3c9   : > { %v1252_v60 = vpop.permute.xlu2 %1251 }
 0x3ca   : > { %v1199_v61 = vpop.permute.xlu1 %1198  ;;  %v1279_v0 = vadd.f32 %v1252_v60, %v3656_v55 }
 0x3cb   : > { %v1217_v35 = vmax.f32 %v3632_v8, %v1199_v61  ;;  %v1215_v61 = vmax.f32 %v3632_v8, %v3651_v48 }
 0x3cc   : > { %v1287_v2 = vsub.f32 %v1279_v0, %v1238_v62 }
 0x3cd   : > { %v1225_v59 = vsub.f32 %v1176_v49, %v1217_v35  ;;  %v1223_v48 = vsub.f32 %v1174_v27, %v1215_v61 }
 0x3ce   : > { %3113 = vrcp.f32 %v1287_v2 }
 0x3d1   : > { %v1260_v20 = vpop.permute.xlu2 %1259 }
 0x3d2   : > { %v1207_v23 = vpop.permute.xlu1 %1206  ;;  %v1281_v53 = vadd.f32 %v1260_v20, %v3656_v55  ;;  %v1178_v20 = vmin.f32 %v3628_v6, %v3636_v21 }
 0x3d3   : > { %v1219_v7 = vmax.f32 %v3632_v8, %v1207_v23  ;;  %v1076_v8 = vmin.f32 %v3587_v28, %v3578_v26  ;;  %v1137_v26 = vmax.f32 %v3621_v63, 0.0 }
 0x3d4   : > { %v3114_v24 = vpop.eup %3113  ;;  %v1289_v39 = vsub.f32 %v1281_v53, %v3639_v31 }
 0x3d5   : > { %v1303_v25 = vmul.f32 %v3114_v24, %v1287_v2  ;;  %v1233_v2 = vmax.f32 %v1225_v59, 0.0 }
 0x3d6   : > { %3115 = vrcp.f32 %v1289_v39 }
 0x3d7   : > { %v1311_v32 = vsub.f32 2.0, %v1303_v25 }
 0x3d9   : > { %v1319_v38 = vmul.f32 %v3114_v24, %v1311_v32  ;;  %v1268_v41 = vpop.permute.xlu2 %1267  ;;  %v1227_v32 = vsub.f32 %v1178_v20, %v1219_v7 }
 0x3da   : > { %v1283_v40 = vadd.f32 %v1268_v41, %v3656_v55 }
 0x3db   : > { %v1248_v36 = vpop.permute.xlu1 %1247  ;;  %v3671_v43 = vmul.f32 %v1319_v38, %v1238_v62  ;;  %v1241_v38 = vmul.f32 %v1233_v2, %v1135_v5 }
 0x3dc   : > { %v1278_v42 = vadd.f32 %v1248_v36, %v3656_v55  ;;  %v1291_v50 = vsub.f32 %v1283_v40, %v3647_v44  ;;  %v3116_v56 = vpop.eup %3115  ;;  %v1231_v40 = vmax.f32 %v1223_v48, 0.0 }
 0x3dd   : > { %v3676_v47 = vsel %vm1334_vm0, %v3671_v43, -inf  ;;  %v1305_v62 = vmul.f32 %v3116_v56, %v1289_v39 }
 0x3de   : > { %v1286_v46 = vsub.f32 %v1278_v42, %v1237_v1  ;;  %1489 = vmax.xlane.f32.xlu1 %v3676_v47  ;;  %v1235_v42 = vmax.f32 %v1227_v32, 0.0 }
 0x3df   : > { %v1313_v24 = vsub.f32 2.0, %v1305_v62 }
 0x3e0   : > { %3117 = vrcp.f32 %v1286_v46 }
 0x3e1   : > { %3119 = vrcp.f32 %v1291_v50  ;;  %v1321_v41 = vmul.f32 %v3116_v56, %v1313_v24 }
 0x3e3   : > { %v1256_v45 = vpop.permute.xlu1 %1255  ;;  %v3707_v49 = vmul.f32 %v1321_v41, %v3639_v31 }
 0x3e6   : > { %v3118_v60 = vpop.eup %3117 }
 0x3e7   : > { %v1302_v0 = vmul.f32 %v3118_v60, %v1286_v46  ;;  %v3120_v30 = vpop.eup %3119 }
 0x3e8   : > { %v1307_v3 = vmul.f32 %v3120_v30, %v1291_v50  ;;  %v1243_v50 = vmul.f32 %v1235_v42, %v1137_v26 }
 0x3e9   : > { %v1310_v52 = vsub.f32 2.0, %v1302_v0 }
 0x3ea   : > { %v1315_v28 = vsub.f32 2.0, %v1307_v3 }
 0x3eb   : > { %v1318_v25 = vmul.f32 %v3118_v60, %v1310_v52  ;;  %v1264_v53 = vpop.permute.xlu1 %1263 }
 0x3ec   : > { %v1093_v34 = vpop.permute.xlu0 %1092  ;;  %v1282_v23 = vadd.f32 %v1264_v53, %v3656_v55  ;;  %v1323_v7 = vmul.f32 %v3120_v30, %v1315_v28 }
 0x3ed   : > { %v1117_v58 = vmax.f32 %v3590_v29, %v1093_v34  ;;  %v3697_v39 = vmul.f32 %v1318_v25, %v1237_v1  ;;  %v1280_v29 = vadd.f32 %v1256_v45, %v3656_v55  ;;  %v3713_v45 = vsel %vm1334_vm0, %v3707_v49, -inf }
 0x3ee   : > { %v1290_v21 = vsub.f32 %v1282_v23, %v1241_v38  ;;  %v3718_v5 = vmul.f32 %v1323_v7, %v3647_v44 }
 0x3ef   : > { %v1125_v6 = vsub.f32 %v1076_v8, %v1117_v58  ;;  %v3701_v36 = vsel %vm1334_vm0, %v3697_v39, -inf }
 0x3f0   : > { %3121 = vrcp.f32 %v1290_v21  ;;  %1487 = vmax.xlane.f32.xlu2 %v3701_v36  ;;  %v3724_v53 = vsel %vm1334_vm0, %v3718_v5, -inf }
 0x3f1   : > { %v1133_v46 = vmax.f32 %v1125_v6, 0.0 }
 0x3f3   : > { %v1239_v1 = vmul.f32 %v1231_v40, %v1133_v46  ;;  %v1272_v35 = vpop.permute.xlu1 %1271  ;;  %v1029_v46 = vlaneseq }
 0x3f4   : > { %v1284_v56 = vadd.f32 %v1272_v35, %v3656_v55 }
 0x3f5   : > { %v1288_v59 = vsub.f32 %v1280_v29, %v1239_v1  ;;  %v1276_v60 = vpop.permute.xlu0 %1275  ;;  %v3754_v26 = vand.u32 127, %v1029_v46 }
 0x3f6   : > { %v3122_v62 = vpop.eup %3121  ;;  %v1292_v0 = vsub.f32 %v1284_v56, %v1243_v50  ;;  %v1285_v2 = vadd.f32 %v1276_v60, %v3656_v55 }
 0x3f7   : > { %3123 = vrcp.f32 %v1288_v59  ;;  %v1306_v63 = vmul.f32 %v3122_v62, %v1290_v21 }
 0x3f8   : > { %3125 = vrcp.f32 %v1292_v0  ;;  %1493 = vmax.xlane.f32.xlu2 %v3713_v45  ;;  %v1293_v61 = vsub.f32 %v1285_v2, %v3658_v57 }
 0x3f9   : > { %v1314_v31 = vsub.f32 2.0, %v1306_v63 }
 0x3fa   : > { %3127 = vrcp.f32 %v1293_v61 }
 0x3fb   : > { %v1322_v52 = vmul.f32 %v3122_v62, %v1314_v31 }
 0x3fd   : > { %v3124_v20 = vpop.eup %3123  ;;  %v3720_v55 = vmul.f32 %v1322_v52, %v1241_v38 }
 0x3fe   : > { %v3126_v27 = vpop.eup %3125  ;;  %v1304_v24 = vmul.f32 %v3124_v20, %v1288_v59 }
 0x3ff   : > { %v1308_v25 = vmul.f32 %v3126_v27, %v1292_v0  ;;  %v3728_v30 = vsel %vm1334_vm0, %v3720_v55, -inf }
 0x400   : > { %v1312_v32 = vsub.f32 2.0, %v1304_v24  ;;  %1497 = vmax.xlane.f32.xlu2 %v3724_v53  ;;  %1495 = vmax.xlane.f32.xlu1 %v3728_v30  ;;  %v3128_v44 = vpop.eup %3127 }
 0x401   : > { %v1316_v34 = vsub.f32 2.0, %v1308_v25  ;;  %v1309_v38 = vmul.f32 %v3128_v44, %v1293_v61 }
 0x402   : > { %v1320_v8 = vmul.f32 %v3124_v20, %v1312_v32 }
 0x403   : > { %v1324_v23 = vmul.f32 %v3126_v27, %v1316_v34  ;;  %v1317_v48 = vsub.f32 2.0, %v1309_v38 }
 0x404   : > { %v3732_v58 = vmul.f32 %v1320_v8, %v1239_v1 }
 0x405   : > { %v3734_v21 = vmul.f32 %v1324_v23, %v1243_v50  ;;  %v1325_v41 = vmul.f32 %v3128_v44, %v1317_v48 }
 0x406   : > { %v3738_v3 = vsel %vm1334_vm0, %v3732_v58, -inf }
 0x407   : > { %v3742_v6 = vsel %vm1334_vm0, %v3734_v21, -inf  ;;  %1491 = vmax.xlane.f32.xlu0 %v3738_v3  ;;  %v3747_v42 = vmul.f32 %v1325_v41, %v3658_v57 }
 0x408   : > { %1499 = vmax.xlane.f32.xlu1 %v3742_v6 }
 0x409   : > { %v3751_v40 = vsel %vm1334_vm0, %v3747_v42, -inf }
 0x40f   : > { %1501 = vmax.xlane.f32.xlu0 %v3751_v40 }
 0x451   : > { %v1490_v28 = vpop.xlane.xlu1 %1489 }
 0x452   : > { %vm1504_vm1 = vcmp.ge.f32.partialorder %v3671_v43, %v1490_v28 }
 0x453   : > { %v1512_v29 = vsel %vm1504_vm1, %v3754_v26, 128 }
 0x454   : > { %v1534_v1 = vsel %vm1334_vm0, %v1512_v29, 2147483647  ;;  %v1343_v29 = vrot.slane %v3676_v47, 4 }
 0x455   : > { %v1536_v35 = vshra.s32 %v1534_v1, 16  ;;  %v1535_v63 = vand.u32 65535, %v1534_v1 }
 0x456   : > { %v1344_v1 = vmax.f32 %v3676_v47, %v1343_v29 }
 0x457   : > { %v1538_v50 = vcvt.s32.f32 %v1536_v35  ;;  %v1537_v52 = vcvt.s32.f32 %v1535_v63 }
 0x458   : > { %v1345_v35 = vrot.slane %v1344_v1, 2 }
 0x459   : > { %1539 = vmin.xlane.f32.xlu0 %v1538_v50 }
 0x463   : > { %v1488_v57 = vpop.xlane.xlu2 %1487 }
 0x464   : > { %vm1503_vm2 = vcmp.ge.f32.partialorder %v3697_v39, %v1488_v57 }
 0x465   : > { %v1511_v56 = vsel %vm1503_vm2, %v3754_v26, 128 }
 0x466   : > { %v1519_v59 = vsel %vm1334_vm0, %v1511_v56, 2147483647  ;;  %v1336_v56 = vrot.slane %v3701_v36, 4 }
 0x467   : > { %v1521_v60 = vshra.s32 %v1519_v59, 16  ;;  %v1520_v44 = vand.u32 65535, %v1519_v59 }
 0x469   : > { %v1523_v62 = vcvt.s32.f32 %v1521_v60  ;;  %v1522_v23 = vcvt.s32.f32 %v1520_v44  ;;  %v1337_v60 = vmax.f32 %v3701_v36, %v1336_v56 }
 0x46b   : > { %1524 = vmin.xlane.f32.xlu2 %v1523_v62  ;;  %v1494_v7 = vpop.xlane.xlu2 %1493 }
 0x46c   : > { %vm1506_vm3 = vcmp.ge.f32.partialorder %v3707_v49, %v1494_v7 }
 0x46d   : > { %v1514_v31 = vsel %vm1506_vm3, %v3754_v26, 128 }
 0x46e   : > { %v1564_v20 = vsel %vm1334_vm0, %v1514_v31, 2147483647 }
 0x46f   : > { %v1566_v24 = vshra.s32 %v1564_v20, 16  ;;  %v1565_v29 = vand.u32 65535, %v1564_v20 }
 0x471   : > { %v3767_v32 = vcvt.s32.f32 %v1566_v24  ;;  %v1567_v20 = vcvt.s32.f32 %v1565_v29 }
 0x473   : > { %v1498_v25 = vpop.xlane.xlu2 %1497 }
 0x474   : > { %vm1508_vm10 = vcmp.ge.f32.partialorder %v3718_v5, %v1498_v25 }
 0x47a   : > { %v1492_v0 = vpop.xlane.xlu0 %1491 }
 0x47b   : > { %vm1505_vm5 = vcmp.ge.f32.partialorder %v3732_v58, %v1492_v0  ;;  %v1338_v0 = vrot.slane %v1337_v60, 2 }
 0x47c   : > { %v1513_v34 = vsel %vm1505_vm5, %v3754_v26, 128 }
 0x47d   : > { %v3776_v8 = vsel %vm1334_vm0, %v1513_v34, 2147483647  ;;  %v1339_v63 = vmax.f32 %v1337_v60, %v1338_v0  ;;  %v3796_v34 = vpop.xlane.xlu1 %1495 }
 0x47e   : > { %v1551_v41 = vshra.s32 %v3776_v8, 16 }
 0x480   : > { %v3779_v28 = vcvt.s32.f32 %v1551_v41 }
 0x482   : > { %v3762_v2 = vpop.xlane.xlu0 %1501 }
 0x4cc   : > { %v1540_v61 = vpop.xlane.xlu0 %1539 }
 0x4cd   : > { %vm1541_vm4 = vcmp.eq.f32.partialorder %v1538_v50, %v1540_v61  ;;  %v1346_v50 = vmax.f32 %v1344_v1, %v1345_v35  ;;  %v1546_v24 = vcvt.f32.s32 %v1540_v61 }
 0x4ce   : > { %v1542_v27 = vsel %vm1541_vm4, %v1537_v52, inf  ;;  %v1340_v52 = vrot.slane %v1339_v63, 1 }
 0x4cf   : > { %1543 = vmin.xlane.f32.xlu2 %v1542_v27  ;;  %v1347_v57 = vrot.slane %v1346_v50, 1 }
 0x4d0   : > { %v3794_v27 = vmax.f32 %v1339_v63, %v1340_v52 }
 0x4d1   : > { %v3785_v59 = vmax.f32 %v1346_v50, %v1347_v57 }
 0x4d2   : > { %vm1391_vm9 = vcmp.ge.f32.partialorder %v3697_v39, %v3794_v27  ;;  %v1516_v39 = vsel %vm1508_vm10, %v3754_v26, 128 }
 0x4d3   : > { %vm1392_vm7 = vcmp.ge.f32.partialorder %v3671_v43, %v3785_v59  ;;  %v1547_v43 = vshll.u32 %v1546_v24, 16 }
 0x4d7   : > { %1569 = vmin.xlane.f32.xlu2 %v3767_v32 }
 0x4de   : > { %v3772_v38 = vpop.xlane.xlu2 %1524 }
 0x4df   : > { %vm1526_vm6 = vcmp.eq.f32.partialorder %v1523_v62, %v3772_v38  ;;  %v3788_v62 = vshrl.u32 %v1029_v46, 7 }
 0x4e0   : > { %v1527_v48 = vsel %vm1526_vm6, %v1522_v23, inf }
 0x4e1   : > { %1528 = vmin.xlane.f32.xlu1 %v1527_v48  ;;  %v1400_v7 = vsel %vm1392_vm7, %v3788_v62, 3  ;;  %v1399_v48 = vsel %vm1391_vm9, %v3788_v62, 3 }
 0x4e2   : > { %v1417_v47 = vsel %vm1334_vm0, %v1400_v7, 2147483647  ;;  %v1407_v61 = vsel %vm1334_vm0, %v1399_v48, 2147483647  ;;  %v3811_v7 = vpop.xlane.xlu1 %1499 }
 0x4e3   : > { %v1418_v31 = vrot.slane %v1417_v47, 4  ;;  %v1408_v25 = vrot.slane %v1407_v61, 4 }
 0x4e5   : > { %vm1419_vm8 = vcmp.lt.s32.totalorder %v1417_v47, %v1418_v31  ;;  %vm1409_vm1 = vcmp.lt.s32.totalorder %v1407_v61, %v1408_v25 }
 0x4e6   : > { %v1420_v44 = vsel %vm1419_vm8, %v1417_v47, %v1418_v31  ;;  %v3816_v47 = vsel %vm1334_vm0, %v1516_v39, 2147483647  ;;  %vm1507_vm8 = vcmp.ge.f32.partialorder %v3720_v55, %v3796_v34 }
 0x4e7   : > { %v1421_v23 = vrot.slane %v1420_v44, 2 }
 0x4e9   : > { %1554 = vmin.xlane.f32.xlu1 %v3779_v28  ;;  %vm1422_vm12 = vcmp.lt.s32.totalorder %v1420_v44, %v1421_v23 }
 0x4ea   : > { %v1423_v63 = vsel %vm1422_vm12, %v1420_v44, %v1421_v23  ;;  %v1410_v23 = vsel %vm1409_vm1, %v1407_v61, %v1408_v25  ;;  %v1550_v61 = vand.u32 65535, %v3776_v8 }
 0x4eb   : > { %v1424_v48 = vrot.slane %v1423_v63, 1 }
 0x4ed   : > { %vm1425_vm4 = vcmp.lt.s32.totalorder %v1423_v63, %v1424_v48 }
 0x542   : > { %v1544_v36 = vpop.xlane.xlu2 %1543 }
 0x543   : > { %v1545_v46 = vcvt.f32.s32 %v1544_v36 }
 0x545   : > { %v1548_v41 = vadd.s32 %v1547_v43, %v1545_v46  ;;  %v1596_v46 = vshra.s32 %v3816_v47, 16 }
 0x547   : > { %vm1640_vm11 = vcmp.eq.s32.totalorder %v3754_v26, %v1548_v41  ;;  %v1531_v41 = vcvt.f32.s32 %v3772_v38  ;;  %v3820_v39 = vcvt.s32.f32 %v1596_v46 }
 0x548   : > { %v1648_v1 = vsel %vm1640_vm11, 1, %v4697_v9  ;;  %v1744_v35 = vsel %vm1640_vm11, %v3788_v62, 4294967295 }
 0x549   : > { %v1665_v50 = vsel %vm1334_vm0, %v1648_v1, 2147483648  ;;  %v1761_v57 = vsel %vm1334_vm0, %v1744_v35, 2147483648 }
 0x54a   : > { %v1666_v56 = vrot.slane %v1665_v50, 4  ;;  %v1762_v60 = vrot.slane %v1761_v57, 4  ;;  %v3809_v0 = vpop.xlane.xlu2 %1569 }
 0x54b   : > { %vm1571_vm13 = vcmp.eq.f32.partialorder %v3767_v32, %v3809_v0 }
 0x54c   : > { %vm1667_vm14 = vcmp.gt.s32.totalorder %v1665_v50, %v1666_v56  ;;  %vm1763_vm15 = vcmp.gt.s32.totalorder %v1761_v57, %v1762_v60  ;;  %v1572_v31 = vsel %vm1571_vm13, %v1567_v20, inf }
 0x54d   : > { %v1668_v52 = vsel %vm1667_vm14, %v1665_v50, %v1666_v56  ;;  %v1764_v24 = vsel %vm1763_vm15, %v1761_v57, %v1762_v60  ;;  %1573 = vmin.xlane.f32.xlu1 %v1572_v31  ;;  %v1532_v50 = vshll.u32 %v1531_v41, 16  ;;  %v1411_v56 = vrot.slane %v1410_v23, 2 }
 0x54e   : > { %v1669_v36 = vrot.slane %v1668_v52, 2  ;;  %v1765_v43 = vrot.slane %v1764_v24, 2  ;;  %v1426_v31 = vsel %vm1425_vm4, %v1423_v63, %v1424_v48  ;;  %v1515_v63 = vsel %vm1507_vm8, %v3754_v26, 128 }
 0x54f   : > { %vm1412_vm10 = vcmp.lt.s32.totalorder %v1410_v23, %v1411_v56  ;;  %v1552_v41 = vcvt.s32.f32 %v1550_v61  ;;  %vm1510_vm8 = vcmp.ge.f32.partialorder %v3747_v42, %v3762_v2 }
 0x550   : > { %vm1670_vm2 = vcmp.gt.s32.totalorder %v1668_v52, %v1669_v36  ;;  %vm1766_vm3 = vcmp.gt.s32.totalorder %v1764_v24, %v1765_v43 }
 0x551   : > { %v1671_v32 = vsel %vm1670_vm2, %v1668_v52, %v1669_v36  ;;  %v1767_v44 = vsel %vm1766_vm3, %v1764_v24, %v1765_v43 }
 0x552   : > { %v1672_v29 = vrot.slane %v1671_v32, 1  ;;  %v1768_v1 = vrot.slane %v1767_v44, 1 }
 0x554   : > { %v1529_v35 = vpop.xlane.xlu1 %1528  ;;  %vm1673_vm5 = vcmp.gt.s32.totalorder %v1671_v32, %v1672_v29  ;;  %vm1769_vm6 = vcmp.gt.s32.totalorder %v1767_v44, %v1768_v1 }
 0x555   : > { %v1530_v57 = vcvt.f32.s32 %v1529_v35  ;;  %1599 = vmin.xlane.f32.xlu1 %v3820_v39  ;;  %v1674_v60 = vsel %vm1673_vm5, %v1671_v32, %v1672_v29  ;;  %v1770_v38 = vsel %vm1769_vm6, %v1767_v44, %v1768_v1  ;;  %v3842_v32 = vsel %vm1334_vm0, %v1515_v63, 2147483647 }
 0x556   : > { %vm1736_vm7 = vcmp.gt.s32.totalorder %v1674_v60, 0 }
 0x557   : > { %v1533_v20 = vadd.s32 %v1532_v50, %v1530_v57  ;;  %v3826_v25 = vsel %vm1736_vm7, %v1770_v38, %v1426_v31  ;;  %v3829_v52 = vsel %vm1736_vm7, 1.0, %v3785_v59  ;;  %v1413_v59 = vsel %vm1412_vm10, %v1410_v23, %v1411_v56 }
 0x558   : > { %4730 = vst [vmem:[#allocation16_spill] sm:$0xff] %v3829_v52  ;;  %v1581_v57 = vshra.s32 %v3842_v32, 16  ;;  %v1414_v60 = vrot.slane %v1413_v59, 1 }
 0x559   : > { %vm1639_vm9 = vcmp.eq.s32.totalorder %v3754_v26, %v1533_v20 }
 0x55a   : > { %v1647_v24 = vsel %vm1639_vm9, 1, %v4697_v9  ;;  %v1743_v36 = vsel %vm1639_vm9, %v3788_v62, 4294967295  ;;  %v3845_v56 = vcvt.s32.f32 %v1581_v57  ;;  %vm1415_vm1 = vcmp.lt.s32.totalorder %v1413_v59, %v1414_v60 }
 0x55b   : > { %v1655_v43 = vsel %vm1334_vm0, %v1647_v24, 2147483648  ;;  %v1751_v34 = vsel %vm1334_vm0, %v1743_v36, 2147483648  ;;  %v1416_v24 = vsel %vm1415_vm1, %v1413_v59, %v1414_v60 }
 0x55c   : > { %v1656_v46 = vrot.slane %v1655_v43, 4  ;;  %v1752_v8 = vrot.slane %v1751_v34, 4  ;;  %v3837_v48 = vpop.xlane.xlu1 %1554 }
 0x55d   : > { %vm1556_vm11 = vcmp.eq.f32.partialorder %v3779_v28, %v3837_v48 }
 0x55e   : > { %vm1657_vm12 = vcmp.gt.s32.totalorder %v1655_v43, %v1656_v46  ;;  %vm1753_vm13 = vcmp.gt.s32.totalorder %v1751_v34, %v1752_v8  ;;  %v1557_v44 = vsel %vm1556_vm11, %v1552_v41, inf }
 0x55f   : > { %v1658_v29 = vsel %vm1657_vm12, %v1655_v43, %v1656_v46  ;;  %v1754_v1 = vsel %vm1753_vm13, %v1751_v34, %v1752_v8  ;;  %1558 = vmin.xlane.f32.xlu0 %v1557_v44  ;;  %v1357_v43 = vrot.slane %v3713_v45, 4  ;;  %v1350_v44 = vrot.slane %v3738_v3, 4 }
 0x560   : > { %v1659_v35 = vrot.slane %v1658_v29, 2  ;;  %v1755_v50 = vrot.slane %v1754_v1, 2 }
 0x561   : > { %v1358_v34 = vmax.f32 %v3713_v45, %v1357_v43  ;;  %v3183_v43 = vmov 5  }
 0x562   : > { %vm1660_vm14 = vcmp.gt.s32.totalorder %v1658_v29, %v1659_v35  ;;  %vm1756_vm15 = vcmp.gt.s32.totalorder %v1754_v1, %v1755_v50  ;;  %3099 = vset.pattern.permute.xlu0 %v3183_v43  ;;  %3100 = vset.pattern.permute.xlu2 %v3183_v43 }
 0x563   : > { %v1661_v38 = vsel %vm1660_vm14, %v1658_v29, %v1659_v35  ;;  %v1757_v20 = vsel %vm1756_vm15, %v1754_v1, %v1755_v50  ;;  %v1359_v46 = vrot.slane %v1358_v34, 2  ;;  %v1351_v1 = vmax.f32 %v3738_v3, %v1350_v44  ;;  %3098 = vset.pattern.permute.xlu1 %v3183_v43 }
 0x564   : > { %v1662_v28 = vrot.slane %v1661_v38, 1  ;;  %v1758_v23 = vrot.slane %v1757_v20, 1 }
 0x565   : > { %v1360_v8 = vmax.f32 %v1358_v34, %v1359_v46  ;;  %v1352_v59 = vrot.slane %v1351_v1, 2  ;;  %v1518_v46 = vsel %vm1510_vm8, %v3754_v26, 128 }
 0x566   : > { %vm1663_vm2 = vcmp.gt.s32.totalorder %v1661_v38, %v1662_v28  ;;  %vm1759_vm3 = vcmp.gt.s32.totalorder %v1757_v20, %v1758_v23 }
 0x567   : > { %1584 = vmin.xlane.f32.xlu0 %v3845_v56  ;;  %v1664_v31 = vsel %vm1663_vm2, %v1661_v38, %v1662_v28  ;;  %v1760_v61 = vsel %vm1759_vm3, %v1757_v20, %v1758_v23  ;;  %v1361_v41 = vrot.slane %v1360_v8, 1  ;;  %v1353_v35 = vmax.f32 %v1351_v1, %v1352_v59 }
 0x568   : > { %vm1735_vm4 = vcmp.gt.s32.totalorder %v1664_v31, 0  ;;  %v1576_v38 = vcvt.f32.s32 %v3809_v0 }
 0x569   : > { %v3848_v36 = vsel %vm1735_vm4, %v1760_v61, %v1416_v24  ;;  %v3851_v63 = vsel %vm1735_vm4, 1.0, %v3794_v27  ;;  %v3856_v29 = vmax.f32 %v1360_v8, %v1361_v41  ;;  %v1354_v45 = vrot.slane %v1353_v35, 1 }
 0x56a   : > { %v1577_v28 = vshll.u32 %v1576_v38, 16  ;;  %v1595_v24 = vand.u32 65535, %v3816_v47 }
 0x56b   : > { %vm1394_vm5 = vcmp.ge.f32.partialorder %v3707_v49, %v3856_v29  ;;  %v3863_v60 = vmax.f32 %v1353_v35, %v1354_v45  ;;  %v3884_v35 = vsel %vm1334_vm0, %v1518_v46, 2147483647 }
 0x56c   : > { %v1402_v27 = vsel %vm1394_vm5, %v3788_v62, 3  ;;  %v1597_v1 = vcvt.s32.f32 %v1595_v24 }
 0x56d   : > { %v1437_v50 = vsel %vm1334_vm0, %v1402_v27, 2147483647  ;;  %vm1393_vm7 = vcmp.ge.f32.partialorder %v3732_v58, %v3863_v60 }
 0x56e   : > { %v1438_v57 = vrot.slane %v1437_v50, 4  ;;  %v1401_v31 = vsel %vm1393_vm7, %v3788_v62, 3 }
 0x56f   : > { %v1427_v0 = vsel %vm1334_vm0, %v1401_v31, 2147483647  ;;  %v1561_v31 = vcvt.f32.s32 %v3837_v48 }
 0x570   : > { %vm1439_vm6 = vcmp.lt.s32.totalorder %v1437_v50, %v1438_v57  ;;  %v1428_v59 = vrot.slane %v1427_v0, 4 }
 0x571   : > { %v1440_v20 = vsel %vm1439_vm6, %v1437_v50, %v1438_v57  ;;  %vm1509_vm6 = vcmp.ge.f32.partialorder %v3734_v21, %v3811_v7 }
 0x572   : > { %v1441_v23 = vrot.slane %v1440_v20, 2  ;;  %vm1429_vm14 = vcmp.lt.s32.totalorder %v1427_v0, %v1428_v59 }
 0x574   : > { %vm1442_vm10 = vcmp.lt.s32.totalorder %v1440_v20, %v1441_v23 }
 0x575   : > { %v1443_v27 = vsel %vm1442_vm10, %v1440_v20, %v1441_v23  ;;  %v1430_v23 = vsel %vm1429_vm14, %v1427_v0, %v1428_v59  ;;  %v1580_v0 = vand.u32 65535, %v3842_v32 }
 0x5c0   : > { %v1574_v3 = vpop.xlane.xlu1 %1573 }
 0x5c1   : > { %v1575_v49 = vcvt.f32.s32 %v1574_v3 }
 0x5c3   : > { %v1578_v61 = vadd.s32 %v1577_v28, %v1575_v49  ;;  %v1626_v28 = vshra.s32 %v3884_v35, 16  ;;  %v1444_v49 = vrot.slane %v1443_v27, 1 }
 0x5c5   : > { %vm1642_vm9 = vcmp.eq.s32.totalorder %v3754_v26, %v1578_v61  ;;  %vm1445_vm2 = vcmp.lt.s32.totalorder %v1443_v27, %v1444_v49 }
 0x5c6   : > { %v1650_v58 = vsel %vm1642_vm9, 1, %v4697_v9  ;;  %v1746_v34 = vsel %vm1642_vm9, %v3788_v62, 4294967295 }
 0x5c7   : > { %v1685_v8 = vsel %vm1334_vm0, %v1650_v58, 2147483648  ;;  %v1781_v2 = vsel %vm1334_vm0, %v1746_v34, 2147483648  ;;  %v3888_v58 = vcvt.s32.f32 %v1626_v28  ;;  %v1562_v34 = vshll.u32 %v1561_v31, 16 }
 0x5c8   : > { %v1686_v47 = vrot.slane %v1685_v8, 4  ;;  %v1782_v41 = vrot.slane %v1781_v2, 4  ;;  %v3879_v44 = vpop.xlane.xlu1 %1599  ;;  %v1582_v28 = vcvt.s32.f32 %v1580_v0 }
 0x5c9   : > { %vm1601_vm11 = vcmp.eq.f32.partialorder %v3820_v39, %v3879_v44 }
 0x5ca   : > { %vm1687_vm12 = vcmp.gt.s32.totalorder %v1685_v8, %v1686_v47  ;;  %vm1783_vm13 = vcmp.gt.s32.totalorder %v1781_v2, %v1782_v41  ;;  %v1602_v50 = vsel %vm1601_vm11, %v1597_v1, inf }
 0x5cb   : > { %v1688_v57 = vsel %vm1687_vm12, %v1685_v8, %v1686_v47  ;;  %v1784_v45 = vsel %vm1783_vm13, %v1781_v2, %v1782_v41  ;;  %1603 = vmin.xlane.f32.xlu0 %v1602_v50  ;;  %v1431_v8 = vrot.slane %v1430_v23, 2  ;;  %v1446_v41 = vsel %vm1445_vm2, %v1443_v27, %v1444_v49 }
 0x5cc   : > { %v1689_v38 = vrot.slane %v1688_v57, 2  ;;  %v1785_v3 = vrot.slane %v1784_v45, 2  ;;  %v1517_v27 = vsel %vm1509_vm6, %v3754_v26, 128 }
 0x5cd   : > { %vm1432_vm8 = vcmp.lt.s32.totalorder %v1430_v23, %v1431_v8  ;;  %v3910_v49 = vsel %vm1334_vm0, %v1517_v27, 2147483647  ;;  %v4701_v27 = vmov 6  }
 0x5ce   : > { %vm1690_vm15 = vcmp.gt.s32.totalorder %v1688_v57, %v1689_v38  ;;  %vm1786_vm1 = vcmp.gt.s32.totalorder %v1784_v45, %v1785_v3 }
 0x5cf   : > { %v1691_v39 = vsel %vm1690_vm15, %v1688_v57, %v1689_v38  ;;  %v1787_v20 = vsel %vm1786_vm1, %v1784_v45, %v1785_v3 }
 0x5d0   : > { %v1692_v61 = vrot.slane %v1691_v39, 1  ;;  %v1788_v24 = vrot.slane %v1787_v20, 1 }
 0x5d2   : > { %v1559_v43 = vpop.xlane.xlu0 %1558  ;;  %vm1693_vm3 = vcmp.gt.s32.totalorder %v1691_v39, %v1692_v61  ;;  %vm1789_vm4 = vcmp.gt.s32.totalorder %v1787_v20, %v1788_v24 }
 0x5d3   : > { %v1560_v46 = vcvt.f32.s32 %v1559_v43  ;;  %1629 = vmin.xlane.f32.xlu0 %v3888_v58  ;;  %v1694_v2 = vsel %vm1693_vm3, %v1691_v39, %v1692_v61  ;;  %v1790_v48 = vsel %vm1789_vm4, %v1787_v20, %v1788_v24  ;;  %v1611_v43 = vshra.s32 %v3910_v49, 16 }
 0x5d4   : > { %vm1738_vm5 = vcmp.gt.s32.totalorder %v1694_v2, 0 }
 0x5d5   : > { %v1563_v47 = vadd.s32 %v1562_v34, %v1560_v46  ;;  %v3894_v1 = vsel %vm1738_vm5, %v1790_v48, %v1446_v41  ;;  %v3897_v59 = vsel %vm1738_vm5, 1.0, %v3856_v29  ;;  %v1433_v29 = vsel %vm1432_vm8, %v1430_v23, %v1431_v8 }
 0x5d6   : > { %4731 = vst [vmem:[#allocation17_spill] sm:$0xff] %v3897_v59  ;;  %v1434_v34 = vrot.slane %v1433_v29, 1  ;;  %v3913_v2 = vcvt.s32.f32 %v1611_v43 }
 0x5d7   : > { %vm1641_vm7 = vcmp.eq.s32.totalorder %v3754_v26, %v1563_v47 }
 0x5d8   : > { %v1649_v50 = vsel %vm1641_vm7, 1, %v4697_v9  ;;  %v1745_v57 = vsel %vm1641_vm7, %v3788_v62, 4294967295  ;;  %vm1435_vm14 = vcmp.lt.s32.totalorder %v1433_v29, %v1434_v34 }
 0x5d9   : > { %v1675_v45 = vsel %vm1334_vm0, %v1649_v50, 2147483648  ;;  %v1771_v7 = vsel %vm1334_vm0, %v1745_v57, 2147483648  ;;  %v1436_v41 = vsel %vm1435_vm14, %v1433_v29, %v1434_v34  ;;  %v3922_v57 = vld [vmem:[%s3495_s28 + $0x4] sm:$0x7] }
 0x5da   : > { %v1676_v38 = vrot.slane %v1675_v45, 4  ;;  %v1772_v32 = vrot.slane %v1771_v7, 4  ;;  %v3905_v3 = vpop.xlane.xlu0 %1584 }
 0x5db   : > { %vm1586_vm9 = vcmp.eq.f32.partialorder %v3845_v56, %v3905_v3 }
 0x5dc   : > { %vm1677_vm10 = vcmp.gt.s32.totalorder %v1675_v45, %v1676_v38  ;;  %vm1773_vm11 = vcmp.gt.s32.totalorder %v1771_v7, %v1772_v32  ;;  %v1587_v31 = vsel %vm1586_vm9, %v1582_v28, inf }
 0x5dd   : > { %v1678_v39 = vsel %vm1677_vm10, %v1675_v45, %v1676_v38  ;;  %v1774_v20 = vsel %vm1773_vm11, %v1771_v7, %v1772_v32  ;;  %1588 = vmin.xlane.f32.xlu2 %v1587_v31  ;;  %v3927_v45 = vld [vmem:[%s3495_s28] sm:$0x7]  ;;  %v3931_v7 = vld [vmem:[%s3495_s28 + $0x14] sm:$0x7]  ;;  %v4695_v38 = vmov 7   ;;  %v1371_v32 = vrot.slane %v3724_v53, 4 }
 0x5de   : > { %v1679_v61 = vrot.slane %v1678_v39, 2  ;;  %v1775_v24 = vrot.slane %v1774_v20, 2 }
 0x5df   : > { %v1372_v28 = vmax.f32 %v3724_v53, %v1371_v32 }
 0x5e0   : > { %vm1680_vm12 = vcmp.gt.s32.totalorder %v1678_v39, %v1679_v61  ;;  %vm1776_vm13 = vcmp.gt.s32.totalorder %v1774_v20, %v1775_v24 }
 0x5e1   : > { %v1681_v46 = vsel %vm1680_vm12, %v1678_v39, %v1679_v61  ;;  %v1777_v56 = vsel %vm1776_vm13, %v1774_v20, %v1775_v24  ;;  %v1373_v29 = vrot.slane %v1372_v28, 2  ;;  %v4691_v39 = vmov 9  }
 0x5e2   : > { %v1682_v23 = vrot.slane %v1681_v46, 1  ;;  %v1778_v8 = vrot.slane %v1777_v56, 1  ;;  %v1364_v61 = vrot.slane %v3728_v30, 4 }
 0x5e3   : > { %v1374_v31 = vmax.f32 %v1372_v28, %v1373_v29 }
 0x5e4   : > { %vm1683_vm15 = vcmp.gt.s32.totalorder %v1681_v46, %v1682_v23  ;;  %vm1779_vm1 = vcmp.gt.s32.totalorder %v1777_v56, %v1778_v8  ;;  %v1365_v43 = vmax.f32 %v3728_v30, %v1364_v61 }
 0x5e5   : > { %1614 = vmin.xlane.f32.xlu2 %v3913_v2  ;;  %v1684_v48 = vsel %vm1683_vm15, %v1681_v46, %v1682_v23  ;;  %v1780_v47 = vsel %vm1779_vm1, %v1777_v56, %v1778_v8  ;;  %v1375_v20 = vrot.slane %v1374_v31, 1 }
 0x5e6   : > { %vm1737_vm2 = vcmp.gt.s32.totalorder %v1684_v48, 0  ;;  %v1366_v53 = vrot.slane %v1365_v43, 2 }
 0x5e7   : > { %v3916_v0 = vsel %vm1737_vm2, %v1780_v47, %v1436_v41  ;;  %v3919_v50 = vsel %vm1737_vm2, 1.0, %v3863_v60  ;;  %1876 = vperm.xlu0 %3099, %v3922_v57   ;;  %v4693_v60 = vmov 8   ;;  %v3945_v24 = vmax.f32 %v1374_v31, %v1375_v20 }
 0x5e8   : > { %4732 = vst [vmem:[#allocation18_spill] sm:$0xff] %v3919_v50  ;;  %v1367_v46 = vmax.f32 %v1365_v43, %v1366_v53  ;;  %v1606_v47 = vcvt.f32.s32 %v3879_v44  ;;  %v1625_v20 = vand.u32 65535, %v3884_v35 }
 0x5e9   : > { %vm1396_vm3 = vcmp.ge.f32.partialorder %v3718_v5, %v3945_v24 }
 0x5ea   : > { %v1404_v34 = vsel %vm1396_vm3, %v3788_v62, 3  ;;  %v1368_v23 = vrot.slane %v1367_v46, 1  ;;  %v1607_v32 = vshll.u32 %v1606_v47, 16 }
 0x5eb   : > { %v1457_v56 = vsel %vm1334_vm0, %v1404_v34, 2147483647 }
 0x5ec   : > { %v1458_v8 = vrot.slane %v1457_v56, 4  ;;  %v3953_v48 = vmax.f32 %v1367_v46, %v1368_v23  ;;  %v1627_v23 = vcvt.s32.f32 %v1625_v20 }
 0x5ee   : > { %vm1459_vm4 = vcmp.lt.s32.totalorder %v1457_v56, %v1458_v8  ;;  %vm1395_vm5 = vcmp.ge.f32.partialorder %v3720_v55, %v3953_v48 }
 0x5ef   : > { %3101 = vset.pattern.permute.xlu0 %v4701_v27  ;;  %v1460_v41 = vsel %vm1459_vm4, %v1457_v56, %v1458_v8  ;;  %v1403_v29 = vsel %vm1395_vm5, %v3788_v62, 3  ;;  %vm1848_vm5 = vcmp.eq.s32.totalorder %v3826_v25, %v3788_v62 }
 0x5f0   : > { %1968 = vperm.xlu0 %3101, %v3927_v45   ;;  %v1461_v28 = vrot.slane %v1460_v41, 2  ;;  %v1447_v61 = vsel %vm1334_vm0, %v1403_v29, 2147483647 }
 0x5f1   : > { %v1448_v8 = vrot.slane %v1447_v61, 4 }
 0x5f2   : > { %vm1462_vm7 = vcmp.lt.s32.totalorder %v1460_v41, %v1461_v28 }
 0x5f3   : > { %v1463_v47 = vsel %vm1462_vm7, %v1460_v41, %v1461_v28  ;;  %vm1449_vm11 = vcmp.lt.s32.totalorder %v1447_v61, %v1448_v8 }
 0x5f8   : > { %1988 = vperm.xlu0 %3101, %v3931_v7  }
 0x600   : > { %3104 = vset.pattern.permute.xlu0 %v4695_v38 }
 0x601   : > { %2064 = vperm.xlu0 %3104, %v3927_v45  }
 0x609   : > { %2084 = vperm.xlu0 %3104, %v3931_v7  }
 0x611   : > { %3107 = vset.pattern.permute.xlu0 %v4693_v60 }
 0x612   : > { %2160 = vperm.xlu0 %3107, %v3927_v45  }
 0x61a   : > { %2180 = vperm.xlu0 %3107, %v3931_v7  }
 0x622   : > { %3110 = vset.pattern.permute.xlu0 %v4691_v39  ;;  %v1450_v39 = vsel %vm1449_vm11, %v1447_v61, %v1448_v8 }
 0x623   : > { %2256 = vperm.xlu0 %3110, %v3927_v45   ;;  %v1451_v28 = vrot.slane %v1450_v39, 2 }
 0x625   : > { %vm1452_vm4 = vcmp.lt.s32.totalorder %v1450_v39, %v1451_v28 }
 0x62b   : > { %2276 = vperm.xlu0 %3110, %v3931_v7  }
 0x63e   : > { %v1604_v30 = vpop.xlane.xlu0 %1603 }
 0x63f   : > { %v1605_v5 = vcvt.f32.s32 %v1604_v30 }
 0x641   : > { %v1608_v31 = vadd.s32 %v1607_v32, %v1605_v5 }
 0x643   : > { %vm1644_vm6 = vcmp.eq.s32.totalorder %v3754_v26, %v1608_v31  ;;  %v1464_v31 = vrot.slane %v1463_v47, 1 }
 0x644   : > { %v1652_v43 = vsel %vm1644_vm6, 1, %v4697_v9  ;;  %v1748_v44 = vsel %vm1644_vm6, %v3788_v62, 4294967295 }
 0x645   : > { %v1705_v53 = vsel %vm1334_vm0, %v1652_v43, 2147483648  ;;  %v1801_v55 = vsel %vm1334_vm0, %v1748_v44, 2147483648  ;;  %v1591_v43 = vcvt.f32.s32 %v3905_v3  ;;  %vm1465_vm14 = vcmp.lt.s32.totalorder %v1463_v47, %v1464_v31 }
 0x646   : > { %v1706_v34 = vrot.slane %v1705_v53, 4  ;;  %v1802_v46 = vrot.slane %v1801_v55, 4  ;;  %v3966_v56 = vpop.xlane.xlu0 %1629  ;;  %v1610_v3 = vand.u32 65535, %v3910_v49 }
 0x647   : > { %vm1631_vm8 = vcmp.eq.f32.partialorder %v3888_v58, %v3966_v56 }
 0x648   : > { %vm1707_vm9 = vcmp.gt.s32.totalorder %v1705_v53, %v1706_v34  ;;  %vm1803_vm10 = vcmp.gt.s32.totalorder %v1801_v55, %v1802_v46  ;;  %v1632_v35 = vsel %vm1631_vm8, %v1627_v23, inf  ;;  %v1592_v23 = vshll.u32 %v1591_v43, 16 }
 0x649   : > { %v1708_v30 = vsel %vm1707_vm9, %v1705_v53, %v1706_v34  ;;  %v1804_v32 = vsel %vm1803_vm10, %v1801_v55, %v1802_v46  ;;  %1633 = vmin.xlane.f32.xlu2 %v1632_v35  ;;  %v1466_v46 = vsel %vm1465_vm14, %v1463_v47, %v1464_v31 }
 0x64a   : > { %v1709_v5 = vrot.slane %v1708_v30, 2  ;;  %v1805_v29 = vrot.slane %v1804_v32, 2 }
 0x64c   : > { %vm1710_vm12 = vcmp.gt.s32.totalorder %v1708_v30, %v1709_v5  ;;  %vm1806_vm13 = vcmp.gt.s32.totalorder %v1804_v32, %v1805_v29 }
 0x64d   : > { %v1711_v20 = vsel %vm1710_vm12, %v1708_v30, %v1709_v5  ;;  %v1807_v44 = vsel %vm1806_vm13, %v1804_v32, %v1805_v29  ;;  %v1453_v5 = vsel %vm1452_vm4, %v1450_v39, %v1451_v28  ;;  %v4699_v29 = vmov 0.0  }
 0x64e   : > { %v1712_v60 = vrot.slane %v1711_v20, 1  ;;  %v1808_v58 = vrot.slane %v1807_v44, 1  ;;  %v3989_v31 = vsel %vm1848_vm5, 1.0, %v4699_v29  ;;  %v2660_v29 = vrot.slane %v3567_v19, 4 }
 0x64f   : > { %vm2351_vm4 = vcmp.lt.f32.partialorder %v3851_v63, 0.5 }
 0x650   : > { %v1589_v38 = vpop.xlane.xlu2 %1588  ;;  %vm1713_vm15 = vcmp.gt.s32.totalorder %v1711_v20, %v1712_v60  ;;  %vm1809_vm1 = vcmp.gt.s32.totalorder %v1807_v44, %v1808_v58 }
 0x651   : > { %v1590_v41 = vcvt.f32.s32 %v1589_v38  ;;  %v1714_v53 = vsel %vm1713_vm15, %v1711_v20, %v1712_v60  ;;  %v1810_v55 = vsel %vm1809_vm1, %v1807_v44, %v1808_v58  ;;  %vm1847_vm15 = vcmp.eq.s32.totalorder %v3848_v36, %v3788_v62 }
 0x652   : > { %vm1740_vm2 = vcmp.gt.s32.totalorder %v1714_v53, 0  ;;  %v1454_v53 = vrot.slane %v1453_v5, 1 }
 0x653   : > { %v1593_v34 = vadd.s32 %v1592_v23, %v1590_v41  ;;  %v3972_v35 = vsel %vm1740_vm2, %v1810_v55, %v1466_v46  ;;  %v3975_v61 = vsel %vm1740_vm2, 1.0, %v3945_v24  ;;  %v1612_v24 = vcvt.s32.f32 %v1610_v3 }
 0x654   : > { %vm1455_vm11 = vcmp.lt.s32.totalorder %v1453_v5, %v1454_v53  ;;  %vm1852_vm1 = vcmp.eq.s32.totalorder %v3972_v35, %v3788_v62 }
 0x655   : > { %vm1643_vm3 = vcmp.eq.s32.totalorder %v3754_v26, %v1593_v34  ;;  %v3995_v34 = vld [vmem:[%s3495_s28 + $0x8] sm:$0x7] }
 0x656   : > { %v1651_v8 = vsel %vm1643_vm3, 1, %v4697_v9  ;;  %v1747_v38 = vsel %vm1643_vm3, %v3788_v62, 4294967295 }
 0x657   : > { %v1695_v60 = vsel %vm1334_vm0, %v1651_v8, 2147483648  ;;  %v1791_v30 = vsel %vm1334_vm0, %v1747_v38, 2147483648  ;;  %v1456_v38 = vsel %vm1455_vm11, %v1453_v5, %v1454_v53  ;;  %vm1850_vm11 = vcmp.eq.s32.totalorder %v3894_v1, %v3788_v62 }
 0x658   : > { %v1696_v49 = vrot.slane %v1695_v60, 4  ;;  %v1792_v47 = vrot.slane %v1791_v30, 4  ;;  %v3984_v32 = vpop.xlane.xlu2 %1614 }
 0x659   : > { %vm1616_vm6 = vcmp.eq.f32.partialorder %v3913_v2, %v3984_v32  ;;  %v1877_v43 = vpop.permute.xlu0 %1876 }
 0x65a   : > { %vm1697_vm7 = vcmp.gt.s32.totalorder %v1695_v60, %v1696_v49  ;;  %vm1793_vm8 = vcmp.gt.s32.totalorder %v1791_v30, %v1792_v47  ;;  %v1617_v20 = vsel %vm1616_vm6, %v1612_v24, inf  ;;  %v3992_v58 = vmul.f32 %v3989_v31, %v1877_v43 }
 0x65b   : > { %v1698_v44 = vsel %vm1697_vm7, %v1695_v60, %v1696_v49  ;;  %v1794_v25 = vsel %vm1793_vm8, %v1791_v30, %v1792_v47  ;;  %1618 = vmin.xlane.f32.xlu1 %v1617_v20  ;;  %v2678_v49 = vrot.slane %v3571_v22, 4  ;;  %v4007_v47 = vld [vmem:[%s3495_s28 + $0x10] sm:$0x7]  ;;  %v2648_v24 = vrot.slane %v3553_v14, 4 }
 0x65c   : > { %v1699_v23 = vrot.slane %v1698_v44, 2  ;;  %v1795_v41 = vrot.slane %v1794_v25, 2  ;;  %v2666_v20 = vrot.slane %v3559_v16, 4  ;;  %vm2356_vm7 = vcmp.lt.f32.partialorder %v3975_v61, 0.5 }
 0x65d   : > { %v2679_v5 = vmax.f32 %v3571_v22, %v2678_v49  ;;  %v4027_v49 = vld [vmem:[%s3495_s28 + $0xc] sm:$0x7] }
 0x65e   : > { %vm1700_vm9 = vcmp.gt.s32.totalorder %v1698_v44, %v1699_v23  ;;  %vm1796_vm10 = vcmp.gt.s32.totalorder %v1794_v25, %v1795_v41 }
 0x65f   : > { %v1701_v2 = vsel %vm1700_vm9, %v1698_v44, %v1699_v23  ;;  %v1797_v39 = vsel %vm1796_vm10, %v1794_v25, %v1795_v41  ;;  %v2649_v44 = vmax.f32 %v3553_v14, %v2648_v24  ;;  %v2667_v25 = vmax.f32 %v3559_v16, %v2666_v20  ;;  %v4018_v23 = vld [vmem:[%s3495_s28 + $0x18] sm:$0x7] }
 0x660   : > { %v1702_v28 = vrot.slane %v1701_v2, 1  ;;  %v1798_v55 = vrot.slane %v1797_v39, 1 }
 0x661   : > { %1880 = vperm.xlu2 %3100, %v3995_v34   ;;  %v2650_v41 = vrot.slane %v2649_v44, 2  ;;  %v2668_v53 = vrot.slane %v2667_v25, 2 }
 0x662   : > { %vm1703_vm12 = vcmp.gt.s32.totalorder %v1701_v2, %v1702_v28  ;;  %vm1799_vm13 = vcmp.gt.s32.totalorder %v1797_v39, %v1798_v55  ;;  %v3998_v46 = vpop.permute.xlu0 %1968 }
 0x663   : > { %v1704_v3 = vsel %vm1703_vm12, %v1701_v2, %v1702_v28  ;;  %v1800_v8 = vsel %vm1799_vm13, %v1797_v39, %v1798_v55  ;;  %v2651_v28 = vmax.f32 %v2649_v44, %v2650_v41  ;;  %v2669_v55 = vmax.f32 %v2667_v25, %v2668_v53 }
 0x664   : > { %vm1739_vm14 = vcmp.gt.s32.totalorder %v1704_v3, 0  ;;  %v2684_v25 = vrot.slane %v3565_v18, 4  ;;  %v2654_v41 = vrot.slane %v3661_v4, 4  ;;  %vm1849_vm13 = vcmp.eq.s32.totalorder %v3916_v0, %v3788_v62  ;;  %v3169_v0 = vld [vmem:[%s4687_s1] sm:$0xff] }
 0x665   : > { %v4000_v60 = vsel %vm1739_vm14, %v1800_v8, %v1456_v38  ;;  %v4003_v30 = vsel %vm1739_vm14, 1.0, %v3953_v48  ;;  %v2680_v48 = vrot.slane %v2679_v5, 2  ;;  %v2652_v8 = vrot.slane %v2651_v28, 1 }
 0x666   : > { %4733 = vst [vmem:[#allocation19_spill] sm:$0xff] %v4003_v30  ;;  %v2670_v38 = vrot.slane %v2669_v55, 1  ;;  %v2655_v9 = vmax.f32 %v3661_v4, %v2654_v41 }
 0x667   : > { %v2681_v39 = vmax.f32 %v2679_v5, %v2680_v48 }
 0x668   : > { %v4036_v5 = vmax.f32 %v2669_v55, %v2670_v38 }
 0x669   : > { %1888 = vperm.xlu2 %3100, %v4007_v47   ;;  %v2682_v3 = vrot.slane %v2681_v39, 1 }
 0x66a   : > { %v4011_v43 = vpop.permute.xlu0 %1988  ;;  %v2699_v53 = vsub.f32 %v3559_v16, %v4036_v5 }
 0x66b   : > { %v4032_v20 = vmax.f32 %v2681_v39, %v2682_v3  ;;  %v1378_v39 = vrot.slane %v3742_v6, 4  ;;  %v2685_v3 = vmax.f32 %v3565_v18, %v2684_v25 }
 0x66d   : > { %v2701_v44 = vsub.f32 %v3571_v22, %v4032_v20  ;;  %v1379_v30 = vmax.f32 %v3742_v6, %v1378_v39  ;;  %v2686_v17 = vrot.slane %v2685_v3, 2 }
 0x66f   : > { %v2714_v55 = vmul.f32 1.442695, %v2701_v44  ;;  %v2661_v44 = vmax.f32 %v3567_v19, %v2660_v29  ;;  %v1380_v25 = vrot.slane %v1379_v30, 2  ;;  %v2687_v41 = vmax.f32 %v2685_v3, %v2686_v17 }
 0x670   : > { %v4735_v3 = vmov 6  }
 0x671   : > { %1896 = vperm.xlu2 %3100, %v4018_v23   ;;  %3129 = vpow2.f32 %v2714_v55  ;;  %v2662_v39 = vrot.slane %v2661_v44, 2  ;;  %v2688_v10 = vrot.slane %v2687_v41, 1 }
 0x673   : > { %v4022_v2 = vpop.permute.xlu0 %2064  ;;  %v2663_v51 = vmax.f32 %v2661_v44, %v2662_v39 }
 0x674   : > { %1872 = vperm.xlu1 %3098, %v3927_v45   ;;  %v4034_v45 = vmax.f32 %v2651_v28, %v2652_v8  ;;  %v1385_v28 = vrot.slane %v3751_v40, 4 }
 0x675   : > { %v2664_v39 = vrot.slane %v2663_v51, 1 }
 0x676   : > { %v2696_v48 = vsub.f32 %v3553_v14, %v4034_v45  ;;  %v1386_v50 = vmax.f32 %v3751_v40, %v1385_v28  ;;  %v1381_v28 = vmax.f32 %v1379_v30, %v1380_v25  ;;  %v4737_v25 = vmov 0.0  }
 0x677   : > { %v3130_v6 = vpop.eup %3129 }
 0x678   : > { %v2704_v38 = vmul.f32 1.442695, %v2696_v48  ;;  %v1387_v48 = vrot.slane %v1386_v50, 2  ;;  %v2750_v59 = vrot.slane %v3130_v6, 4  ;;  %v1382_v52 = vrot.slane %v1381_v28, 1 }
 0x679   : > { %3102 = vset.pattern.permute.xlu2 %v4701_v27  ;;  %v2710_v27 = vmul.f32 1.442695, %v2699_v53 }
 0x67a   : > { %1972 = vperm.xlu2 %3102, %v3922_v57   ;;  %3131 = vpow2.f32 %v2704_v38  ;;  %v1388_v55 = vmax.f32 %v1386_v50, %v1387_v48  ;;  %v4070_v50 = vmax.f32 %v2687_v41, %v2688_v10  ;;  %v4074_v48 = vsel %vm1847_vm15, 1.0, %v4737_v25 }
 0x67b   : > { %v4030_v24 = vpop.permute.xlu0 %2084  ;;  %3133 = vpow2.f32 %v2710_v27  ;;  %v4734_v27 = vmov 7   ;;  %v4079_v13 = vmax.f32 %v1381_v28, %v1382_v52  ;;  %vm1851_vm15 = vcmp.eq.s32.totalorder %v4000_v60, %v3788_v62 }
 0x67c   : > { %1884 = vperm.xlu1 %3098, %v4027_v49   ;;  %v1389_v17 = vrot.slane %v1388_v55, 1  ;;  %4736 = vst [vmem:[#allocation20_spill] sm:$0xff] %v4070_v50  ;;  %v2702_v10 = vsub.f32 %v3565_v18, %v4070_v50 }
 0x67d   : > { %vm1397_vm2 = vcmp.ge.f32.partialorder %v3734_v21, %v4079_v13 }
 0x680   : > { %v3132_v38 = vpop.eup %3131 }
 0x681   : > { %v3134_v16 = vpop.eup %3133 }
 0x682   : > { %1980 = vperm.xlu2 %3102, %v4027_v49   ;;  %v2738_v30 = vrot.slane %v3134_v16, 4 }
 0x684   : > { %1892 = vperm.xlu1 %3098, %v3931_v7   ;;  %v4051_v8 = vpop.permute.xlu0 %2160  ;;  %v2656_v7 = vrot.slane %v2655_v9, 2  ;;  %v2739_v11 = vadd.f32 %v3134_v16, %v2738_v30  ;;  %v1405_v30 = vsel %vm1397_vm2, %v3788_v62, 3 }
 0x686   : > { %v2657_v40 = vmax.f32 %v2655_v9, %v2656_v7  ;;  %v2720_v9 = vrot.slane %v3132_v38, 4  ;;  %v2751_v7 = vadd.f32 %v3130_v6, %v2750_v59  ;;  %v2740_v28 = vrot.slane %v2739_v11, 2 }
 0x688   : > { %v2658_v29 = vrot.slane %v2657_v40, 1  ;;  %v2721_v12 = vadd.f32 %v3132_v38, %v2720_v9  ;;  %v2752_v41 = vrot.slane %v2751_v7, 2 }
 0x68a   : > { %1992 = vperm.xlu2 %3102, %v4018_v23   ;;  %v4076_v37 = vmax.f32 %v2657_v40, %v2658_v29  ;;  %v4090_v29 = vmax.f32 %v2663_v51, %v2664_v39  ;;  %v2722_v52 = vrot.slane %v2721_v12, 2  ;;  %v2753_v38 = vadd.f32 %v2752_v41, %v2751_v7 }
 0x68b   : > { %v4100_v51 = vsel %vm1852_vm1, 1.0, %v4737_v25  ;;  %v2741_v7 = vadd.f32 %v2740_v28, %v2739_v11  ;;  %v1467_v41 = vsel %vm1334_vm0, %v1405_v30, 2147483647 }
 0x68c   : > { %1900 = vperm.xlu1 %3098, %v4060_v15   ;;  %v4063_v53 = vpop.permute.xlu0 %2180  ;;  %4738 = vst [vmem:[#allocation21_spill] sm:$0xff] %v4076_v37  ;;  %v2697_v40 = vsub.f32 %v3661_v4, %v4076_v37  ;;  %v2754_v18 = vrot.slane %v2753_v38, 1  ;;  %v1468_v11 = vrot.slane %v1467_v41, 4 }
 0x68d   : > { %4739 = vst [vmem:[#allocation22_spill] sm:$0xff] %v4090_v29 }
 0x68e   : > { %v2706_v21 = vmul.f32 1.442695, %v2697_v40  ;;  %vm1469_vm5 = vcmp.lt.s32.totalorder %v1467_v41, %v1468_v11 }
 0x692   : > { %3105 = vset.pattern.permute.xlu2 %v4734_v27 }
 0x693   : > { %2068 = vperm.xlu2 %3105, %v3922_v57  }
 0x694   : > { %3103 = vset.pattern.permute.xlu1 %v4735_v3  ;;  %v4081_v3 = vmax.f32 %v1388_v55, %v1389_v17  ;;  %v2716_v55 = vmul.f32 1.442695, %v2702_v10  ;;  %v2672_v17 = vrot.slane %v3666_v33, 4  ;;  %v2723_v10 = vadd.f32 %v2722_v52, %v2721_v12 }
 0x695   : > { %1976 = vperm.xlu1 %3103, %v3995_v34   ;;  %v2257_v36 = vpop.permute.xlu0 %2256  ;;  %v2742_v52 = vrot.slane %v2741_v7, 1 }
 0x696   : > { %v2287_v44 = vmul.f32 %v4074_v48, %v2257_v36  ;;  %vm1398_vm3 = vcmp.ge.f32.partialorder %v3747_v42, %v4081_v3  ;;  %3135 = vpow2.f32 %v2716_v55  ;;  %v2673_v37 = vmax.f32 %v3666_v33, %v2672_v17 }
 0x697   : > { %v1406_v42 = vsel %vm1398_vm3, %v3788_v62, 3  ;;  %3137 = vpow2.f32 %v2706_v21  ;;  %v2724_v12 = vrot.slane %v2723_v10, 1  ;;  %v2755_v21 = vadd.f32 %v2754_v18, %v2753_v38 }
 0x698   : > { %v2295_v59 = vsel %vm1334_vm0, %v2287_v44, 0.0  ;;  %v2698_v44 = vsub.f32 %v3567_v19, %v4090_v29  ;;  %v2674_v30 = vrot.slane %v2673_v37, 2  ;;  %v4740_v19 = vmov 8  }
 0x699   : > { %v2296_v6 = vrot.slane %v2295_v59, 4 }
 0x69a   : > { %v2675_v63 = vmax.f32 %v2673_v37, %v2674_v30 }
 0x69b   : > { %v2297_v16 = vadd.f32 %v2296_v6, %v2295_v59  ;;  %2076 = vperm.xlu2 %3105, %v4027_v49   ;;  %v1477_v6 = vsel %vm1334_vm0, %v1406_v42, 2147483647 }
 0x69c   : > { %v2676_v38 = vrot.slane %v2675_v63, 1 }
 0x69d   : > { %1984 = vperm.xlu1 %3103, %v4007_v47   ;;  %v2298_v35 = vrot.slane %v2297_v16, 2  ;;  %v2277_v9 = vpop.permute.xlu0 %2276 }
 0x69e   : > { %v2292_v36 = vmul.f32 %v4100_v51, %v2277_v9  ;;  %v2708_v9 = vmul.f32 1.442695, %v2698_v44  ;;  %v4123_v61 = vmax.f32 %v2675_v63, %v2676_v38 }
 0x69f   : > { %v2299_v39 = vadd.f32 %v2298_v35, %v2297_v16  ;;  %v1478_v16 = vrot.slane %v1477_v6, 4  ;;  %v3136_v35 = vpop.eup %3135 }
 0x6a0   : > { %v2330_v59 = vsel %vm1334_vm0, %v2292_v36, 0.0  ;;  %v3138_v42 = vpop.eup %3137  ;;  %3139 = vpow2.f32 %v2708_v9  ;;  %v2743_v36 = vadd.f32 %v2742_v52, %v2741_v7  ;;  %4741 = vst [vmem:[#allocation23_spill] sm:$0xff] %v4123_v61  ;;  %v2690_v52 = vrot.slane %v3683_v54, 4 }
 0x6a1   : > { %v2300_v40 = vrot.slane %v2299_v39, 1  ;;  %v2331_v50 = vrot.slane %v2330_v59, 4  ;;  %vm1479_vm6 = vcmp.lt.s32.totalorder %v1477_v6, %v1478_v16  ;;  %3141 = vlog2.f32 %v2755_v21 }
 0x6a2   : > { %v1480_v29 = vsel %vm1479_vm6, %v1477_v6, %v1478_v16  ;;  %v2691_v63 = vmax.f32 %v3683_v54, %v2690_v52 }
 0x6a3   : > { %v2301_v4 = vadd.f32 %v2300_v40, %v2299_v39  ;;  %v2332_v22 = vadd.f32 %v2331_v50, %v2330_v59  ;;  %2088 = vperm.xlu2 %3105, %v4018_v23   ;;  %v2725_v50 = vadd.f32 %v2724_v12, %v2723_v10  ;;  %v2756_v39 = vrot.slane %v3136_v35, 4 }
 0x6a4   : > { %v2726_v59 = vrot.slane %v3138_v42, 4  ;;  %v1470_v40 = vsel %vm1469_vm5, %v1467_v41, %v1468_v11  ;;  %v1481_v7 = vrot.slane %v1480_v29, 2 }
 0x6a5   : > { %1996 = vperm.xlu1 %3103, %v4060_v15   ;;  %v4114_v28 = vsel %vm2351_vm4, 0.0, %v2301_v4  ;;  %v2333_v55 = vrot.slane %v2332_v22, 2  ;;  %3143 = vlog2.f32 %v2725_v50  ;;  %v2757_v37 = vadd.f32 %v3136_v35, %v2756_v39 }
 0x6a6   : > { %3145 = vlog2.f32 %v2743_v36  ;;  %v1471_v10 = vrot.slane %v1470_v40, 2  ;;  %v2727_v41 = vadd.f32 %v3138_v42, %v2726_v59  ;;  %vm1482_vm9 = vcmp.lt.s32.totalorder %v1480_v29, %v1481_v7 }
 0x6a7   : > { %v2334_v17 = vadd.f32 %v2333_v55, %v2332_v22  ;;  %v3140_v22 = vpop.eup %3139  ;;  %v2758_v11 = vrot.slane %v2757_v37, 2  ;;  %v1483_v21 = vsel %vm1482_vm9, %v1480_v29, %v1481_v7  ;;  %v2700_v42 = vsub.f32 %v3666_v33, %v4123_v61 }
 0x6a8   : > { %v3142_v6 = vpop.eup %3141  ;;  %v2732_v9 = vrot.slane %v3140_v22, 4  ;;  %vm1472_vm8 = vcmp.lt.s32.totalorder %v1470_v40, %v1471_v10  ;;  %v2728_v16 = vrot.slane %v2727_v41, 2  ;;  %v1999_v50 = vmul.f32 %v4074_v48, %v3998_v46 }
 0x6a9   : > { %v2335_v44 = vrot.slane %v2334_v17, 1  ;;  %v1473_v35 = vsel %vm1472_vm8, %v1470_v40, %v1471_v10  ;;  %v2779_v30 = vmul.f32 0.6931472, %v3142_v6  ;;  %v1636_v40 = vcvt.f32.s32 %v3966_v56 }
 0x6aa   : > { %v4127_v55 = vadd.f32 %v3140_v22, %v2732_v9  ;;  %v2729_v39 = vadd.f32 %v2728_v16, %v2727_v41  ;;  %v1474_v59 = vrot.slane %v1473_v35, 1  ;;  %v1918_v29 = vsel %vm1334_vm0, %v3992_v58, 0.0 }
 0x6ab   : > { %v2336_v4 = vadd.f32 %v2335_v44, %v2334_v17  ;;  %3108 = vset.pattern.permute.xlu2 %v4740_v19  ;;  %v3144_v12 = vpop.eup %3143  ;;  %v2759_v17 = vadd.f32 %v2758_v11, %v2757_v37  ;;  %v2004_v37 = vmul.f32 %v4100_v51, %v4011_v43  ;;  %v4142_v38 = vadd.f32 %v2779_v30, %v4032_v20 }
 0x6ac   : > { %2164 = vperm.xlu2 %3108, %v3922_v57   ;;  %4742 = vst [vmem:[#allocation24_spill] sm:$0xff] %v4127_v55  ;;  %v2769_v36 = vmul.f32 0.6931472, %v3144_v12  ;;  %v2712_v10 = vmul.f32 1.442695, %v2700_v42  ;;  %v2007_v7 = vsel %vm1334_vm0, %v1999_v50, 0.0  ;;  %vm1475_vm10 = vcmp.lt.s32.totalorder %v1473_v35, %v1474_v59 }
 0x6ad   : > { %3106 = vset.pattern.permute.xlu1 %v4734_v27  ;;  %v4120_v18 = vsel %vm2356_vm7, 0.0, %v2336_v4  ;;  %v3146_v27 = vpop.eup %3145  ;;  %v1484_v4 = vrot.slane %v1483_v21, 1  ;;  %v2760_v46 = vrot.slane %v2759_v17, 1  ;;  %v2730_v56 = vrot.slane %v2729_v39, 1 }
 0x6ae   : > { %2072 = vperm.xlu1 %3106, %v3995_v34   ;;  %v2775_v44 = vmul.f32 0.6931472, %v3146_v27  ;;  %v4146_v41 = vadd.f32 %v2769_v36, %v4034_v45  ;;  %v2692_v9 = vrot.slane %v2691_v63, 2  ;;  %v1919_v12 = vrot.slane %v1918_v29, 4 }
 0x6af   : > { %vm4154_vm12 = vcmp.lt.s32.totalorder %v1483_v21, %v1484_v4  ;;  %v1637_v20 = vshll.u32 %v1636_v40, 16  ;;  %v2008_v45 = vrot.slane %v2007_v7, 4  ;;  %v2042_v11 = vsel %vm1334_vm0, %v2004_v37, 0.0 }
 0x6b0   : > { %v4149_v6 = vadd.f32 %v2775_v44, %v4036_v5  ;;  %v4160_v27 = vadd.f32 %v2760_v46, %v2759_v17  ;;  %3147 = vpow2.f32 %v2712_v10  ;;  %v2095_v16 = vmul.f32 %v4074_v48, %v4022_v2 }
 0x6b1   : > { %v4166_v52 = vadd.f32 %v2730_v56, %v2729_v39  ;;  %v4168_v30 = vmax.f32 %v2691_v63, %v2692_v9  ;;  %v4170_v50 = vsel %vm1475_vm10, %v1473_v35, %v1474_v59  ;;  %v1920_v36 = vadd.f32 %v1919_v12, %v1918_v29 }
 0x6b2   : > { %4743 = vst [vmem:[#allocation25_spill] sm:$0xff] %v4149_v6  ;;  %v2043_v44 = vrot.slane %v2042_v11, 4  ;;  %v4176_v17 = vsel %vm1850_vm11, 1.0, %v4737_v25  ;;  %v4180_v2 = vsel %vm4154_vm12, %v1483_v21, %v1484_v4  ;;  %v4185_v39 = vperm.slane %v3169_v0, 5 }
 0x6b3   : > { %v2009_v35 = vadd.f32 %v2008_v45, %v2007_v7  ;;  %v4189_v63 = vsel %vm1849_vm13, 1.0, %v4737_v25  ;;  %v4191_v59 = vperm.slane %v3169_v0, 7  ;;  %v2103_v1 = vsel %vm1334_vm0, %v2095_v16, 0.0 }
 0x6b4   : > { %2172 = vperm.xlu2 %3108, %v4027_v49   ;;  %v4746_v40 = vmov 0   ;;  %v1621_v4 = vcvt.f32.s32 %v3984_v32  ;;  %v4197_v37 = vperm.slane %v3169_v0, 6  ;;  %v1921_v56 = vrot.slane %v1920_v36, 2 }
 0x6b5   : > { %v2044_v9 = vadd.f32 %v2043_v44, %v2042_v11  ;;  %v2010_v45 = vrot.slane %v2009_v35, 2  ;;  %v3028_v32 = vceil.f32 %v4114_v28  ;;  %v3029_v11 = vfloor.f32 %v4114_v28 }
 0x6b6   : > { %2080 = vperm.xlu1 %3106, %v4007_v47   ;;  %v4201_v7 = vpop.eup %3147  ;;  %vm3027_vm3 = vcmp.lt.s32.totalorder %v4114_v28, 0  ;;  %v1922_v22 = vadd.f32 %v1921_v56, %v1920_v36  ;;  %v2196_v33 = vmul.f32 %v4100_v51, %v4063_v53  ;;  %vm3052_vm11 = vcmp.lt.s32.totalorder %v4120_v18, 0 }
 0x6b7   : > { %v2045_v0 = vrot.slane %v2044_v9, 2  ;;  %v4221_v55 = vsel %vm3027_vm3, %v3028_v32, %v3029_v11  ;;  %v2011_v28 = vadd.f32 %v2010_v45, %v2009_v35  ;;  %v4241_v11 = vld [vmem:[%s4687_s1 + $0x8] sm:$0xf]  ;;  %3149 = vlog2.f32 %v4166_v52 }
 0x6b8   : > { %3151 = vlog2.f32 %v4160_v27 }
 0x6b9   : > { %v2046_v36 = vadd.f32 %v2045_v0, %v2044_v9  ;;  %v1923_v9 = vrot.slane %v1922_v22, 1 }
 0x6bc   : > { %v1634_v58 = vpop.xlane.xlu2 %1633  ;;  %2184 = vperm.xlu2 %3108, %v4018_v23  }
 0x6bd   : > { %v1635_v5 = vcvt.f32.s32 %v1634_v58 }
 0x6be   : > { %2092 = vperm.xlu1 %3106, %v4060_v15  }
 0x6bf   : > { %v1638_v42 = vadd.s32 %v1637_v20, %v1635_v5  ;;  %v4747_v20 = vmov 9   ;;  %v2104_v5 = vrot.slane %v2103_v1, 4 }
 0x6c1   : > { %vm1646_vm14 = vcmp.eq.s32.totalorder %v3754_v26, %v1638_v42  ;;  %v2100_v42 = vmul.f32 %v4100_v51, %v4030_v24  ;;  %v2105_v61 = vadd.f32 %v2104_v5, %v2103_v1  ;;  %v4227_v24 = vsel %vm1851_vm15, 1.0, %v4737_v25 }
 0x6c2   : > { %v1654_v29 = vsel %vm1646_vm14, 1, %v4746_v40  ;;  %v1750_v21 = vsel %vm1646_vm14, %v3788_v62, 4294967295  ;;  %v4715_v5 = vcvt.f32.s32 %v4221_v55 }
 0x6c3   : > { %v1725_v46 = vsel %vm1334_vm0, %v1654_v29, 2147483648  ;;  %v1821_v10 = vsel %vm1334_vm0, %v1750_v21, 2147483648 }
 0x6c4   : > { %v1726_v12 = vrot.slane %v1725_v46, 4  ;;  %v1822_v58 = vrot.slane %v1821_v10, 4  ;;  %v1881_v43 = vpop.permute.xlu2 %1880  ;;  %3111 = vset.pattern.permute.xlu2 %v4747_v20  ;;  %vm2792_vm9 = vcmp.eq.s32.totalorder %v3788_v62, %v4715_v5 }
 0x6c5   : > { %v4205_v16 = vmul.f32 %v4189_v63, %v1881_v43  ;;  %2260 = vperm.xlu2 %3111, %v3922_v57   ;;  %v2191_v57 = vmul.f32 %v4074_v48, %v4051_v8  ;;  %v1622_v43 = vshll.u32 %v1621_v4, 16  ;;  %v2138_v8 = vsel %vm1334_vm0, %v2100_v42, 0.0 }
 0x6c6   : > { %3109 = vset.pattern.permute.xlu1 %v4740_v19  ;;  %vm1727_vm1 = vcmp.gt.s32.totalorder %v1725_v46, %v1726_v12  ;;  %vm1823_vm2 = vcmp.gt.s32.totalorder %v1821_v10, %v1822_v58  ;;  %v2139_v35 = vrot.slane %v2138_v8, 4 }
 0x6c7   : > { %2168 = vperm.xlu1 %3109, %v3995_v34   ;;  %v1728_v44 = vsel %vm1727_vm1, %v1725_v46, %v1726_v12  ;;  %v1824_v19 = vsel %vm1823_vm2, %v1821_v10, %v1822_v58  ;;  %v2199_v1 = vsel %vm1334_vm0, %v2191_v57, 0.0  ;;  %v2106_v12 = vrot.slane %v2105_v61, 2 }
 0x6c8   : > { %v1729_v29 = vrot.slane %v1728_v44, 2  ;;  %v1825_v21 = vrot.slane %v1824_v19, 2  ;;  %v2234_v58 = vsel %vm1334_vm0, %v2196_v33, 0.0  ;;  %v2200_v33 = vrot.slane %v2199_v1, 4 }
 0x6c9   : > { %v2235_v0 = vrot.slane %v2234_v58, 4 }
 0x6ca   : > { %vm1730_vm4 = vcmp.gt.s32.totalorder %v1728_v44, %v1729_v29  ;;  %vm1826_vm5 = vcmp.gt.s32.totalorder %v1824_v19, %v1825_v21 }
 0x6cb   : > { %v1731_v46 = vsel %vm1730_vm4, %v1728_v44, %v1729_v29  ;;  %v1827_v4 = vsel %vm1826_vm5, %v1824_v19, %v1825_v21  ;;  %v2012_v19 = vrot.slane %v2011_v28, 1 }
 0x6cc   : > { %v1732_v10 = vrot.slane %v1731_v46, 1  ;;  %v1828_v53 = vrot.slane %v1827_v4, 1  ;;  %v1889_v56 = vpop.permute.xlu2 %1888 }
 0x6cd   : > { %v4234_v60 = vmul.f32 %v4227_v24, %v1889_v56  ;;  %2268 = vperm.xlu2 %3111, %v4027_v49   ;;  %v2047_v49 = vrot.slane %v2046_v36, 1  ;;  %v4253_v56 = vperm.slane %v4241_v11, 0  ;;  %v2013_v5 = vadd.f32 %v2012_v19, %v2011_v28 }
 0x6ce   : > { %v1619_v32 = vpop.xlane.xlu1 %1618  ;;  %vm1733_vm6 = vcmp.gt.s32.totalorder %v1731_v46, %v1732_v10  ;;  %vm1829_vm7 = vcmp.gt.s32.totalorder %v1827_v4, %v1828_v53 }
 0x6cf   : > { %v1620_v45 = vcvt.f32.s32 %v1619_v32  ;;  %2176 = vperm.xlu1 %3109, %v4007_v47   ;;  %v1734_v42 = vsel %vm1733_vm6, %v1731_v46, %v1732_v10  ;;  %v1830_v44 = vsel %vm1829_vm7, %v1827_v4, %v1828_v53  ;;  %v2107_v46 = vadd.f32 %v2106_v12, %v2105_v61 }
 0x6d0   : > { %vm1742_vm8 = vcmp.gt.s32.totalorder %v1734_v42, 0  ;;  %v2140_v4 = vadd.f32 %v2139_v35, %v2138_v8  ;;  %v2201_v10 = vadd.f32 %v2200_v33, %v2199_v1  ;;  %v2048_v61 = vadd.f32 %v2047_v49, %v2046_v36 }
 0x6d1   : > { %v1623_v57 = vadd.s32 %v1622_v43, %v1620_v45  ;;  %v4247_v29 = vsel %vm1742_vm8, %v1830_v44, %v4180_v2  ;;  %v4250_v21 = vsel %vm1742_vm8, 1.0, %v4081_v3  ;;  %v1924_v43 = vadd.f32 %v1923_v9, %v1922_v22 }
 0x6d2   : > { %4748 = vst [vmem:[#allocation26_spill] sm:$0xff] %v4250_v21  ;;  %v2236_v45 = vadd.f32 %v2235_v0, %v2234_v58  ;;  %v3015_v2 = vsel %vm2792_vm9, 1.0, %v4737_v25  ;;  %v2141_v22 = vrot.slane %v2140_v4, 2  ;;  %v3054_v1 = vfloor.f32 %v4120_v18 }
 0x6d3   : > { %vm1645_vm10 = vcmp.eq.s32.totalorder %v3754_v26, %v1623_v57  ;;  %v2108_v26 = vrot.slane %v2107_v46, 1  ;;  %v2816_v58 = vmul.f32 %v3015_v2, %v3553_v14  ;;  %v2202_v28 = vrot.slane %v2201_v10, 2 }
 0x6d4   : > { %v1653_v53 = vsel %vm1645_vm10, 1, %v4746_v40  ;;  %v1749_v32 = vsel %vm1645_vm10, %v3788_v62, 4294967295  ;;  %v4261_v44 = vpop.permute.xlu2 %1896  ;;  %v3053_v40 = vceil.f32 %v4120_v18  ;;  %v2237_v36 = vrot.slane %v2236_v45, 2 }
 0x6d5   : > { %v1715_v42 = vsel %vm1334_vm0, %v1653_v53, 2147483648  ;;  %v1811_v3 = vsel %vm1334_vm0, %v1749_v32, 2147483648  ;;  %2280 = vperm.xlu2 %3111, %v4018_v23   ;;  %v2401_v23 = vsub.f32 %v1924_v43, %v4185_v39  ;;  %v4271_v33 = vperm.slane %v4241_v11, 1 }
 0x6d6   : > { %v1716_v8 = vrot.slane %v1715_v42, 4  ;;  %v1812_v12 = vrot.slane %v1811_v3, 4  ;;  %v2418_v57 = vsub.f32 %v2013_v5, %v4197_v37  ;;  %v2423_v49 = vsub.f32 %v2048_v61, %v4197_v37 }
 0x6d7   : > { %2188 = vperm.xlu1 %3109, %v4060_v15   ;;  %v2142_v14 = vadd.f32 %v2141_v22, %v2140_v4  ;;  %v4275_v53 = vsel %vm3052_vm11, %v3053_v40, %v3054_v1  ;;  %v2109_v18 = vadd.f32 %v2108_v26, %v2107_v46  ;;  %v2824_v32 = vrot.slane %v2816_v58, 4 }
 0x6d8   : > { %vm1717_vm12 = vcmp.gt.s32.totalorder %v1715_v42, %v1716_v8  ;;  %vm1813_vm13 = vcmp.gt.s32.totalorder %v1811_v3, %v1812_v12  ;;  %v2203_v2 = vadd.f32 %v2202_v28, %v2201_v10  ;;  %v4280_v61 = vmul.f32 %v4191_v59, %v2401_v23 }
 0x6d9   : > { %v1718_v35 = vsel %vm1717_vm12, %v1715_v42, %v1716_v8  ;;  %v1814_v9 = vsel %vm1813_vm13, %v1811_v3, %v1812_v12  ;;  %v2238_v42 = vadd.f32 %v2237_v36, %v2236_v45  ;;  %v3056_v12 = vcvt.f32.s32 %v4275_v53 }
 0x6da   : > { %v1719_v19 = vrot.slane %v1718_v35, 2  ;;  %v1815_v0 = vrot.slane %v1814_v9, 2  ;;  %v4283_v4 = vmul.f32 %v4253_v56, %v2418_v57  ;;  %v4286_v46 = vmul.f32 %v4253_v56, %v2423_v49 }
 0x6db   : > { %v2143_v10 = vrot.slane %v2142_v14, 1  ;;  %v2825_v45 = vadd.f32 %v2824_v32, %v2816_v58  ;;  %v2436_v22 = vsub.f32 %v2109_v18, %v4271_v33  ;;  %v2204_v36 = vrot.slane %v2203_v2, 1 }
 0x6dc   : > { %vm1720_vm14 = vcmp.gt.s32.totalorder %v1718_v35, %v1719_v19  ;;  %vm1816_vm15 = vcmp.gt.s32.totalorder %v1814_v9, %v1815_v0  ;;  %v1973_v8 = vpop.permute.xlu2 %1972  ;;  %vm2797_vm3 = vcmp.eq.s32.totalorder %v3788_v62, %v3056_v12  ;;  %vm2541_vm6 = vcmask 1040384  }
 0x6dd   : > { %v1721_v3 = vsel %vm1720_vm14, %v1718_v35, %v1719_v19  ;;  %v1817_v43 = vsel %vm1816_vm15, %v1814_v9, %v1815_v0  ;;  %v2000_v5 = vmul.f32 %v3989_v31, %v1973_v8  ;;  %v2239_v35 = vrot.slane %v2238_v42, 1 }
 0x6de   : > { %v1722_v21 = vrot.slane %v1721_v3, 1  ;;  %v1818_v6 = vrot.slane %v1817_v43, 1  ;;  %v3020_v0 = vsel %vm2797_vm3, 1.0, %v4737_v25  ;;  %vm2550_vm8 = vcmask 1041408  }
 0x6df   : > { %3112 = vset.pattern.permute.xlu1 %v4747_v20  ;;  %v2014_v26 = vsel %vm1334_vm0, %v2000_v5, 0.0  ;;  %v2144_v20 = vadd.f32 %v2143_v10, %v2142_v14  ;;  %v2205_v14 = vadd.f32 %v2204_v36, %v2203_v2  ;;  %vm1854_vm9 = vcmp.eq.s32.totalorder %v4247_v29, %v3788_v62 }
 0x6e0   : > { %vm1723_vm1 = vcmp.gt.s32.totalorder %v1721_v3, %v1722_v21  ;;  %vm1819_vm2 = vcmp.gt.s32.totalorder %v1817_v43, %v1818_v6  ;;  %2264 = vperm.xlu1 %3112, %v3995_v34   ;;  %v2015_v28 = vrot.slane %v2014_v26, 4  ;;  %v2477_v34 = vrot.slane %v4283_v4, 7 }
 0x6e1   : > { %v1724_v40 = vsel %vm1723_vm1, %v1721_v3, %v1722_v21  ;;  %v1820_v1 = vsel %vm1819_vm2, %v1817_v43, %v1818_v6  ;;  %v4301_v21 = vperm.slane %v4241_v11, 2  ;;  %v2826_v6 = vrot.slane %v2825_v45, 2 }
 0x6e2   : > { %vm1741_vm4 = vcmp.gt.s32.totalorder %v1724_v40, 0  ;;  %v2016_v9 = vadd.f32 %v2015_v28, %v2014_v26  ;;  %v4312_v3 = vmul.f32 5.0, %v2436_v22  ;;  %v2441_v43 = vsub.f32 %v2144_v20, %v4271_v33  ;;  %v4749_v26 = vld [vmem:[#allocation10_spill] sm:$0xff] }
 0x6e3   : > { %v1837_v58 = vsel %vm1741_vm4, %v1820_v1, %v4170_v50  ;;  %v4297_v23 = vsel %vm1741_vm4, 1.0, %v4079_v13  ;;  %v2240_v13 = vadd.f32 %v2239_v35, %v2238_v42  ;;  %v2827_v10 = vadd.f32 %v2826_v6, %v2825_v45 }
 0x6e4   : > { %vm1853_vm5 = vcmp.eq.s32.totalorder %v1837_v58, %v3788_v62  ;;  %v2017_v50 = vrot.slane %v2016_v9, 2  ;;  %v1981_v49 = vpop.permute.xlu2 %1980  ;;  %v2821_v40 = vmul.f32 %v3020_v0, %v4749_v26  ;;  %v2453_v36 = vsub.f32 %v2205_v14, %v4301_v21 }
 0x6e5   : > { %v4307_v57 = vsel %vm1853_vm5, 1.0, %v4737_v25  ;;  %v2002_v11 = vmul.f32 %v4176_v17, %v1981_v49  ;;  %v2458_v35 = vsub.f32 %v2240_v13, %v4301_v21  ;;  %v2501_v20 = vrot.slane %v4312_v3, 6 }
 0x6e6   : > { %v1909_v18 = vmul.f32 %v4307_v57, %v4261_v44  ;;  %v1873_v32 = vpop.permute.xlu1 %1872  ;;  %v2018_v8 = vadd.f32 %v2017_v50, %v2016_v9  ;;  %v2828_v0 = vrot.slane %v2827_v10, 1  ;;  %v2854_v50 = vrot.slane %v2821_v40, 4 }
 0x6e7   : > { %v1903_v5 = vmul.f32 %v4074_v48, %v1873_v32  ;;  %v2028_v2 = vsel %vm1334_vm0, %v2002_v11, 0.0  ;;  %v1925_v48 = vsel %vm1334_vm0, %v4205_v16, 0.0  ;;  %v4331_v16 = vmul.f32 5.0, %v2458_v35 }
 0x6e8   : > { %v1953_v1 = vsel %vm1334_vm0, %v1909_v18, 0.0  ;;  %2272 = vperm.xlu1 %3112, %v4007_v47   ;;  %v2019_v42 = vrot.slane %v2018_v8, 1  ;;  %v2029_v28 = vrot.slane %v2028_v2, 4  ;;  %v4326_v47 = vmul.f32 5.0, %v2441_v43 }
 0x6e9   : > { %v1954_v44 = vrot.slane %v1953_v1, 4  ;;  %v1911_v22 = vsel %vm1334_vm0, %v1903_v5, 0.0  ;;  %v1926_v18 = vrot.slane %v1925_v48, 4  ;;  %v4329_v5 = vmul.f32 5.0, %v2453_v36 }
 0x6ea   : > { %v1912_v45 = vrot.slane %v1911_v22, 4  ;;  %v2020_v9 = vadd.f32 %v2019_v42, %v2018_v8  ;;  %v2030_v6 = vadd.f32 %v2029_v28, %v2028_v2  ;;  %v4750_v43 = vcvt.f32.s32 %v4221_v55 }
 0x6eb   : > { %v1955_v58 = vadd.f32 %v1954_v44, %v1953_v1  ;;  %v4348_v55 = vadd.f32 %v1926_v18, %v1925_v48  ;;  %v2506_v19 = vrot.slane %v4326_v47, 6  ;;  %vm4376_vm10 = vcmp.ne.s32.totalorder %v3056_v12, 0 }
 0x6ec   : > { %v1913_v49 = vadd.f32 %v1912_v45, %v1911_v22  ;;  %v2419_v14 = vsub.f32 %v2020_v9, %v4197_v37  ;;  %v2031_v13 = vrot.slane %v2030_v6, 2  ;;  %v1993_v32 = vpop.permute.xlu2 %1992  ;;  %vm4336_vm7 = vcmp.ne.s32.totalorder %v4750_v43, 0 }
 0x6ed   : > { %v1956_v11 = vrot.slane %v1955_v58, 2  ;;  %v2005_v1 = vmul.f32 %v4307_v57, %v1993_v32  ;;  %v4342_v22 = vadd.f32 %v2828_v0, %v2827_v10  ;;  %v4346_v9 = vadd.f32 %v2854_v50, %v2821_v40 }
 0x6ee   : > { %v1914_v26 = vrot.slane %v1913_v49, 2  ;;  %v1885_v8 = vpop.permute.xlu1 %1884  ;;  %v2428_v44 = vmul.f32 %v4253_v56, %v2419_v14  ;;  %v2032_v42 = vadd.f32 %v2031_v13, %v2030_v6  ;;  %v2525_v10 = vrot.slane %v4329_v5, 5 }
 0x6ef   : > { %v1906_v28 = vmul.f32 %v4176_v17, %v1885_v8  ;;  %v1957_v36 = vadd.f32 %v1956_v11, %v1955_v58  ;;  %v2049_v45 = vsel %vm1334_vm0, %v2005_v1, 0.0  ;;  %v4361_v40 = vsel %vm4336_vm7, 1.0, %v4737_v25 }
 0x6f0   : > { %v1915_v35 = vadd.f32 %v1914_v26, %v1913_v49  ;;  %2284 = vperm.xlu1 %3112, %v4060_v15   ;;  %v2478_v32 = vrot.slane %v2428_v44, 7  ;;  %v2050_v43 = vrot.slane %v2049_v45, 4  ;;  %v2033_v14 = vrot.slane %v2032_v42, 1 }
 0x6f1   : > { %v1932_v13 = vsel %vm1334_vm0, %v1906_v28, 0.0  ;;  %v1958_v48 = vrot.slane %v1957_v36, 1  ;;  %v2872_v18 = vsub.f32 %v4146_v41, %v4342_v22  ;;  %v2856_v11 = vrot.slane %v4346_v9, 2 }
 0x6f2   : > { %v1916_v6 = vrot.slane %v1915_v35, 1  ;;  %v4356_v0 = vsel %vm2541_vm6, %v4280_v61, %v2478_v32  ;;  %v2051_v15 = vadd.f32 %v2050_v43, %v2049_v45  ;;  %v1933_v49 = vrot.slane %v1932_v13, 4 }
 0x6f3   : > { %v1928_v5 = vrot.slane %v4348_v55, 2  ;;  %v2034_v61 = vadd.f32 %v2033_v14, %v2032_v42  ;;  %v1959_v32 = vadd.f32 %v1958_v48, %v1957_v36  ;;  %v4382_v14 = vsel %vm1334_vm0, %v4234_v60, 0.0 }
 0x6f4   : > { %v1917_v50 = vadd.f32 %v1916_v6, %v1915_v35  ;;  %v2052_v26 = vrot.slane %v2051_v15, 2  ;;  %v2069_v1 = vpop.permute.xlu2 %2068  ;;  %v1934_v44 = vadd.f32 %v1933_v49, %v1932_v13  ;;  %v4396_v60 = vsel %vm1854_vm9, 1.0, %v4737_v25 }
 0x6f5   : > { %v2096_v2 = vmul.f32 %v3989_v31, %v2069_v1  ;;  %v2421_v36 = vsub.f32 %v2034_v61, %v4197_v37  ;;  %v2406_v1 = vsub.f32 %v1959_v32, %v4185_v39  ;;  %vm2583_vm11 = vcmask 1043456  }
 0x6f6   : > { %v2400_v8 = vsub.f32 %v1917_v50, %v4185_v39  ;;  %v1893_v28 = vpop.permute.xlu1 %1892  ;;  %v2053_v45 = vadd.f32 %v2052_v26, %v2051_v15  ;;  %v1935_v6 = vrot.slane %v1934_v44, 2  ;;  %v1929_v42 = vadd.f32 %v1928_v5, %v4348_v55 }
 0x6f7   : > { %v1908_v35 = vmul.f32 %v4100_v51, %v1893_v28  ;;  %v2110_v58 = vsel %vm1334_vm0, %v2096_v2, 0.0  ;;  %vm2357_vm5 = vcmp.lt.f32.partialorder %v4297_v23, 0.5 }
 0x6f8   : > { %v2409_v43 = vmul.f32 %v4191_v59, %v2400_v8  ;;  %v2054_v51 = vrot.slane %v2053_v45, 1  ;;  %v2111_v13 = vrot.slane %v2110_v58, 4  ;;  %v1936_v50 = vadd.f32 %v1935_v6, %v1934_v44  ;;  %v4755_v8 = vld [vmem:[#allocation11_spill] sm:$0xff] }
 0x6f9   : > { %v1946_v15 = vsel %vm1334_vm0, %v1908_v35, 0.0 }
 0x6fa   : > { %v2542_v48 = vsel %vm2541_vm6, %v2409_v43, %v2477_v34  ;;  %v1947_v53 = vrot.slane %v1946_v15, 4  ;;  %v2055_v49 = vadd.f32 %v2054_v51, %v2053_v45  ;;  %v2112_v26 = vadd.f32 %v2111_v13, %v2110_v58 }
 0x6fb   : > { %v2551_v12 = vsel %vm2550_vm8, %v2542_v48, %v2501_v20  ;;  %v1937_v61 = vrot.slane %v1936_v50, 1  ;;  %v2430_v58 = vmul.f32 %v4253_v56, %v2421_v36  ;;  %v2415_v51 = vmul.f32 %v4191_v59, %v2406_v1 }
 0x6fc   : > { %v2559_v4 = vsel %vm1334_vm0, %v2551_v12, %v2525_v10  ;;  %v1948_v34 = vadd.f32 %v1947_v53, %v1946_v15  ;;  %v2424_v3 = vsub.f32 %v2055_v49, %v4197_v37  ;;  %v2113_v20 = vrot.slane %v2112_v26, 2  ;;  %v2077_v2 = vpop.permute.xlu2 %2076 }
 0x6fd   : > { %v2567_v44 = vsub.f32 %v4755_v8, %v2559_v4  ;;  %v1938_v28 = vadd.f32 %v1937_v61, %v1936_v50  ;;  %v2098_v29 = vmul.f32 %v4176_v17, %v2077_v2  ;;  %v2480_v49 = vrot.slane %v2430_v58, 7 }
 0x6fe   : > { %v1949_v45 = vrot.slane %v1948_v34, 2  ;;  %v1901_v35 = vpop.permute.xlu1 %1900  ;;  %v2433_v32 = vmul.f32 %v4253_v56, %v2424_v3  ;;  %v2114_v10 = vadd.f32 %v2113_v20, %v2112_v26  ;;  %v2857_v26 = vadd.f32 %v2856_v11, %v4346_v9 }
 0x6ff   : > { %v2575_v43 = vand.u32 2147483647, %v2567_v44  ;;  %v1910_v6 = vmul.f32 %v4396_v60, %v1901_v35  ;;  %v2403_v13 = vsub.f32 %v1938_v28, %v4185_v39  ;;  %v2124_v48 = vsel %vm1334_vm0, %v2098_v29, 0.0 }
 0x700   : > { %v1950_v15 = vadd.f32 %v1949_v45, %v1948_v34  ;;  %v2483_v50 = vrot.slane %v2433_v32, 7  ;;  %v2115_v53 = vrot.slane %v2114_v10, 1  ;;  %v2125_v12 = vrot.slane %v2124_v48, 4 }
 0x701   : > { %v2584_v36 = vsel %vm2583_vm11, %v2575_v43, 0.0  ;;  %v2412_v61 = vmul.f32 %v4191_v59, %v2403_v13  ;;  %v4418_v34 = vsel %vm4376_vm10, 1.0, %v4737_v25  ;;  %v2880_v9 = vsel %vm2541_vm6, %v2872_v18, %v4361_v40 }
 0x702   : > { %v2585_v4 = vrot.slane %v2584_v36, 4  ;;  %v1951_v8 = vrot.slane %v1950_v15, 1  ;;  %v4413_v44 = vsel %vm2541_vm6, %v2415_v51, %v2483_v50  ;;  %v2116_v1 = vadd.f32 %v2115_v53, %v2114_v10 }
 0x703   : > { %v2126_v3 = vadd.f32 %v2125_v12, %v2124_v48  ;;  %v4421_v2 = vsel %vm2541_vm6, %v2412_v61, %v2480_v49  ;;  %v1940_v11 = vrot.slane %v4382_v14, 4  ;;  %v2858_v10 = vrot.slane %v2857_v26, 1 }
 0x704   : > { %v2586_v20 = vadd.f32 %v2585_v4, %v2584_v36  ;;  %v1952_v58 = vadd.f32 %v1951_v8, %v1950_v15  ;;  %v2437_v28 = vsub.f32 %v2116_v1, %v4271_v33  ;;  %v2089_v29 = vpop.permute.xlu2 %2088  ;;  %v1960_v22 = vsel %vm1334_vm0, %v1910_v6, 0.0 }
 0x705   : > { %v2127_v45 = vrot.slane %v2126_v3, 2  ;;  %v2101_v32 = vmul.f32 %v4307_v57, %v2089_v29  ;;  %v1941_v55 = vadd.f32 %v1940_v11, %v4382_v14  ;;  %v1930_v12 = vrot.slane %v1929_v42, 1 }
 0x706   : > { %v2587_v35 = vrot.slane %v2586_v20, 2  ;;  %v2405_v43 = vsub.f32 %v1952_v58, %v4185_v39  ;;  %v2445_v51 = vmul.f32 5.0, %v2437_v28  ;;  %v4756_v4 = vrot.slane %v4286_v46, 7 }
 0x707   : > { %v2128_v41 = vadd.f32 %v2127_v45, %v2126_v3  ;;  %v1977_v18 = vpop.permute.xlu1 %1976  ;;  %v2145_v48 = vsel %vm1334_vm0, %v2101_v32, 0.0  ;;  %v1961_v3 = vrot.slane %v1960_v22, 4  ;;  %v4757_v58 = vrot.slane %v4331_v16, 5 }
 0x708   : > { %v2588_v13 = vadd.f32 %v2587_v35, %v2586_v20  ;;  %v2414_v15 = vmul.f32 %v4191_v59, %v2405_v43  ;;  %v2001_v36 = vmul.f32 %v4189_v63, %v1977_v18  ;;  %v2502_v5 = vrot.slane %v2445_v51, 6  ;;  %v4758_v35 = vld [vmem:[#allocation3_spill] sm:$0xff] }
 0x709   : > { %v2129_v50 = vrot.slane %v2128_v41, 1  ;;  %v2146_v53 = vrot.slane %v2145_v48, 4  ;;  %v4454_v45 = vadd.f32 %v2858_v10, %v2857_v26  ;;  %v1942_v29 = vrot.slane %v1941_v55, 2 }
 0x70a   : > { %v2589_v49 = vrot.slane %v2588_v13, 1  ;;  %v2547_v6 = vsel %vm2541_vm6, %v2414_v15, %v4756_v4  ;;  %v2021_v61 = vsel %vm1334_vm0, %v2001_v36, 0.0  ;;  %v4446_v8 = vsel %vm2550_vm8, %v4356_v0, %v2502_v5 }
 0x70b   : > { %v2556_v14 = vsel %vm2550_vm8, %v2547_v6, %v2506_v19  ;;  %v2130_v1 = vadd.f32 %v2129_v50, %v2128_v41  ;;  %v2147_v11 = vadd.f32 %v2146_v53, %v2145_v48  ;;  %v2022_v28 = vrot.slane %v2021_v61, 4 }
 0x70c   : > { %v2590_v20 = vadd.f32 %v2589_v49, %v2588_v13  ;;  %v2564_v46 = vsel %vm1334_vm0, %v2556_v14, %v4757_v58  ;;  %v2165_v32 = vpop.permute.xlu2 %2164  ;;  %v1931_v10 = vadd.f32 %v1930_v12, %v1929_v42  ;;  %v1962_v18 = vadd.f32 %v1961_v3, %v1960_v22 }
 0x70d   : > { %v2572_v43 = vsub.f32 %v4758_v35, %v2564_v46  ;;  %v2439_v0 = vsub.f32 %v2130_v1, %v4271_v33  ;;  %v2148_v47 = vrot.slane %v2147_v11, 2  ;;  %v2023_v16 = vadd.f32 %v2022_v28, %v2021_v61 }
 0x70e   : > { %v2640_v19 = vmul.f32 %v4361_v40, %v2590_v20  ;;  %v2192_v26 = vmul.f32 %v3989_v31, %v2165_v32  ;;  %v1943_v50 = vadd.f32 %v1942_v29, %v1941_v55  ;;  %v2402_v22 = vsub.f32 %v1931_v10, %v4185_v39 }
 0x70f   : > { %v2580_v51 = vand.u32 2147483647, %v2572_v43  ;;  %v2447_v41 = vmul.f32 5.0, %v2439_v0  ;;  %v1985_v13 = vpop.permute.xlu1 %1984  ;;  %v2149_v48 = vadd.f32 %v2148_v47, %v2147_v11  ;;  %v2024_v36 = vrot.slane %v2023_v16, 2 }
 0x710   : > { %v2888_v15 = vsel %vm2550_vm8, %v2880_v9, %v2640_v19  ;;  %v2206_v5 = vsel %vm1334_vm0, %v2192_v26, 0.0  ;;  %v2003_v42 = vmul.f32 %v4227_v24, %v1985_v13  ;;  %v1963_v12 = vrot.slane %v1962_v18, 2 }
 0x711   : > { %2896 = vst [vmem:[%s4463_s11] sm:$0x7] %v2888_v15  ;;  %v2619_v53 = vsel %vm2583_vm11, %v2580_v51, 0.0  ;;  %v2504_v40 = vrot.slane %v2447_v41, 6  ;;  %v2207_v49 = vrot.slane %v2206_v5, 4  ;;  %v2150_v6 = vrot.slane %v2149_v48, 1 }
 0x712   : > { %v2620_v4 = vrot.slane %v2619_v53, 4  ;;  %v2025_v61 = vadd.f32 %v2024_v36, %v2023_v16  ;;  %v2035_v20 = vsel %vm1334_vm0, %v2003_v42, 0.0  ;;  %v2877_v58 = vsub.f32 %v4142_v38, %v4454_v45 }
 0x713   : > { %v4475_v9 = vsel %vm2550_vm8, %v4421_v2, %v2504_v40  ;;  %v2208_v14 = vadd.f32 %v2207_v49, %v2206_v5  ;;  %v2151_v55 = vadd.f32 %v2150_v6, %v2149_v48  ;;  %v1944_v46 = vrot.slane %v1943_v50, 1 }
 0x714   : > { %v2621_v1 = vadd.f32 %v2620_v4, %v2619_v53  ;;  %v2026_v3 = vrot.slane %v2025_v61, 1  ;;  %v2036_v28 = vrot.slane %v2035_v20, 4  ;;  %v2173_v29 = vpop.permute.xlu2 %2172  ;;  %v2411_v32 = vmul.f32 %v4191_v59, %v2402_v22 }
 0x715   : > { %v2209_v11 = vrot.slane %v2208_v14, 2  ;;  %v2442_v43 = vsub.f32 %v2151_v55, %v4271_v33  ;;  %v2194_v2 = vmul.f32 %v4176_v17, %v2173_v29  ;;  %v1964_v19 = vadd.f32 %v1963_v12, %v1962_v18 }
 0x716   : > { %v2622_v35 = vrot.slane %v2621_v1, 2  ;;  %v2027_v0 = vadd.f32 %v2026_v3, %v2025_v61  ;;  %v2037_v16 = vadd.f32 %v2036_v28, %v2035_v20  ;;  %v1945_v36 = vadd.f32 %v1944_v46, %v1943_v50 }
 0x717   : > { %v2210_v47 = vadd.f32 %v2209_v11, %v2208_v14  ;;  %v1997_v26 = vpop.permute.xlu1 %1996  ;;  %v2450_v51 = vmul.f32 5.0, %v2442_v43  ;;  %v2220_v45 = vsel %vm1334_vm0, %v2194_v2, 0.0  ;;  %v1965_v14 = vrot.slane %v1964_v19, 1 }
 0x718   : > { %v2623_v10 = vadd.f32 %v2622_v35, %v2621_v1  ;;  %v2420_v38 = vsub.f32 %v2027_v0, %v4197_v37  ;;  %v2038_v13 = vrot.slane %v2037_v16, 2  ;;  %v2221_v15 = vrot.slane %v2220_v45, 4 }
 0x719   : > { %v2211_v41 = vrot.slane %v2210_v47, 1  ;;  %v2006_v48 = vmul.f32 %v4396_v60, %v1997_v26  ;;  %v2507_v53 = vrot.slane %v2450_v51, 6  ;;  %v2404_v0 = vsub.f32 %v1945_v36, %v4185_v39 }
 0x71a   : > { %v2624_v5 = vrot.slane %v2623_v10, 1  ;;  %v2429_v40 = vmul.f32 %v4253_v56, %v2420_v38  ;;  %v2039_v49 = vadd.f32 %v2038_v13, %v2037_v16  ;;  %v2222_v4 = vadd.f32 %v2221_v15, %v2220_v45 }
 0x71b   : > { %v2212_v18 = vadd.f32 %v2211_v41, %v2210_v47  ;;  %v2056_v6 = vsel %vm1334_vm0, %v2006_v48, 0.0  ;;  %v4490_v42 = vsel %vm2550_vm8, %v4413_v44, %v2507_v53  ;;  %v2885_v44 = vsel %vm2541_vm6, %v2877_v58, %v4418_v34  ;;  %v4759_v53 = vld [vmem:[#allocation4_spill] sm:$0xff] }
 0x71c   : > { %v2625_v61 = vadd.f32 %v2624_v5, %v2623_v10  ;;  %v2479_v22 = vrot.slane %v2429_v40, 7  ;;  %v2057_v12 = vrot.slane %v2056_v6, 4  ;;  %v2040_v50 = vrot.slane %v2039_v49, 1  ;;  %v2185_v3 = vpop.permute.xlu2 %2184 }
 0x71d   : > { %v2454_v1 = vsub.f32 %v2212_v18, %v4301_v21  ;;  %v2223_v55 = vrot.slane %v2222_v4, 2  ;;  %v2197_v28 = vmul.f32 %v4307_v57, %v2185_v3  ;;  %v2694_v45 = vrot.slane %v4168_v30, 1 }
 0x71e   : > { %v2645_v20 = vmul.f32 %v4418_v34, %v2625_v61  ;;  %v4495_v46 = vsel %vm2541_vm6, %v2411_v32, %v2479_v22  ;;  %v2058_v11 = vadd.f32 %v2057_v12, %v2056_v6  ;;  %v2041_v35 = vadd.f32 %v2040_v50, %v2039_v49 }
 0x71f   : > { %v2462_v29 = vmul.f32 5.0, %v2454_v1  ;;  %v2224_v43 = vadd.f32 %v2223_v55, %v2222_v4  ;;  %v2241_v16 = vsel %vm1334_vm0, %v2197_v28, 0.0  ;;  %v1966_v34 = vadd.f32 %v1965_v14, %v1964_v19 }
 0x720   : > { %v2893_v2 = vsel %vm2550_vm8, %v2885_v44, %v2645_v20  ;;  %v2059_v47 = vrot.slane %v2058_v11, 2  ;;  %v2073_v26 = vpop.permute.xlu1 %2072  ;;  %v2422_v10 = vsub.f32 %v2041_v35, %v4197_v37  ;;  %v2242_v38 = vrot.slane %v2241_v16, 4 }
 0x721   : > { %2901 = vst [vmem:[%s4463_s11 + $0x14] sm:$0x7] %v2893_v2  ;;  %v2526_v32 = vrot.slane %v2462_v29, 5  ;;  %v2225_v51 = vrot.slane %v2224_v43, 1  ;;  %v2097_v41 = vmul.f32 %v4189_v63, %v2073_v26  ;;  %v2413_v5 = vmul.f32 %v4191_v59, %v2404_v0 }
 0x722   : > { %v2060_v58 = vadd.f32 %v2059_v47, %v2058_v11  ;;  %v2431_v15 = vmul.f32 %v4253_v56, %v2422_v10  ;;  %v2243_v36 = vadd.f32 %v2242_v38, %v2241_v16  ;;  %v2407_v12 = vsub.f32 %v1966_v34, %v4185_v39 }
 0x723   : > { %v2560_v13 = vsel %vm1334_vm0, %v4446_v8, %v2526_v32  ;;  %v2226_v48 = vadd.f32 %v2225_v51, %v2224_v43  ;;  %v2117_v49 = vsel %vm1334_vm0, %v2097_v41, 0.0  ;;  %v4520_v11 = vmax.f32 %v4168_v30, %v2694_v45  ;;  %v4760_v51 = vld [vmem:[#allocation12_spill] sm:$0xff] }
 0x724   : > { %v2568_v40 = vsub.f32 %v4759_v53, %v2560_v13  ;;  %v2061_v18 = vrot.slane %v2060_v58, 1  ;;  %v2481_v4 = vrot.slane %v2431_v15, 7  ;;  %v2244_v6 = vrot.slane %v2243_v36, 2  ;;  %v2261_v22 = vpop.permute.xlu2 %2260 }
 0x725   : > { %v2456_v19 = vsub.f32 %v2226_v48, %v4301_v21  ;;  %v2118_v61 = vrot.slane %v2117_v49, 4  ;;  %v2288_v1 = vmul.f32 %v3989_v31, %v2261_v22  ;;  %v2416_v2 = vmul.f32 %v4191_v59, %v2407_v12 }
 0x726   : > { %v2576_v8 = vand.u32 2147483647, %v2568_v40  ;;  %v2062_v14 = vadd.f32 %v2061_v18, %v2060_v58  ;;  %v4517_v50 = vsel %vm2541_vm6, %v2413_v5, %v2481_v4  ;;  %v2245_v3 = vadd.f32 %v2244_v6, %v2243_v36 }
 0x727   : > { %v2464_v55 = vmul.f32 5.0, %v2456_v19  ;;  %v2119_v20 = vadd.f32 %v2118_v61, %v2117_v49  ;;  %v2302_v29 = vsel %vm1334_vm0, %v2288_v1, 0.0  ;;  %v2703_v49 = vsub.f32 %v3683_v54, %v4520_v11 }
 0x728   : > { %v2591_v28 = vsel %vm2583_vm11, %v2576_v8, 0.0  ;;  %v2425_v44 = vsub.f32 %v2062_v14, %v4197_v37  ;;  %v2081_v39 = vpop.permute.xlu1 %2080  ;;  %v2246_v0 = vrot.slane %v2245_v3, 1  ;;  %v2303_v16 = vrot.slane %v2302_v29, 4 }
 0x729   : > { %v2592_v35 = vrot.slane %v2591_v28, 4  ;;  %v2528_v43 = vrot.slane %v2464_v55, 5  ;;  %v2120_v31 = vrot.slane %v2119_v20, 2  ;;  %v2099_v26 = vmul.f32 %v4227_v24, %v2081_v39 }
 0x72a   : > { %v2434_v47 = vmul.f32 %v4253_v56, %v2425_v44  ;;  %v2247_v10 = vadd.f32 %v2246_v0, %v2245_v3  ;;  %v2304_v34 = vadd.f32 %v2303_v16, %v2302_v29  ;;  %v4761_v44 = vld [vmem:[#allocation16_spill] sm:$0xff]  ;;  %v4762_v29 = vld [vmem:[#allocation13_spill] sm:$0xff] }
 0x72b   : > { %v2593_v30 = vadd.f32 %v2592_v35, %v2591_v28  ;;  %v2562_v32 = vsel %vm1334_vm0, %v4475_v9, %v2528_v43  ;;  %v2121_v37 = vadd.f32 %v2120_v31, %v2119_v20  ;;  %v2131_v58 = vsel %vm1334_vm0, %v2099_v26, 0.0  ;;  %v3150_v31 = vpop.eup %3149 }
 0x72c   : > { %v2570_v38 = vsub.f32 %v4760_v51, %v2562_v32  ;;  %v2484_v45 = vrot.slane %v2434_v47, 7  ;;  %v2459_v59 = vsub.f32 %v2247_v10, %v4301_v21  ;;  %v2132_v56 = vrot.slane %v2131_v58, 4  ;;  %v2269_v15 = vpop.permute.xlu2 %2268 }
 0x72d   : > { %v2594_v41 = vrot.slane %v2593_v30, 2  ;;  %v2122_v13 = vrot.slane %v2121_v37, 1  ;;  %v2305_v5 = vrot.slane %v2304_v34, 2  ;;  %v2290_v9 = vmul.f32 %v4176_v17, %v2269_v15 }
 0x72e   : > { %v2578_v48 = vand.u32 2147483647, %v2570_v38  ;;  %v4534_v36 = vsel %vm2541_vm6, %v2416_v2, %v2484_v45  ;;  %v2467_v53 = vmul.f32 5.0, %v2459_v59  ;;  %v2133_v18 = vadd.f32 %v2132_v56, %v2131_v58  ;;  %v4763_v56 = vld [vmem:[#allocation17_spill] sm:$0xff] }
 0x72f   : > { %v2123_v40 = vadd.f32 %v2122_v13, %v2121_v37  ;;  %v2306_v19 = vadd.f32 %v2305_v5, %v2304_v34  ;;  %v2316_v6 = vsel %vm1334_vm0, %v2290_v9, 0.0  ;;  %v2595_v22 = vadd.f32 %v2594_v41, %v2593_v30 }
 0x730   : > { %v2605_v4 = vsel %vm2583_vm11, %v2578_v48, 0.0  ;;  %v2093_v61 = vpop.permute.xlu1 %2092  ;;  %v2531_v8 = vrot.slane %v2467_v53, 5  ;;  %v2134_v1 = vrot.slane %v2133_v18, 2  ;;  %v2317_v52 = vrot.slane %v2316_v6, 4 }
 0x731   : > { %v2606_v12 = vrot.slane %v2605_v4, 4  ;;  %v2438_v14 = vsub.f32 %v2123_v40, %v4271_v33  ;;  %v2307_v17 = vrot.slane %v2306_v19, 1  ;;  %v2102_v55 = vmul.f32 %v4396_v60, %v2093_v61 }
 0x732   : > { %v2565_v20 = vsel %vm1334_vm0, %v4490_v42, %v2531_v8  ;;  %vm2352_vm12 = vcmp.lt.f32.partialorder %v4761_v44, 0.5  ;;  %v2135_v43 = vadd.f32 %v2134_v1, %v2133_v18  ;;  %v2318_v0 = vadd.f32 %v2317_v52, %v2316_v6 }
 0x733   : > { %v2607_v3 = vadd.f32 %v2606_v12, %v2605_v4  ;;  %v2446_v28 = vmul.f32 5.0, %v2438_v14  ;;  %v2573_v39 = vsub.f32 %v4762_v29, %v2565_v20  ;;  %v2308_v35 = vadd.f32 %v2307_v17, %v2306_v19 }
 0x734   : > { %v2596_v16 = vrot.slane %v2595_v22, 1  ;;  %v2152_v26 = vsel %vm1334_vm0, %v2102_v55, 0.0  ;;  %v2136_v10 = vrot.slane %v2135_v43, 1  ;;  %v2319_v37 = vrot.slane %v2318_v0, 2  ;;  %v2281_v51 = vpop.permute.xlu2 %2280 }
 0x735   : > { %v2608_v2 = vrot.slane %v2607_v3, 2  ;;  %v2503_v47 = vrot.slane %v2446_v28, 6  ;;  %v2581_v30 = vand.u32 2147483647, %v2573_v39  ;;  %v2360_v32 = vsel %vm2352_vm12, 0.0, %v2308_v35  ;;  %v4764_v28 = vld [vmem:[#allocation14_spill] sm:$0xff] }
 0x736   : > { %vm3032_vm13 = vcmp.lt.s32.totalorder %v2360_v32, 0  ;;  %v3033_v45 = vceil.f32 %v2360_v32  ;;  %v3034_v58 = vfloor.f32 %v2360_v32  ;;  %v2137_v41 = vadd.f32 %v2136_v10, %v2135_v43 }
 0x737   : > { %v2609_v42 = vadd.f32 %v2608_v2, %v2607_v3  ;;  %v4551_v38 = vsel %vm2550_vm8, %v4495_v46, %v2503_v47  ;;  %v2626_v34 = vsel %vm2583_vm11, %v2581_v30, 0.0  ;;  %v2320_v59 = vadd.f32 %v2319_v37, %v2318_v0 }
 0x738   : > { %v2627_v13 = vrot.slane %v2626_v34, 4  ;;  %vm2354_vm14 = vcmp.lt.f32.partialorder %v4763_v56, 0.5  ;;  %v2153_v15 = vrot.slane %v2152_v26, 4  ;;  %v2293_v48 = vmul.f32 %v4307_v57, %v2281_v51 }
 0x739   : > { %v2169_v5 = vpop.permute.xlu1 %2168  ;;  %v3035_v9 = vsel %vm3032_vm13, %v3033_v45, %v3034_v58  ;;  %v2440_v53 = vsub.f32 %v2137_v41, %v4271_v33  ;;  %v2321_v40 = vrot.slane %v2320_v59, 1  ;;  %v2597_v19 = vadd.f32 %v2596_v16, %v2595_v22 }
 0x73a   : > { %v2193_v46 = vmul.f32 %v4189_v63, %v2169_v5  ;;  %v2628_v18 = vadd.f32 %v2627_v13, %v2626_v34  ;;  %v3036_v4 = vcvt.f32.s32 %v3035_v9  ;;  %v2154_v6 = vadd.f32 %v2153_v15, %v2152_v26 }
 0x73b   : > { %v2448_v61 = vmul.f32 5.0, %v2440_v53  ;;  %v2322_v12 = vadd.f32 %v2321_v40, %v2320_v59  ;;  %v2610_v8 = vrot.slane %v2609_v42, 1  ;;  %v2337_v14 = vsel %vm1334_vm0, %v2293_v48, 0.0  ;;  %v4765_v53 = vld [vmem:[#allocation6_spill] sm:$0xff] }
 0x73c   : > { %vm2376_vm15 = vcmp.ne.s32.totalorder %v3036_v4, 0  ;;  %vm2793_vm1 = vcmp.eq.s32.totalorder %v3788_v62, %v3036_v4  ;;  %v2155_v57 = vrot.slane %v2154_v6, 2  ;;  %v2213_v17 = vsel %vm1334_vm0, %v2193_v46, 0.0 }
 0x73d   : > { %v4562_v1 = vsel %vm2376_vm15, 1.0, %v4737_v25  ;;  %v3016_v52 = vsel %vm2793_vm1, 1.0, %v4737_v25  ;;  %v2505_v55 = vrot.slane %v2448_v61, 6  ;;  %v2362_v22 = vsel %vm2354_vm14, 0.0, %v2322_v12 }
 0x73e   : > { %v2629_v3 = vrot.slane %v2628_v18, 2  ;;  %v4568_v20 = vmul.f32 %v4562_v1, %v2597_v19  ;;  %v2817_v44 = vmul.f32 %v3016_v52, %v4764_v28  ;;  %vm3042_vm2 = vcmp.lt.s32.totalorder %v2362_v22, 0 }
 0x73f   : > { %v4573_v29 = vsel %vm2550_vm8, %v4517_v50, %v2505_v55  ;;  %v3043_v39 = vceil.f32 %v2362_v22  ;;  %v3044_v35 = vfloor.f32 %v2362_v22  ;;  %v2156_v43 = vadd.f32 %v2155_v57, %v2154_v6 }
 0x740   : > { %v4578_v0 = vmul.f32 1.442695, %v2703_v49  ;;  %v2830_v2 = vrot.slane %v2817_v44, 4  ;;  %v2338_v47 = vrot.slane %v2337_v14, 4  ;;  %v2214_v16 = vrot.slane %v2213_v17, 4 }
 0x741   : > { %v2177_v26 = vpop.permute.xlu1 %2176  ;;  %v2771_v30 = vmul.f32 0.6931472, %v3150_v31  ;;  %v3045_v32 = vsel %vm3042_vm2, %v3043_v39, %v3044_v35  ;;  %v2157_v10 = vrot.slane %v2156_v43, 1  ;;  %v2611_v45 = vadd.f32 %v2610_v8, %v2609_v42 }
 0x742   : > { %v2195_v37 = vmul.f32 %v4227_v24, %v2177_v26  ;;  %v2831_v51 = vadd.f32 %v2830_v2, %v2817_v44  ;;  %v3046_v50 = vcvt.f32.s32 %v3045_v32  ;;  %v2339_v34 = vadd.f32 %v2338_v47, %v2337_v14 }
 0x743   : > { %v2630_v58 = vadd.f32 %v2629_v3, %v2628_v18  ;;  %v2158_v41 = vadd.f32 %v2157_v10, %v2156_v43  ;;  %v2215_v59 = vadd.f32 %v2214_v16, %v2213_v17  ;;  %v4766_v18 = vld [vmem:[#allocation21_spill] sm:$0xff]  ;;  %3153 = vpow2.f32 %v4578_v0 }
 0x744   : > { %v2227_v13 = vsel %vm1334_vm0, %v2195_v37, 0.0  ;;  %v2832_v49 = vrot.slane %v2831_v51, 2  ;;  %vm2378_vm3 = vcmp.ne.s32.totalorder %v3046_v50, 0  ;;  %vm2795_vm4 = vcmp.eq.s32.totalorder %v3788_v62, %v3046_v50 }
 0x745   : > { %v2340_v56 = vrot.slane %v2339_v34, 2  ;;  %v4584_v31 = vsel %vm2378_vm3, 1.0, %v4737_v25  ;;  %v3018_v15 = vsel %vm2795_vm4, 1.0, %v4737_v25  ;;  %v2443_v48 = vsub.f32 %v2158_v41, %v4271_v33 }
 0x746   : > { %v2216_v5 = vrot.slane %v2215_v59, 2  ;;  %v2833_v42 = vadd.f32 %v2832_v49, %v2831_v51  ;;  %v4589_v9 = vmul.f32 %v4584_v31, %v2611_v45  ;;  %v2819_v40 = vmul.f32 %v3018_v15, %v4765_v53 }
 0x747   : > { %v2341_v46 = vadd.f32 %v2340_v56, %v2339_v34  ;;  %v2785_v4 = vadd.f32 %v2771_v30, %v4766_v18  ;;  %v2451_v19 = vmul.f32 5.0, %v2443_v48  ;;  %v2228_v61 = vrot.slane %v2227_v13, 4  ;;  %v4767_v18 = vld [vmem:[#allocation25_spill] sm:$0xff] }
 0x748   : > { %v2217_v6 = vadd.f32 %v2216_v5, %v2215_v59  ;;  %v2834_v12 = vrot.slane %v2833_v42, 1  ;;  %v2842_v8 = vrot.slane %v2819_v40, 4  ;;  %v2631_v44 = vrot.slane %v2630_v58, 1 }
 0x749   : > { %v2342_v14 = vrot.slane %v2341_v46, 1  ;;  %v2189_v57 = vpop.permute.xlu1 %2188  ;;  %v2508_v33 = vrot.slane %v2451_v19, 6  ;;  %v2229_v52 = vadd.f32 %v2228_v61, %v2227_v13  ;;  %v2744_v15 = vrot.slane %v4201_v7, 4 }
 0x74a   : > { %v2218_v17 = vrot.slane %v2217_v6, 1  ;;  %v2198_v55 = vmul.f32 %v4396_v60, %v2189_v57  ;;  %v2835_v22 = vadd.f32 %v2834_v12, %v2833_v42  ;;  %v2843_v3 = vadd.f32 %v2842_v8, %v2819_v40  ;;  %v3152_v12 = vpop.eup %3151 }
 0x74b   : > { %v2343_v28 = vadd.f32 %v2342_v14, %v2341_v46  ;;  %v4597_v39 = vsel %vm2550_vm8, %v4534_v36, %v2508_v33  ;;  %v2230_v43 = vrot.slane %v2229_v52, 2  ;;  %v2745_v8 = vadd.f32 %v4201_v7, %v2744_v15 }
 0x74c   : > { %v2219_v35 = vadd.f32 %v2218_v17, %v2217_v6  ;;  %v2248_v2 = vsel %vm1334_vm0, %v2198_v55, 0.0  ;;  %v2873_v47 = vsub.f32 %v2785_v4, %v2835_v22  ;;  %v2844_v16 = vrot.slane %v2843_v3, 2  ;;  %v4769_v6 = vld [vmem:[#allocation2_spill] sm:$0xff] }
 0x74d   : > { %v2365_v26 = vsel %vm2357_vm5, 0.0, %v2343_v28  ;;  %v2249_v30 = vrot.slane %v2248_v2, 4  ;;  %v2231_v50 = vadd.f32 %v2230_v43, %v2229_v52  ;;  %v3154_v28 = vpop.eup %3153 }
 0x74e   : > { %vm3057_vm7 = vcmp.lt.s32.totalorder %v2365_v26, 0  ;;  %v3058_v32 = vceil.f32 %v2365_v26  ;;  %v3059_v10 = vfloor.f32 %v2365_v26  ;;  %v2455_v37 = vsub.f32 %v2219_v35, %v4301_v21 }
 0x74f   : > { %v2881_v36 = vsel %vm2541_vm6, %v2873_v47, %v4562_v1  ;;  %v2845_v51 = vadd.f32 %v2844_v16, %v2843_v3  ;;  %v2250_v45 = vadd.f32 %v2249_v30, %v2248_v2  ;;  %v2232_v49 = vrot.slane %v2231_v50, 1 }
 0x750   : > { %v2889_v34 = vsel %vm2550_vm8, %v2881_v36, %v4568_v20  ;;  %v3060_v41 = vsel %vm3057_vm7, %v3058_v32, %v3059_v10  ;;  %v2463_v23 = vmul.f32 5.0, %v2455_v37  ;;  %v2632_v1 = vadd.f32 %v2631_v44, %v2630_v58  ;;  %v4768_v58 = vld [vmem:[#allocation8_spill] sm:$0xff] }
 0x751   : > { %2897 = vst [vmem:[%s4463_s11 + $0x4] sm:$0x7] %v2889_v34  ;;  %v2846_v59 = vrot.slane %v2845_v51, 1  ;;  %v3061_v13 = vcvt.f32.s32 %v3060_v41  ;;  %v2251_v56 = vrot.slane %v2250_v45, 2  ;;  %v2233_v27 = vadd.f32 %v2232_v49, %v2231_v50 }
 0x752   : > { %v2527_v48 = vrot.slane %v2463_v23, 5  ;;  %v2265_v5 = vpop.permute.xlu1 %2264  ;;  %v2746_v16 = vrot.slane %v2745_v8, 2  ;;  %v4772_v23 = vld [vmem:[#allocation5_spill] sm:$0xff] }
 0x753   : > { %v2847_v42 = vadd.f32 %v2846_v59, %v2845_v51  ;;  %vm2381_vm9 = vcmp.ne.s32.totalorder %v3061_v13, 0  ;;  %vm2798_vm10 = vcmp.eq.s32.totalorder %v3788_v62, %v3061_v13  ;;  %v2252_v46 = vadd.f32 %v2251_v56, %v2250_v45 }
 0x754   : > { %v4613_v20 = vsel %vm2381_vm9, 1.0, %v4737_v25  ;;  %v3021_v53 = vsel %vm2798_vm10, 1.0, %v4737_v25  ;;  %v2561_v40 = vsel %vm1334_vm0, %v4551_v38, %v2527_v48  ;;  %v2457_v14 = vsub.f32 %v2233_v27, %v4301_v21  ;;  %v4770_v38 = vld [vmem:[#allocation24_spill] sm:$0xff] }
 0x755   : > { %v2875_v4 = vsub.f32 %v4767_v18, %v2847_v42  ;;  %v4620_v0 = vmul.f32 %v4613_v20, %v2632_v1  ;;  %v2822_v19 = vmul.f32 %v3021_v53, %v4768_v58  ;;  %v2569_v61 = vsub.f32 %v4769_v6, %v2561_v40  ;;  %v4773_v27 = vld [vmem:[#allocation20_spill] sm:$0xff]  ;;  %v4774_v58 = vld [vmem:[#allocation7_spill] sm:$0xff] }
 0x756   : > { %v2253_v57 = vrot.slane %v2252_v46, 1  ;;  %v2289_v33 = vmul.f32 %v4189_v63, %v2265_v5  ;;  %v4771_v17 = vrot.slane %v4770_v38, 2  ;;  %v2465_v35 = vmul.f32 5.0, %v2457_v14 }
 0x757   : > { %v2883_v55 = vsel %vm2541_vm6, %v2875_v4, %v4584_v31  ;;  %v2860_v22 = vrot.slane %v2822_v19, 4  ;;  %v2577_v3 = vand.u32 2147483647, %v2569_v61  ;;  %v2781_v51 = vmul.f32 0.6931472, %v3152_v12 }
 0x758   : > { %v2735_v52 = vadd.f32 %v4771_v17, %v4770_v38  ;;  %v2891_v44 = vsel %vm2550_vm8, %v2883_v55, %v4589_v9  ;;  %v2254_v7 = vadd.f32 %v2253_v57, %v2252_v46  ;;  %v2309_v43 = vsel %vm1334_vm0, %v2289_v33, 0.0 }
 0x759   : > { %2899 = vst [vmem:[%s4463_s11 + $0xc] sm:$0x7] %v2891_v44  ;;  %v2861_v2 = vadd.f32 %v2860_v22, %v2822_v19  ;;  %v2598_v63 = vsel %vm2583_vm11, %v2577_v3, 0.0  ;;  %v2310_v47 = vrot.slane %v2309_v43, 4  ;;  %v2529_v30 = vrot.slane %v2465_v35, 5  ;;  %v4775_v22 = vld [vmem:[#allocation18_spill] sm:$0xff] }
 0x75a   : > { %v2599_v26 = vrot.slane %v2598_v63, 4  ;;  %v2460_v31 = vsub.f32 %v2254_v7, %v4301_v21  ;;  %v2273_v32 = vpop.permute.xlu1 %2272  ;;  %v2736_v10 = vrot.slane %v2735_v52, 1  ;;  %v2747_v56 = vadd.f32 %v2746_v16, %v2745_v8 }
 0x75b   : > { %v2862_v37 = vrot.slane %v2861_v2, 2  ;;  %v2311_v36 = vadd.f32 %v2310_v47, %v2309_v43  ;;  %v2291_v9 = vmul.f32 %v4227_v24, %v2273_v32  ;;  %v2563_v45 = vsel %vm1334_vm0, %v4573_v29, %v2529_v30 }
 0x75c   : > { %v2600_v50 = vadd.f32 %v2599_v26, %v2598_v63  ;;  %v2468_v34 = vmul.f32 5.0, %v2460_v31  ;;  %v2571_v59 = vsub.f32 %v4772_v23, %v2563_v45  ;;  %v2762_v21 = vrot.slane %v3154_v28, 4 }
 0x75d   : > { %v2863_v41 = vadd.f32 %v2862_v37, %v2861_v2  ;;  %v2312_v13 = vrot.slane %v2311_v36, 2  ;;  %v2323_v49 = vsel %vm1334_vm0, %v2291_v9, 0.0  ;;  %v2737_v48 = vadd.f32 %v2736_v10, %v2735_v52  ;;  %v4776_v9 = vld [vmem:[#allocation19_spill] sm:$0xff] }
 0x75e   : > { %v2532_v15 = vrot.slane %v2468_v34, 5  ;;  %v2324_v1 = vrot.slane %v2323_v49, 4  ;;  %v2579_v42 = vand.u32 2147483647, %v2571_v59  ;;  %v2790_v53 = vadd.f32 %v2781_v51, %v4773_v27 }
 0x75f   : > { %v2864_v5 = vrot.slane %v2863_v41, 1  ;;  %v2313_v24 = vadd.f32 %v2312_v13, %v2311_v36  ;;  %v2601_v40 = vrot.slane %v2600_v50, 2  ;;  %v2748_v61 = vrot.slane %v2747_v56, 1 }
 0x760   : > { %v2566_v29 = vsel %vm1334_vm0, %v4597_v39, %v2532_v15  ;;  %v2325_v46 = vadd.f32 %v2324_v1, %v2323_v49  ;;  %v2612_v4 = vsel %vm2583_vm11, %v2579_v42, 0.0  ;;  %v2763_v12 = vadd.f32 %v3154_v28, %v2762_v21  ;;  %v4777_v15 = vld [vmem:[#allocation9_spill] sm:$0xff] }
 0x761   : > { %v2865_v18 = vadd.f32 %v2864_v5, %v2863_v41  ;;  %v2574_v19 = vsub.f32 %v4774_v58, %v2566_v29  ;;  %v2314_v6 = vrot.slane %v2313_v24, 1  ;;  %v2613_v8 = vrot.slane %v2612_v4, 4 }
 0x762   : > { %v2326_v14 = vrot.slane %v2325_v46, 2  ;;  %v2285_v57 = vpop.permute.xlu1 %2284  ;;  %v2602_v55 = vadd.f32 %v2601_v40, %v2600_v50  ;;  %vm2353_vm12 = vcmp.lt.f32.partialorder %v4775_v22, 0.5  ;;  %v2764_v30 = vrot.slane %v2763_v12, 2 }
 0x763   : > { %v2878_v33 = vsub.f32 %v2790_v53, %v2865_v18  ;;  %v2582_v38 = vand.u32 2147483647, %v2574_v19  ;;  %v2315_v17 = vadd.f32 %v2314_v6, %v2313_v24  ;;  %v2294_v52 = vmul.f32 %v4396_v60, %v2285_v57  ;;  %v4779_v57 = vld [vmem:[#allocation15_spill] sm:$0xff] }
 0x764   : > { %v2614_v39 = vadd.f32 %v2613_v8, %v2612_v4  ;;  %v2327_v3 = vadd.f32 %v2326_v14, %v2325_v46  ;;  %v2603_v31 = vrot.slane %v2602_v55, 1  ;;  %3155 = vlog2.f32 %v2737_v48 }
 0x765   : > { %v2886_v44 = vsel %vm2541_vm6, %v2878_v33, %v4613_v20  ;;  %v2633_v35 = vsel %vm2583_vm11, %v2582_v38, 0.0  ;;  %v2361_v28 = vsel %vm2353_vm12, 0.0, %v2315_v17  ;;  %v2344_v7 = vsel %vm1334_vm0, %v2294_v52, 0.0 }
 0x766   : > { %v2894_v43 = vsel %vm2550_vm8, %v2886_v44, %v4620_v0  ;;  %v2615_v2 = vrot.slane %v2614_v39, 2  ;;  %v2634_v63 = vrot.slane %v2633_v35, 4  ;;  %vm3037_vm13 = vcmp.lt.s32.totalorder %v2361_v28, 0 }
 0x767   : > { %2902 = vst [vmem:[%s4463_s11 + $0x18] sm:$0x7] %v2894_v43  ;;  %v3038_v60 = vceil.f32 %v2361_v28  ;;  %v3039_v47 = vfloor.f32 %v2361_v28  ;;  %v2328_v16 = vrot.slane %v2327_v3, 1  ;;  %v2345_v26 = vrot.slane %v2344_v7, 4 }
 0x768   : > { %v2635_v37 = vadd.f32 %v2634_v63, %v2633_v35  ;;  %vm2355_vm0 = vcmp.lt.f32.partialorder %v4776_v9, 0.5  ;;  %v2749_v51 = vadd.f32 %v2748_v61, %v2747_v56  ;;  %v2616_v0 = vadd.f32 %v2615_v2, %v2614_v39  ;;  %v4780_v2 = vld [vmem:[#allocation22_spill] sm:$0xff] }
 0x769   : > { %v3040_v32 = vsel %vm3037_vm13, %v3038_v60, %v3039_v47  ;;  %v2329_v20 = vadd.f32 %v2328_v16, %v2327_v3  ;;  %v2346_v10 = vadd.f32 %v2345_v26, %v2344_v7  ;;  %v2765_v34 = vadd.f32 %v2764_v30, %v2763_v12  ;;  %v4778_v12 = vld [vmem:[#allocation26_spill] sm:$0xff] }
 0x76a   : > { %v3041_v36 = vcvt.f32.s32 %v3040_v32  ;;  %v2604_v41 = vadd.f32 %v2603_v31, %v2602_v55  ;;  %v2636_v49 = vrot.slane %v2635_v37, 2  ;;  %v2617_v56 = vrot.slane %v2616_v0, 1  ;;  %v3156_v42 = vpop.eup %3155 }
 0x76b   : > { %v2363_v50 = vsel %vm2355_vm0, 0.0, %v2329_v20  ;;  %v2347_v45 = vrot.slane %v2346_v10, 2  ;;  %3157 = vlog2.f32 %v2749_v51  ;;  %v2766_v29 = vrot.slane %v2765_v34, 1 }
 0x76c   : > { %vm2377_vm11 = vcmp.ne.s32.totalorder %v3041_v36, 0  ;;  %vm2794_vm14 = vcmp.eq.s32.totalorder %v3788_v62, %v3041_v36  ;;  %vm3047_vm15 = vcmp.lt.s32.totalorder %v2363_v50, 0  ;;  %v3048_v13 = vceil.f32 %v2363_v50 }
 0x76d   : > { %v3009_v23 = vsel %vm2377_vm11, 1.0, %v4737_v25  ;;  %v3017_v59 = vsel %vm2794_vm14, 1.0, %v4737_v25  ;;  %v3049_v48 = vfloor.f32 %v2363_v50  ;;  %v2348_v5 = vadd.f32 %v2347_v45, %v2346_v10 }
 0x76e   : > { %v2642_v21 = vmul.f32 %v3009_v23, %v2604_v41  ;;  %v2818_v1 = vmul.f32 %v3017_v59, %v4777_v15  ;;  %v2637_v46 = vadd.f32 %v2636_v49, %v2635_v37  ;;  %v2618_v4 = vadd.f32 %v2617_v56, %v2616_v0 }
 0x76f   : > { %v3050_v27 = vsel %vm3047_vm15, %v3048_v13, %v3049_v48  ;;  %v2349_v40 = vrot.slane %v2348_v5, 1  ;;  %vm2358_vm3 = vcmp.lt.f32.partialorder %v4778_v12, 0.5  ;;  %v2773_v8 = vmul.f32 0.6931472, %v3156_v42 }
 0x770   : > { %v2836_v24 = vrot.slane %v2818_v1, 4  ;;  %v3051_v53 = vcvt.f32.s32 %v3050_v27  ;;  %v2638_v22 = vrot.slane %v2637_v46, 1  ;;  %v2767_v44 = vadd.f32 %v2766_v29, %v2765_v34 }
 0x771   : > { %v2350_v58 = vadd.f32 %v2349_v40, %v2348_v5  ;;  %v3158_v3 = vpop.eup %3157  ;;  %v2786_v63 = vadd.f32 %v2773_v8, %v4780_v2 }
 0x772   : > { %v2837_v18 = vadd.f32 %v2836_v24, %v2818_v1  ;;  %vm2379_vm1 = vcmp.ne.s32.totalorder %v3051_v53, 0  ;;  %vm2796_vm2 = vcmp.eq.s32.totalorder %v3788_v62, %v3051_v53  ;;  %v2639_v16 = vadd.f32 %v2638_v22, %v2637_v46 }
 0x773   : > { %v3011_v6 = vsel %vm2379_vm1, 1.0, %v4737_v25  ;;  %v3019_v61 = vsel %vm2796_vm2, 1.0, %v4737_v25  ;;  %v2366_v38 = vsel %vm2358_vm3, 0.0, %v2350_v58  ;;  %3159 = vlog2.f32 %v2767_v44 }
 0x774   : > { %v2838_v19 = vrot.slane %v2837_v18, 2  ;;  %v2644_v14 = vmul.f32 %v3011_v6, %v2618_v4  ;;  %v2820_v33 = vmul.f32 %v3019_v61, %v4779_v57  ;;  %vm3062_vm4 = vcmp.lt.s32.totalorder %v2366_v38, 0 }
 0x775   : > { %v3063_v52 = vceil.f32 %v2366_v38  ;;  %v3064_v55 = vfloor.f32 %v2366_v38  ;;  %v2777_v32 = vmul.f32 0.6931472, %v3158_v3 }
 0x776   : > { %v2839_v17 = vadd.f32 %v2838_v19, %v2837_v18  ;;  %v2848_v39 = vrot.slane %v2820_v33, 4 }
 0x777   : > { %v3065_v28 = vsel %vm3062_vm4, %v3063_v52, %v3064_v55 }
 0x778   : > { %v2840_v35 = vrot.slane %v2839_v17, 1  ;;  %v2849_v7 = vadd.f32 %v2848_v39, %v2820_v33  ;;  %v3066_v43 = vcvt.f32.s32 %v3065_v28 }
 0x779   : > { %v3160_v41 = vpop.eup %3159 }
 0x77a   : > { %v2841_v60 = vadd.f32 %v2840_v35, %v2839_v17  ;;  %v2850_v47 = vrot.slane %v2849_v7, 2  ;;  %vm2382_vm5 = vcmp.ne.s32.totalorder %v3066_v43, 0  ;;  %vm2799_vm7 = vcmp.eq.s32.totalorder %v3788_v62, %v3066_v43  ;;  %v4781_v62 = vld [vmem:[#allocation23_spill] sm:$0xff] }
 0x77b   : > { %v3014_v30 = vsel %vm2382_vm5, 1.0, %v4737_v25  ;;  %v3022_v31 = vsel %vm2799_vm7, 1.0, %v4737_v25  ;;  %v2788_v50 = vadd.f32 %v2777_v32, %v4781_v62  ;;  %v2783_v13 = vmul.f32 0.6931472, %v3160_v41 }
 0x77c   : > { %v2874_v26 = vsub.f32 %v2786_v63, %v2841_v60  ;;  %v2851_v20 = vadd.f32 %v2850_v47, %v2849_v7  ;;  %v2647_v10 = vmul.f32 %v3014_v30, %v2639_v16  ;;  %v2823_v37 = vmul.f32 %v3022_v31, %v3683_v54 }
 0x77e   : > { %v2882_v36 = vsel %vm2541_vm6, %v2874_v26, %v3009_v23  ;;  %v2852_v51 = vrot.slane %v2851_v20, 1  ;;  %v2866_v0 = vrot.slane %v2823_v37, 4 }
 0x77f   : > { %v2890_v9 = vsel %vm2550_vm8, %v2882_v36, %v2642_v21  ;;  %v2791_v21 = vadd.f32 %v2783_v13, %v4520_v11 }
 0x780   : > { %2898 = vst [vmem:[%s4463_s11 + $0x8] sm:$0x7] %v2890_v9  ;;  %v2853_v45 = vadd.f32 %v2852_v51, %v2851_v20  ;;  %v2867_v34 = vadd.f32 %v2866_v0, %v2823_v37 }
 0x782   : > { %v2876_v25 = vsub.f32 %v2788_v50, %v2853_v45  ;;  %v2868_v59 = vrot.slane %v2867_v34, 2 }
 0x784   : > { %v2884_v49 = vsel %vm2541_vm6, %v2876_v25, %v3011_v6  ;;  %v2869_v54 = vadd.f32 %v2868_v59, %v2867_v34 }
 0x785   : > { %v2892_v15 = vsel %vm2550_vm8, %v2884_v49, %v2644_v14 }
 0x786   : > { %2900 = vst [vmem:[%s4463_s11 + $0x10] sm:$0x7] %v2892_v15  ;;  %v2870_v23 = vrot.slane %v2869_v54, 1 }
 0x788   : > { %v2871_v1 = vadd.f32 %v2870_v23, %v2869_v54 }
 0x78a   : > { %v2879_v48 = vsub.f32 %v2791_v21, %v2871_v1 }
 0x78c   : > { %v2887_v56 = vsel %vm2541_vm6, %v2879_v48, %v3014_v30 }
 0x78d   : > { %v2895_v5 = vsel %vm2550_vm8, %v2887_v56, %v2647_v10 }
 0x78e   : > { %2903 = vst [vmem:[%s4463_s11 + $0x1c] sm:$0x7] %v2895_v5 }
 0x78f PF: > { %s14_s15 = sadd.s32 1, %s3176_s15  }
 0x790   : > { %p11_p4 = scmp.ge.s32.totalorder %s14_s15, 4  }
 0x792   :  { %13 = sbr.rel (!%p11_p4) target bundleno = 1 (0x1), region = 72 }

</bundles_post_ra>
